<compile_context>
chip_gen: v7x
topology: tpu7x:2x2x1
jax: 0.10.0
libtpu: 0.0.40
codegen_flags: <defaults>
</compile_context>

<pallas_src>
import functools
import math

import jax
import jax.numpy as jnp
import numpy as np
from jax.experimental import pallas as pl
from jax.experimental.pallas import tpu as pltpu


# ----------------------------------------------------------------------------
# Kernel 1: ConvTranspose2d(kernel=2, stride=2) + bias  (upconv)
# ----------------------------------------------------------------------------
def _upconv2x2_kernel(x_ref, w_ref, b_ref, o_ref):
    """x: (H, W, Cin) bf16 full image (batch squeezed);
    w: (2, Cin, 2*Cout) bf16 with columns ordered kj*Cout + co;
    b: (1, 2*Cout) f32; o: (2H, W, 2*Cout) bf16.
    out[2i+ki, j, kj*Cout+co] = sum_ci x[i,j,ci] * w[ki,kj,ci,co] + b[co]."""
    H, W, _ = x_ref.shape
    two_cout = o_ref.shape[-1]
    bias = b_ref[...] + jnp.zeros((W, two_cout), jnp.float32)  # hoisted broadcast

    @pl.loop(0, H)
    def _(i):
        x_row = x_ref[i]                                   # (W, Cin) bf16
        for ki in range(2):
            z = jnp.dot(x_row, w_ref[ki],
                        preferred_element_type=jnp.float32) + bias
            o_ref[2 * i + ki] = z.astype(o_ref.dtype)


def upconv2x2(x, w, b):
    """ConvTranspose2d(2, 2). x: (N,H,W,Cin) -> (N,2H,2W,Cout) bf16."""
    N, H, W, Cin = x.shape
    Cout = w.shape[-1]
    w_cat = (jnp.transpose(w, (0, 2, 1, 3))
             .reshape(2, Cin, 2 * Cout).astype(jnp.bfloat16))
    b2 = jnp.tile(b, 2).reshape(1, 2 * Cout).astype(jnp.float32)

    flops = 2 * N * H * W * Cin * 4 * Cout
    bytes_accessed = (2 * N * H * W * Cin + 2 * 4 * Cin * Cout
                      + 2 * N * 4 * H * W * Cout + 4 * 2 * Cout)

    y = pl.pallas_call(
        _upconv2x2_kernel,
        out_shape=jax.ShapeDtypeStruct((N, 2 * H, W, 2 * Cout), jnp.bfloat16),
        grid=(N,),
        in_specs=[
            pl.BlockSpec((None, H, W, Cin), lambda n: (n, 0, 0, 0)),
            pl.BlockSpec((2, Cin, 2 * Cout), lambda n: (0, 0, 0)),
            pl.BlockSpec((1, 2 * Cout), lambda n: (0, 0)),
        ],
        out_specs=pl.BlockSpec((None, 2 * H, W, 2 * Cout),
                               lambda n: (n, 0, 0, 0)),
        compiler_params=pltpu.CompilerParams(dimension_semantics=("parallel",)),
        cost_estimate=pl.CostEstimate(flops=flops, transcendentals=0,
                                      bytes_accessed=bytes_accessed),
    )(x.astype(jnp.bfloat16), w_cat, b2)
    # Free reshape: (N, 2H, W, 2*Cout) row-major == (N, 2H, 2W, Cout).
    return y.reshape(N, 2 * H, 2 * W, Cout)


# ----------------------------------------------------------------------------
# Kernel 2: fused decoder Block:
#   conv1( concat[u, CenterCrop(enc)] ) + ReLU + conv2   (both 3x3 valid)
# The concat is never materialized: the conv1 weight is split along its input
# channels and the encoder crop is applied via static (top,left) offsets.
# ----------------------------------------------------------------------------
def _block_kernel(u_ref, e_ref, w1u_ref, w1e_ref, b1_ref, w2_ref, b2_ref,
                  o_ref, y1_ref, *, off_e):
    """u: (Hu, Wu, Cu) bf16 upconv output; e: (He, We, Ce) bf16 encoder feature;
    w1u: (9, Cu, Cout) bf16; w1e: (9, Ce, Cout) bf16; w2: (9, Cout, Cout) bf16;
    b1/b2: (1, Cout) f32; o: (Ho2, Wo2, Cout); y1 scratch: (Ho1, Wo1, Cout) bf16.
    off_e = (top, left): static CenterCrop offset of enc relative to u."""
    Ho1, Wo1, Cout = y1_ref.shape
    Ho2, Wo2, _ = o_ref.shape
    te, le = off_e

    bias1 = b1_ref[...] + jnp.zeros((Wo1, Cout), jnp.float32)
    bias2 = b2_ref[...] + jnp.zeros((Wo2, Cout), jnp.float32)

    # conv1 + ReLU  (accumulate the 9 taps of both channel groups per row)
    @pl.loop(0, Ho1)
    def _(i):
        acc = bias1
        for ki in range(3):
            u_row = u_ref[i + ki]                      # (Wu, Cu) bf16
            e_row = e_ref[i + te + ki]                 # (We, Ce) bf16
            for kj in range(3):
                acc = acc + jnp.dot(u_row[kj:kj + Wo1, :], w1u_ref[ki * 3 + kj],
                                    preferred_element_type=jnp.float32)
                acc = acc + jnp.dot(e_row[le + kj:le + kj + Wo1, :],
                                    w1e_ref[ki * 3 + kj],
                                    preferred_element_type=jnp.float32)
        y1_ref[i] = jnp.maximum(acc, 0.0).astype(jnp.bfloat16)

    # conv2 from the VMEM-resident conv1 activation
    @pl.loop(0, Ho2)
    def _(i):
        acc = bias2
        for ki in range(3):
            y_row = y1_ref[i + ki]                     # (Wo1, Cout) bf16
            for kj in range(3):
                acc = acc + jnp.dot(y_row[kj:kj + Wo2, :], w2_ref[ki * 3 + kj],
                                    preferred_element_type=jnp.float32)
        o_ref[i] = acc.astype(o_ref.dtype)


def dec_block(u, enc, p, *, out_dtype):
    """Fused Block forward on NHWC tensors. u: (N,Hu,Wu,Cu), enc: (N,He,We,Ce)."""
    N, Hu, Wu, Cu = u.shape
    _, He, We, Ce = enc.shape
    Cout = p["c1_w"].shape[-1]
    Ho1, Wo1 = Hu - 2, Wu - 2
    Ho2, Wo2 = Ho1 - 2, Wo1 - 2
    te, le = _center_crop_offsets((He, We), (Hu, Wu))

    w1 = p["c1_w"]                                     # (3, 3, Cu + Ce, Cout)
    w1u = w1[:, :, :Cu, :].reshape(9, Cu, Cout).astype(jnp.bfloat16)
    w1e = w1[:, :, Cu:, :].reshape(9, Ce, Cout).astype(jnp.bfloat16)
    b1 = p["c1_b"].reshape(1, Cout).astype(jnp.float32)
    w2 = p["c2_w"].reshape(9, Cout, Cout).astype(jnp.bfloat16)
    b2 = p["c2_b"].reshape(1, Cout).astype(jnp.float32)

    flops = (2 * N * Ho1 * Wo1 * 9 * (Cu + Ce) * Cout
             + 2 * N * Ho2 * Wo2 * 9 * Cout * Cout)
    out_bytes = np.dtype(out_dtype).itemsize
    bytes_accessed = (2 * N * (Hu * Wu * Cu + He * We * Ce)
                      + 2 * 9 * (Cu + Ce + Cout) * Cout + 8 * Cout
                      + out_bytes * N * Ho2 * Wo2 * Cout)

    kern = functools.partial(_block_kernel, off_e=(te, le))
    return pl.pallas_call(
        kern,
        out_shape=jax.ShapeDtypeStruct((N, Ho2, Wo2, Cout), out_dtype),
        grid=(N,),
        in_specs=[
            pl.BlockSpec((None, Hu, Wu, Cu), lambda n: (n, 0, 0, 0)),
            pl.BlockSpec((None, He, We, Ce), lambda n: (n, 0, 0, 0)),
            pl.BlockSpec((9, Cu, Cout), lambda n: (0, 0, 0)),
            pl.BlockSpec((9, Ce, Cout), lambda n: (0, 0, 0)),
            pl.BlockSpec((1, Cout), lambda n: (0, 0)),
            pl.BlockSpec((9, Cout, Cout), lambda n: (0, 0, 0)),
            pl.BlockSpec((1, Cout), lambda n: (0, 0)),
        ],
        out_specs=pl.BlockSpec((None, Ho2, Wo2, Cout), lambda n: (n, 0, 0, 0)),
        scratch_shapes=[pltpu.VMEM((Ho1, Wo1, Cout), jnp.bfloat16)],
        compiler_params=pltpu.CompilerParams(dimension_semantics=("parallel",)),
        cost_estimate=pl.CostEstimate(flops=flops, transcendentals=0,
                                      bytes_accessed=int(bytes_accessed)),
    )(u.astype(jnp.bfloat16), enc.astype(jnp.bfloat16),
      w1u, w1e, b1, w2, b2)


# ----------------------------------------------------------------------------
# Decoder forward (NHWC internally, NCHW at the boundary)
# ----------------------------------------------------------------------------
def _center_crop_offsets(src_hw, dst_hw):
    """torchvision CenterCrop offsets (static Python ints)."""
    top = int(round((src_hw[0] - dst_hw[0]) / 2.0))
    left = int(round((src_hw[1] - dst_hw[1]) / 2.0))
    return top, left


def _decoder_nhwc(x, encoder_features, params):
    n_stages = len(params)
    for s, (p, enc) in enumerate(zip(params, encoder_features)):
        u = upconv2x2(x, p["up_w"], p["up_b"])
        out_dtype = jnp.float32 if s == n_stages - 1 else jnp.bfloat16
        x = dec_block(u, enc, p, out_dtype=out_dtype)
    return x


def decoder_forward(x_nchw, encoder_features_nchw, params):
    # Boundary transposes stay in XLA; activations are carried as bf16.
    x = jnp.transpose(x_nchw, (0, 2, 3, 1)).astype(jnp.bfloat16)
    encs = [jnp.transpose(e, (0, 2, 3, 1)).astype(jnp.bfloat16)
            for e in encoder_features_nchw]
    y = _decoder_nhwc(x, encs, params)
    return jnp.transpose(y, (0, 3, 1, 2))


# ----------------------------------------------------------------------------
# Pure-JAX reference (same bf16-operand / f32-accumulate quantization)
# ----------------------------------------------------------------------------
def _ref_upconv2x2(x, w, b):
    y = jnp.einsum("nhwc,ijcd->nhiwjd",
                   x.astype(jnp.bfloat16), w.astype(jnp.bfloat16),
                   preferred_element_type=jnp.float32)
    n, h, _, wd, _, cout = y.shape
    return y.reshape(n, 2 * h, 2 * wd, cout) + b


def _ref_conv3x3(x, w, b, *, relu):
    n, h, wd, c = x.shape
    ho, wo = h - 2, wd - 2
    acc = jnp.zeros((n, ho, wo, w.shape[-1]), jnp.float32)
    for ki in range(3):
        for kj in range(3):
            acc = acc + jnp.einsum(
                "nhwc,cd->nhwd",
                x[:, ki:ki + ho, kj:kj + wo, :].astype(jnp.bfloat16),
                w[ki, kj].astype(jnp.bfloat16),
                preferred_element_type=jnp.float32)
    acc = acc + b
    return jnp.maximum(acc, 0.0) if relu else acc


def _ref_center_crop(x, th, tw):
    top, left = _center_crop_offsets(x.shape[1:3], (th, tw))
    return x[:, top:top + th, left:left + tw, :]


def decoder_forward_ref(x_nchw, encoder_features_nchw, params):
    x = jnp.transpose(x_nchw, (0, 2, 3, 1))
    encs = [jnp.transpose(e, (0, 2, 3, 1)) for e in encoder_features_nchw]
    for p, enc in zip(params, encs):
        x = _ref_upconv2x2(x, p["up_w"], p["up_b"])
        enc_c = _ref_center_crop(enc, x.shape[1], x.shape[2])
        xc = jnp.concatenate([x, enc_c], axis=-1)
        x = _ref_conv3x3(xc, p["c1_w"], p["c1_b"], relu=True)
        x = _ref_conv3x3(x, p["c2_w"], p["c2_b"], relu=False)
    return jnp.transpose(x, (0, 3, 1, 2))


# ----------------------------------------------------------------------------
# Deterministic parameter init (synthetic; mirrors the PyTorch module's shapes)
# ----------------------------------------------------------------------------
def init_decoder_params(key, chs):
    params = []
    for i in range(len(chs) - 1):
        cin, cout = chs[i], chs[i + 1]
        key, k1, k2, k3, k4, k5, k6 = jax.random.split(key, 7)
        s_up = 1.0 / math.sqrt(cin * 2 * 2)
        s_c1 = 1.0 / math.sqrt(cin * 3 * 3)
        s_c2 = 1.0 / math.sqrt(cout * 3 * 3)
        params.append(dict(
            up_w=jax.random.uniform(k1, (2, 2, cin, cout), jnp.float32, -s_up, s_up),
            up_b=jax.random.uniform(k2, (cout,), jnp.float32, -s_up, s_up),
            c1_w=jax.random.uniform(k3, (3, 3, cin, cout), jnp.float32, -s_c1, s_c1),
            c1_b=jax.random.uniform(k4, (cout,), jnp.float32, -s_c1, s_c1),
            c2_w=jax.random.uniform(k5, (3, 3, cout, cout), jnp.float32, -s_c2, s_c2),
            c2_b=jax.random.uniform(k6, (cout,), jnp.float32, -s_c2, s_c2),
        ))
    return params


# ----------------------------------------------------------------------------
if __name__ == "__main__":
    # Small, decoder-consistent shapes: chs=(32,16,8) instead of (1024,...,64).
    chs = (32, 16, 8)
    key = jax.random.PRNGKey(0)
    key, kx, ke0, ke1, kp = jax.random.split(key, 5)

    # x: bottleneck feature map (NCHW); encoder features per stage (NCHW).
    x = jax.random.normal(kx, (2, chs[0], 8, 8), jnp.float32)
    enc0 = jax.random.normal(ke0, (2, chs[1], 20, 20), jnp.float32)   # -> crop 16x16
    enc1 = jax.random.normal(ke1, (2, chs[2], 28, 28), jnp.float32)   # -> crop 24x24
    encoder_features = [enc0, enc1]

    params = init_decoder_params(kp, chs)

    fwd = jax.jit(decoder_forward)
    out = jax.block_until_ready(fwd(x, encoder_features, params))

    # Expected: 8x8 ->up 16 ->conv 14 ->conv 12 ->up 24 ->conv 22 ->conv 20
    assert out.shape == (2, chs[-1], 20, 20), out.shape

    ref = jax.block_until_ready(
        jax.jit(decoder_forward_ref)(x, encoder_features, params))
    # Both paths use bf16 matmul operands with f32 accumulation; remaining
    # differences are accumulation-order / bf16 intermediate rounding only.
    np.testing.assert_allclose(np.asarray(out), np.asarray(ref),
                               rtol=3e-2, atol=3e-2)

    print("KERNEL_OK")
</pallas_src>

<mosaic_0001>
module attributes {stable_mosaic.version = 11 : i64} {
  func.func @_upconv2x2_kernel(%arg0: i32, %arg1: memref<1x8x8x32xbf16, #tpu.memory_space<vmem>>, %arg2: memref<2x32x32xbf16, #tpu.memory_space<vmem>>, %arg3: memref<1x32xf32, #tpu.memory_space<vmem>>, %arg4: memref<1x16x8x32xbf16, #tpu.memory_space<vmem>>) attributes {dimension_semantics = [#tpu.dimension_semantics<parallel>], iteration_bounds = array<i64: 2>, scalar_prefetch = 0 : i64, scratch_operands = 0 : i64, tpu.core_type = #tpu.core_type<tc>, window_params = [{transform_indices = @transform_0, window_bounds = array<i64: 1, 8, 8, 32>}, {pipeline_mode = #tpu.pipeline_mode<synchronous>, transform_indices = @transform_1, window_bounds = array<i64: 2, 32, 32>}, {pipeline_mode = #tpu.pipeline_mode<synchronous>, transform_indices = @transform_2, window_bounds = array<i64: 1, 32>}, {transform_indices = @transform_3, window_bounds = array<i64: 1, 16, 8, 32>}]} {
    %c0 = arith.constant 0 : index
    %c0_0 = arith.constant 0 : index
    %0 = vector.load %arg3[%c0, %c0_0] : memref<1x32xf32, #tpu.memory_space<vmem>>, vector<1x32xf32>
    %cst = arith.constant 0.000000e+00 : f32
    %1 = vector.broadcast %cst : f32 to vector<8x32xf32>
    %2 = vector.broadcast %0 : vector<1x32xf32> to vector<8x32xf32>
    %3 = arith.addf %2, %1 : vector<8x32xf32>
    %c0_i32 = arith.constant 0 : i32
    %c8_i32 = arith.constant 8 : i32
    %4 = arith.addi %c0_i32, %c8_i32 : i32
    %c1_i32 = arith.constant 1 : i32
    scf.for %arg5 = %c0_i32 to %4 step %c1_i32  : i32 {
      %c1_i32_2 = arith.constant 1 : i32
      %5 = arith.muli %arg5, %c1_i32_2 : i32
      %c0_i32_3 = arith.constant 0 : i32
      %6 = arith.addi %c0_i32_3, %5 : i32
      %c0_4 = arith.constant 0 : index
      %7 = arith.index_cast %6 : i32 to index
      %c0_5 = arith.constant 0 : index
      %c0_6 = arith.constant 0 : index
      %8 = vector.load %arg1[%c0_4, %7, %c0_5, %c0_6] : memref<1x8x8x32xbf16, #tpu.memory_space<vmem>>, vector<1x1x8x32xbf16>
      %9 = vector.shape_cast %8 : vector<1x1x8x32xbf16> to vector<8x32xbf16>
      %c0_7 = arith.constant 0 : index
      %c0_8 = arith.constant 0 : index
      %c0_9 = arith.constant 0 : index
      %10 = vector.load %arg2[%c0_7, %c0_8, %c0_9] : memref<2x32x32xbf16, #tpu.memory_space<vmem>>, vector<1x32x32xbf16>
      %11 = vector.shape_cast %10 : vector<1x32x32xbf16> to vector<32x32xbf16>
      %cst_10 = arith.constant dense<0.000000e+00> : vector<8x32xf32>
      %12 = tpu.matmul %9, %11, %cst_10 {dimension_numbers = #tpu.dot_dimension_numbers<[1], [0], [0], [1], [0, 0, 1, 1], [], []>} : vector<8x32xbf16>, vector<32x32xbf16>, vector<8x32xf32> -> vector<8x32xf32>
      %13 = arith.addf %12, %3 : vector<8x32xf32>
      %14 = arith.truncf %13 : vector<8x32xf32> to vector<8x32xbf16>
      %c2_i32 = arith.constant 2 : i32
      %15 = arith.muli %c2_i32, %6 : i32
      %c0_i32_11 = arith.constant 0 : i32
      %16 = arith.addi %15, %c0_i32_11 : i32
      %c0_12 = arith.constant 0 : index
      %17 = arith.index_cast %16 : i32 to index
      %c0_13 = arith.constant 0 : index
      %c0_14 = arith.constant 0 : index
      %18 = vector.load %arg4[%c0_12, %17, %c0_13, %c0_14] : memref<1x16x8x32xbf16, #tpu.memory_space<vmem>>, vector<1x1x8x32xbf16>
      %19 = vector.shape_cast %18 : vector<1x1x8x32xbf16> to vector<8x32xbf16>
      %20 = vector.shape_cast %14 : vector<8x32xbf16> to vector<1x1x8x32xbf16>
      tpu.vector_store %arg4[%c0_12, %17, %c0_13, %c0_14], %20 {strides = array<i32>} : memref<1x16x8x32xbf16, #tpu.memory_space<vmem>>, vector<1x1x8x32xbf16>,
      %c1 = arith.constant 1 : index
      %c0_15 = arith.constant 0 : index
      %c0_16 = arith.constant 0 : index
      %21 = vector.load %arg2[%c1, %c0_15, %c0_16] : memref<2x32x32xbf16, #tpu.memory_space<vmem>>, vector<1x32x32xbf16>
      %22 = vector.shape_cast %21 : vector<1x32x32xbf16> to vector<32x32xbf16>
      %cst_17 = arith.constant dense<0.000000e+00> : vector<8x32xf32>
      %23 = tpu.matmul %9, %22, %cst_17 {dimension_numbers = #tpu.dot_dimension_numbers<[1], [0], [0], [1], [0, 0, 1, 1], [], []>} : vector<8x32xbf16>, vector<32x32xbf16>, vector<8x32xf32> -> vector<8x32xf32>
      %24 = arith.addf %23, %3 : vector<8x32xf32>
      %25 = arith.truncf %24 : vector<8x32xf32> to vector<8x32xbf16>
      %c2_i32_18 = arith.constant 2 : i32
      %26 = arith.muli %c2_i32_18, %6 : i32
      %c1_i32_19 = arith.constant 1 : i32
      %27 = arith.addi %26, %c1_i32_19 : i32
      %c0_20 = arith.constant 0 : index
      %28 = arith.index_cast %27 : i32 to index
      %c0_21 = arith.constant 0 : index
      %c0_22 = arith.constant 0 : index
      %29 = vector.load %arg4[%c0_20, %28, %c0_21, %c0_22] : memref<1x16x8x32xbf16, #tpu.memory_space<vmem>>, vector<1x1x8x32xbf16>
      %30 = vector.shape_cast %29 : vector<1x1x8x32xbf16> to vector<8x32xbf16>
      %31 = vector.shape_cast %25 : vector<8x32xbf16> to vector<1x1x8x32xbf16>
      tpu.vector_store %arg4[%c0_20, %28, %c0_21, %c0_22], %31 {strides = array<i32>} : memref<1x16x8x32xbf16, #tpu.memory_space<vmem>>, vector<1x1x8x32xbf16>,
    }
    %c8_i32_1 = arith.constant 8 : i32
    return
  }
  func.func @transform_0(%arg0: i32) -> (i32, i32, i32, i32) {
    %c0_i32 = arith.constant 0 : i32
    %c0_i32_0 = arith.constant 0 : i32
    %c0_i32_1 = arith.constant 0 : i32
    %c0_i32_2 = arith.constant 0 : i32
    return %arg0, %c0_i32, %c0_i32_0, %c0_i32_1 : i32, i32, i32, i32
  }
  func.func @transform_1(%arg0: i32) -> (i32, i32, i32) {
    %c0_i32 = arith.constant 0 : i32
    %c0_i32_0 = arith.constant 0 : i32
    %c0_i32_1 = arith.constant 0 : i32
    %c0_i32_2 = arith.constant 0 : i32
    return %c0_i32, %c0_i32_0, %c0_i32_1 : i32, i32, i32
  }
  func.func @transform_2(%arg0: i32) -> (i32, i32) {
    %c0_i32 = arith.constant 0 : i32
    %c0_i32_0 = arith.constant 0 : i32
    %c0_i32_1 = arith.constant 0 : i32
    return %c0_i32, %c0_i32_0 : i32, i32
  }
  func.func @transform_3(%arg0: i32) -> (i32, i32, i32, i32) {
    %c0_i32 = arith.constant 0 : i32
    %c0_i32_0 = arith.constant 0 : i32
    %c0_i32_1 = arith.constant 0 : i32
    %c0_i32_2 = arith.constant 0 : i32
    return %arg0, %c0_i32, %c0_i32_0, %c0_i32_1 : i32, i32, i32, i32
  }
}

module attributes {stable_mosaic.version = 11 : i64} {
  func.func @_upconv2x2_kernel(%arg0: i32, %arg1: memref<1x12x12x16xbf16, #tpu.memory_space<vmem>>, %arg2: memref<2x16x16xbf16, #tpu.memory_space<vmem>>, %arg3: memref<1x16xf32, #tpu.memory_space<vmem>>, %arg4: memref<1x24x12x16xbf16, #tpu.memory_space<vmem>>) attributes {dimension_semantics = [#tpu.dimension_semantics<parallel>], iteration_bounds = array<i64: 2>, scalar_prefetch = 0 : i64, scratch_operands = 0 : i64, tpu.core_type = #tpu.core_type<tc>, window_params = [{transform_indices = @transform_0, window_bounds = array<i64: 1, 12, 12, 16>}, {pipeline_mode = #tpu.pipeline_mode<synchronous>, transform_indices = @transform_1, window_bounds = array<i64: 2, 16, 16>}, {pipeline_mode = #tpu.pipeline_mode<synchronous>, transform_indices = @transform_2, window_bounds = array<i64: 1, 16>}, {transform_indices = @transform_3, window_bounds = array<i64: 1, 24, 12, 16>}]} {
    %c0 = arith.constant 0 : index
    %c0_0 = arith.constant 0 : index
    %0 = vector.load %arg3[%c0, %c0_0] : memref<1x16xf32, #tpu.memory_space<vmem>>, vector<1x16xf32>
    %cst = arith.constant 0.000000e+00 : f32
    %1 = vector.broadcast %cst : f32 to vector<12x16xf32>
    %2 = vector.broadcast %0 : vector<1x16xf32> to vector<12x16xf32>
    %3 = arith.addf %2, %1 : vector<12x16xf32>
    %c0_i32 = arith.constant 0 : i32
    %c12_i32 = arith.constant 12 : i32
    %4 = arith.addi %c0_i32, %c12_i32 : i32
    %c1_i32 = arith.constant 1 : i32
    scf.for %arg5 = %c0_i32 to %4 step %c1_i32  : i32 {
      %c1_i32_2 = arith.constant 1 : i32
      %5 = arith.muli %arg5, %c1_i32_2 : i32
      %c0_i32_3 = arith.constant 0 : i32
      %6 = arith.addi %c0_i32_3, %5 : i32
      %c0_4 = arith.constant 0 : index
      %7 = arith.index_cast %6 : i32 to index
      %c0_5 = arith.constant 0 : index
      %c0_6 = arith.constant 0 : index
      %8 = vector.load %arg1[%c0_4, %7, %c0_5, %c0_6] : memref<1x12x12x16xbf16, #tpu.memory_space<vmem>>, vector<1x1x12x16xbf16>
      %9 = vector.shape_cast %8 : vector<1x1x12x16xbf16> to vector<12x16xbf16>
      %c0_7 = arith.constant 0 : index
      %c0_8 = arith.constant 0 : index
      %c0_9 = arith.constant 0 : index
      %10 = vector.load %arg2[%c0_7, %c0_8, %c0_9] : memref<2x16x16xbf16, #tpu.memory_space<vmem>>, vector<1x16x16xbf16>
      %11 = vector.shape_cast %10 : vector<1x16x16xbf16> to vector<16x16xbf16>
      %cst_10 = arith.constant dense<0.000000e+00> : vector<12x16xf32>
      %12 = tpu.matmul %9, %11, %cst_10 {dimension_numbers = #tpu.dot_dimension_numbers<[1], [0], [0], [1], [0, 0, 1, 1], [], []>} : vector<12x16xbf16>, vector<16x16xbf16>, vector<12x16xf32> -> vector<12x16xf32>
      %13 = arith.addf %12, %3 : vector<12x16xf32>
      %14 = arith.truncf %13 : vector<12x16xf32> to vector<12x16xbf16>
      %c2_i32 = arith.constant 2 : i32
      %15 = arith.muli %c2_i32, %6 : i32
      %c0_i32_11 = arith.constant 0 : i32
      %16 = arith.addi %15, %c0_i32_11 : i32
      %c0_12 = arith.constant 0 : index
      %17 = arith.index_cast %16 : i32 to index
      %c0_13 = arith.constant 0 : index
      %c0_14 = arith.constant 0 : index
      %18 = vector.load %arg4[%c0_12, %17, %c0_13, %c0_14] : memref<1x24x12x16xbf16, #tpu.memory_space<vmem>>, vector<1x1x12x16xbf16>
      %19 = vector.shape_cast %18 : vector<1x1x12x16xbf16> to vector<12x16xbf16>
      %20 = vector.shape_cast %14 : vector<12x16xbf16> to vector<1x1x12x16xbf16>
      tpu.vector_store %arg4[%c0_12, %17, %c0_13, %c0_14], %20 {strides = array<i32>} : memref<1x24x12x16xbf16, #tpu.memory_space<vmem>>, vector<1x1x12x16xbf16>,
      %c1 = arith.constant 1 : index
      %c0_15 = arith.constant 0 : index
      %c0_16 = arith.constant 0 : index
      %21 = vector.load %arg2[%c1, %c0_15, %c0_16] : memref<2x16x16xbf16, #tpu.memory_space<vmem>>, vector<1x16x16xbf16>
      %22 = vector.shape_cast %21 : vector<1x16x16xbf16> to vector<16x16xbf16>
      %cst_17 = arith.constant dense<0.000000e+00> : vector<12x16xf32>
      %23 = tpu.matmul %9, %22, %cst_17 {dimension_numbers = #tpu.dot_dimension_numbers<[1], [0], [0], [1], [0, 0, 1, 1], [], []>} : vector<12x16xbf16>, vector<16x16xbf16>, vector<12x16xf32> -> vector<12x16xf32>
      %24 = arith.addf %23, %3 : vector<12x16xf32>
      %25 = arith.truncf %24 : vector<12x16xf32> to vector<12x16xbf16>
      %c2_i32_18 = arith.constant 2 : i32
      %26 = arith.muli %c2_i32_18, %6 : i32
      %c1_i32_19 = arith.constant 1 : i32
      %27 = arith.addi %26, %c1_i32_19 : i32
      %c0_20 = arith.constant 0 : index
      %28 = arith.index_cast %27 : i32 to index
      %c0_21 = arith.constant 0 : index
      %c0_22 = arith.constant 0 : index
      %29 = vector.load %arg4[%c0_20, %28, %c0_21, %c0_22] : memref<1x24x12x16xbf16, #tpu.memory_space<vmem>>, vector<1x1x12x16xbf16>
      %30 = vector.shape_cast %29 : vector<1x1x12x16xbf16> to vector<12x16xbf16>
      %31 = vector.shape_cast %25 : vector<12x16xbf16> to vector<1x1x12x16xbf16>
      tpu.vector_store %arg4[%c0_20, %28, %c0_21, %c0_22], %31 {strides = array<i32>} : memref<1x24x12x16xbf16, #tpu.memory_space<vmem>>, vector<1x1x12x16xbf16>,
    }
    %c12_i32_1 = arith.constant 12 : i32
    return
  }
  func.func @transform_0(%arg0: i32) -> (i32, i32, i32, i32) {
    %c0_i32 = arith.constant 0 : i32
    %c0_i32_0 = arith.constant 0 : i32
    %c0_i32_1 = arith.constant 0 : i32
    %c0_i32_2 = arith.constant 0 : i32
    return %arg0, %c0_i32, %c0_i32_0, %c0_i32_1 : i32, i32, i32, i32
  }
  func.func @transform_1(%arg0: i32) -> (i32, i32, i32) {
    %c0_i32 = arith.constant 0 : i32
    %c0_i32_0 = arith.constant 0 : i32
    %c0_i32_1 = arith.constant 0 : i32
    %c0_i32_2 = arith.constant 0 : i32
    return %c0_i32, %c0_i32_0, %c0_i32_1 : i32, i32, i32
  }
  func.func @transform_2(%arg0: i32) -> (i32, i32) {
    %c0_i32 = arith.constant 0 : i32
    %c0_i32_0 = arith.constant 0 : i32
    %c0_i32_1 = arith.constant 0 : i32
    return %c0_i32, %c0_i32_0 : i32, i32
  }
  func.func @transform_3(%arg0: i32) -> (i32, i32, i32, i32) {
    %c0_i32 = arith.constant 0 : i32
    %c0_i32_0 = arith.constant 0 : i32
    %c0_i32_1 = arith.constant 0 : i32
    %c0_i32_2 = arith.constant 0 : i32
    return %arg0, %c0_i32, %c0_i32_0, %c0_i32_1 : i32, i32, i32, i32
  }
}

module attributes {stable_mosaic.version = 11 : i64} {
  func.func @_block_kernel(%arg0: i32, %arg1: memref<1x16x16x16xbf16, #tpu.memory_space<vmem>>, %arg2: memref<1x20x20x16xbf16, #tpu.memory_space<vmem>>, %arg3: memref<9x16x16xbf16, #tpu.memory_space<vmem>>, %arg4: memref<9x16x16xbf16, #tpu.memory_space<vmem>>, %arg5: memref<1x16xf32, #tpu.memory_space<vmem>>, %arg6: memref<9x16x16xbf16, #tpu.memory_space<vmem>>, %arg7: memref<1x16xf32, #tpu.memory_space<vmem>>, %arg8: memref<1x12x12x16xbf16, #tpu.memory_space<vmem>>, %arg9: memref<14x14x16xbf16, #tpu.memory_space<vmem>>) attributes {dimension_semantics = [#tpu.dimension_semantics<parallel>], iteration_bounds = array<i64: 2>, scalar_prefetch = 0 : i64, scratch_operands = 1 : i64, tpu.core_type = #tpu.core_type<tc>, window_params = [{transform_indices = @transform_0, window_bounds = array<i64: 1, 16, 16, 16>}, {transform_indices = @transform_1, window_bounds = array<i64: 1, 20, 20, 16>}, {pipeline_mode = #tpu.pipeline_mode<synchronous>, transform_indices = @transform_2, window_bounds = array<i64: 9, 16, 16>}, {pipeline_mode = #tpu.pipeline_mode<synchronous>, transform_indices = @transform_3, window_bounds = array<i64: 9, 16, 16>}, {pipeline_mode = #tpu.pipeline_mode<synchronous>, transform_indices = @transform_4, window_bounds = array<i64: 1, 16>}, {pipeline_mode = #tpu.pipeline_mode<synchronous>, transform_indices = @transform_5, window_bounds = array<i64: 9, 16, 16>}, {pipeline_mode = #tpu.pipeline_mode<synchronous>, transform_indices = @transform_6, window_bounds = array<i64: 1, 16>}, {transform_indices = @transform_7, window_bounds = array<i64: 1, 12, 12, 16>}]} {
    %c0 = arith.constant 0 : index
    %c0_0 = arith.constant 0 : index
    %0 = vector.load %arg5[%c0, %c0_0] : memref<1x16xf32, #tpu.memory_space<vmem>>, vector<1x16xf32>
    %cst = arith.constant 0.000000e+00 : f32
    %1 = vector.broadcast %cst : f32 to vector<14x16xf32>
    %2 = vector.broadcast %0 : vector<1x16xf32> to vector<14x16xf32>
    %3 = arith.addf %2, %1 : vector<14x16xf32>
    %c0_1 = arith.constant 0 : index
    %c0_2 = arith.constant 0 : index
    %4 = vector.load %arg7[%c0_1, %c0_2] : memref<1x16xf32, #tpu.memory_space<vmem>>, vector<1x16xf32>
    %cst_3 = arith.constant 0.000000e+00 : f32
    %5 = vector.broadcast %cst_3 : f32 to vector<12x16xf32>
    %6 = vector.broadcast %4 : vector<1x16xf32> to vector<12x16xf32>
    %7 = arith.addf %6, %5 : vector<12x16xf32>
    %c0_i32 = arith.constant 0 : i32
    %c14_i32 = arith.constant 14 : i32
    %8 = arith.addi %c0_i32, %c14_i32 : i32
    %c1_i32 = arith.constant 1 : i32
    scf.for %arg10 = %c0_i32 to %8 step %c1_i32  : i32 {
      %c1_i32_8 = arith.constant 1 : i32
      %10 = arith.muli %arg10, %c1_i32_8 : i32
      %c0_i32_9 = arith.constant 0 : i32
      %11 = arith.addi %c0_i32_9, %10 : i32
      %c0_i32_10 = arith.constant 0 : i32
      %12 = arith.addi %11, %c0_i32_10 : i32
      %c0_11 = arith.constant 0 : index
      %13 = arith.index_cast %12 : i32 to index
      %c0_12 = arith.constant 0 : index
      %c0_13 = arith.constant 0 : index
      %14 = vector.load %arg1[%c0_11, %13, %c0_12, %c0_13] : memref<1x16x16x16xbf16, #tpu.memory_space<vmem>>, vector<1x1x16x16xbf16>
      %15 = vector.shape_cast %14 : vector<1x1x16x16xbf16> to vector<16x16xbf16>
      %c2_i32 = arith.constant 2 : i32
      %16 = arith.addi %11, %c2_i32 : i32
      %c0_i32_14 = arith.constant 0 : i32
      %17 = arith.addi %16, %c0_i32_14 : i32
      %c0_15 = arith.constant 0 : index
      %18 = arith.index_cast %17 : i32 to index
      %c0_16 = arith.constant 0 : index
      %c0_17 = arith.constant 0 : index
      %19 = vector.load %arg2[%c0_15, %18, %c0_16, %c0_17] : memref<1x20x20x16xbf16, #tpu.memory_space<vmem>>, vector<1x1x20x16xbf16>
      %20 = vector.shape_cast %19 : vector<1x1x20x16xbf16> to vector<20x16xbf16>
      %21 = vector.extract_strided_slice %15 {offsets = [0, 0], sizes = [14, 16], strides = [1, 1]} : vector<16x16xbf16> to vector<14x16xbf16>
      %c0_18 = arith.constant 0 : index
      %c0_19 = arith.constant 0 : index
      %c0_20 = arith.constant 0 : index
      %22 = vector.load %arg3[%c0_18, %c0_19, %c0_20] : memref<9x16x16xbf16, #tpu.memory_space<vmem>>, vector<1x16x16xbf16>
      %23 = vector.shape_cast %22 : vector<1x16x16xbf16> to vector<16x16xbf16>
      %cst_21 = arith.constant dense<0.000000e+00> : vector<14x16xf32>
      %24 = tpu.matmul %21, %23, %cst_21 {dimension_numbers = #tpu.dot_dimension_numbers<[1], [0], [0], [1], [0, 0, 1, 1], [], []>} : vector<14x16xbf16>, vector<16x16xbf16>, vector<14x16xf32> -> vector<14x16xf32>
      %25 = arith.addf %3, %24 : vector<14x16xf32>
      %26 = vector.extract_strided_slice %20 {offsets = [2, 0], sizes = [14, 16], strides = [1, 1]} : vector<20x16xbf16> to vector<14x16xbf16>
      %c0_22 = arith.constant 0 : index
      %c0_23 = arith.constant 0 : index
      %c0_24 = arith.constant 0 : index
      %27 = vector.load %arg4[%c0_22, %c0_23, %c0_24] : memref<9x16x16xbf16, #tpu.memory_space<vmem>>, vector<1x16x16xbf16>
      %28 = vector.shape_cast %27 : vector<1x16x16xbf16> to vector<16x16xbf16>
      %cst_25 = arith.constant dense<0.000000e+00> : vector<14x16xf32>
      %29 = tpu.matmul %26, %28, %cst_25 {dimension_numbers = #tpu.dot_dimension_numbers<[1], [0], [0], [1], [0, 0, 1, 1], [], []>} : vector<14x16xbf16>, vector<16x16xbf16>, vector<14x16xf32> -> vector<14x16xf32>
      %30 = arith.addf %25, %29 : vector<14x16xf32>
      %31 = vector.extract_strided_slice %15 {offsets = [1, 0], sizes = [14, 16], strides = [1, 1]} : vector<16x16xbf16> to vector<14x16xbf16>
      %c1 = arith.constant 1 : index
      %c0_26 = arith.constant 0 : index
      %c0_27 = arith.constant 0 : index
      %32 = vector.load %arg3[%c1, %c0_26, %c0_27] : memref<9x16x16xbf16, #tpu.memory_space<vmem>>, vector<1x16x16xbf16>
      %33 = vector.shape_cast %32 : vector<1x16x16xbf16> to vector<16x16xbf16>
      %cst_28 = arith.constant dense<0.000000e+00> : vector<14x16xf32>
      %34 = tpu.matmul %31, %33, %cst_28 {dimension_numbers = #tpu.dot_dimension_numbers<[1], [0], [0], [1], [0, 0, 1, 1], [], []>} : vector<14x16xbf16>, vector<16x16xbf16>, vector<14x16xf32> -> vector<14x16xf32>
      %35 = arith.addf %30, %34 : vector<14x16xf32>
      %36 = vector.extract_strided_slice %20 {offsets = [3, 0], sizes = [14, 16], strides = [1, 1]} : vector<20x16xbf16> to vector<14x16xbf16>
      %c1_29 = arith.constant 1 : index
      %c0_30 = arith.constant 0 : index
      %c0_31 = arith.constant 0 : index
      %37 = vector.load %arg4[%c1_29, %c0_30, %c0_31] : memref<9x16x16xbf16, #tpu.memory_space<vmem>>, vector<1x16x16xbf16>
      %38 = vector.shape_cast %37 : vector<1x16x16xbf16> to vector<16x16xbf16>
      %cst_32 = arith.constant dense<0.000000e+00> : vector<14x16xf32>
      %39 = tpu.matmul %36, %38, %cst_32 {dimension_numbers = #tpu.dot_dimension_numbers<[1], [0], [0], [1], [0, 0, 1, 1], [], []>} : vector<14x16xbf16>, vector<16x16xbf16>, vector<14x16xf32> -> vector<14x16xf32>
      %40 = arith.addf %35, %39 : vector<14x16xf32>
      %41 = vector.extract_strided_slice %15 {offsets = [2, 0], sizes = [14, 16], strides = [1, 1]} : vector<16x16xbf16> to vector<14x16xbf16>
      %c2 = arith.constant 2 : index
      %c0_33 = arith.constant 0 : index
      %c0_34 = arith.constant 0 : index
      %42 = vector.load %arg3[%c2, %c0_33, %c0_34] : memref<9x16x16xbf16, #tpu.memory_space<vmem>>, vector<1x16x16xbf16>
      %43 = vector.shape_cast %42 : vector<1x16x16xbf16> to vector<16x16xbf16>
      %cst_35 = arith.constant dense<0.000000e+00> : vector<14x16xf32>
      %44 = tpu.matmul %41, %43, %cst_35 {dimension_numbers = #tpu.dot_dimension_numbers<[1], [0], [0], [1], [0, 0, 1, 1], [], []>} : vector<14x16xbf16>, vector<16x16xbf16>, vector<14x16xf32> -> vector<14x16xf32>
      %45 = arith.addf %40, %44 : vector<14x16xf32>
      %46 = vector.extract_strided_slice %20 {offsets = [4, 0], sizes = [14, 16], strides = [1, 1]} : vector<20x16xbf16> to vector<14x16xbf16>
      %c2_36 = arith.constant 2 : index
      %c0_37 = arith.constant 0 : index
      %c0_38 = arith.constant 0 : index
      %47 = vector.load %arg4[%c2_36, %c0_37, %c0_38] : memref<9x16x16xbf16, #tpu.memory_space<vmem>>, vector<1x16x16xbf16>
      %48 = vector.shape_cast %47 : vector<1x16x16xbf16> to vector<16x16xbf16>
      %cst_39 = arith.constant dense<0.000000e+00> : vector<14x16xf32>
      %49 = tpu.matmul %46, %48, %cst_39 {dimension_numbers = #tpu.dot_dimension_numbers<[1], [0], [0], [1], [0, 0, 1, 1], [], []>} : vector<14x16xbf16>, vector<16x16xbf16>, vector<14x16xf32> -> vector<14x16xf32>
      %50 = arith.addf %45, %49 : vector<14x16xf32>
      %c1_i32_40 = arith.constant 1 : i32
      %51 = arith.addi %11, %c1_i32_40 : i32
      %c0_41 = arith.constant 0 : index
      %52 = arith.index_cast %51 : i32 to index
      %c0_42 = arith.constant 0 : index
      %c0_43 = arith.constant 0 : index
      %53 = vector.load %arg1[%c0_41, %52, %c0_42, %c0_43] : memref<1x16x16x16xbf16, #tpu.memory_space<vmem>>, vector<1x1x16x16xbf16>
      %54 = vector.shape_cast %53 : vector<1x1x16x16xbf16> to vector<16x16xbf16>
      %c2_i32_44 = arith.constant 2 : i32
      %55 = arith.addi %11, %c2_i32_44 : i32
      %c1_i32_45 = arith.constant 1 : i32
      %56 = arith.addi %55, %c1_i32_45 : i32
      %c0_46 = arith.constant 0 : index
      %57 = arith.index_cast %56 : i32 to index
      %c0_47 = arith.constant 0 : index
      %c0_48 = arith.constant 0 : index
      %58 = vector.load %arg2[%c0_46, %57, %c0_47, %c0_48] : memref<1x20x20x16xbf16, #tpu.memory_space<vmem>>, vector<1x1x20x16xbf16>
      %59 = vector.shape_cast %58 : vector<1x1x20x16xbf16> to vector<20x16xbf16>
      %60 = vector.extract_strided_slice %54 {offsets = [0, 0], sizes = [14, 16], strides = [1, 1]} : vector<16x16xbf16> to vector<14x16xbf16>
      %c3 = arith.constant 3 : index
      %c0_49 = arith.constant 0 : index
      %c0_50 = arith.constant 0 : index
      %61 = vector.load %arg3[%c3, %c0_49, %c0_50] : memref<9x16x16xbf16, #tpu.memory_space<vmem>>, vector<1x16x16xbf16>
      %62 = vector.shape_cast %61 : vector<1x16x16xbf16> to vector<16x16xbf16>
      %cst_51 = arith.constant dense<0.000000e+00> : vector<14x16xf32>
      %63 = tpu.matmul %60, %62, %cst_51 {dimension_numbers = #tpu.dot_dimension_numbers<[1], [0], [0], [1], [0, 0, 1, 1], [], []>} : vector<14x16xbf16>, vector<16x16xbf16>, vector<14x16xf32> -> vector<14x16xf32>
      %64 = arith.addf %50, %63 : vector<14x16xf32>
      %65 = vector.extract_strided_slice %59 {offsets = [2, 0], sizes = [14, 16], strides = [1, 1]} : vector<20x16xbf16> to vector<14x16xbf16>
      %c3_52 = arith.constant 3 : index
      %c0_53 = arith.constant 0 : index
      %c0_54 = arith.constant 0 : index
      %66 = vector.load %arg4[%c3_52, %c0_53, %c0_54] : memref<9x16x16xbf16, #tpu.memory_space<vmem>>, vector<1x16x16xbf16>
      %67 = vector.shape_cast %66 : vector<1x16x16xbf16> to vector<16x16xbf16>
      %cst_55 = arith.constant dense<0.000000e+00> : vector<14x16xf32>
      %68 = tpu.matmul %65, %67, %cst_55 {dimension_numbers = #tpu.dot_dimension_numbers<[1], [0], [0], [1], [0, 0, 1, 1], [], []>} : vector<14x16xbf16>, vector<16x16xbf16>, vector<14x16xf32> -> vector<14x16xf32>
      %69 = arith.addf %64, %68 : vector<14x16xf32>
      %70 = vector.extract_strided_slice %54 {offsets = [1, 0], sizes = [14, 16], strides = [1, 1]} : vector<16x16xbf16> to vector<14x16xbf16>
      %c4 = arith.constant 4 : index
      %c0_56 = arith.constant 0 : index
      %c0_57 = arith.constant 0 : index
      %71 = vector.load %arg3[%c4, %c0_56, %c0_57] : memref<9x16x16xbf16, #tpu.memory_space<vmem>>, vector<1x16x16xbf16>
      %72 = vector.shape_cast %71 : vector<1x16x16xbf16> to vector<16x16xbf16>
      %cst_58 = arith.constant dense<0.000000e+00> : vector<14x16xf32>
      %73 = tpu.matmul %70, %72, %cst_58 {dimension_numbers = #tpu.dot_dimension_numbers<[1], [0], [0], [1], [0, 0, 1, 1], [], []>} : vector<14x16xbf16>, vector<16x16xbf16>, vector<14x16xf32> -> vector<14x16xf32>
      %74 = arith.addf %69, %73 : vector<14x16xf32>
      %75 = vector.extract_strided_slice %59 {offsets = [3, 0], sizes = [14, 16], strides = [1, 1]} : vector<20x16xbf16> to vector<14x16xbf16>
      %c4_59 = arith.constant 4 : index
      %c0_60 = arith.constant 0 : index
      %c0_61 = arith.constant 0 : index
      %76 = vector.load %arg4[%c4_59, %c0_60, %c0_61] : memref<9x16x16xbf16, #tpu.memory_space<vmem>>, vector<1x16x16xbf16>
      %77 = vector.shape_cast %76 : vector<1x16x16xbf16> to vector<16x16xbf16>
      %cst_62 = arith.constant dense<0.000000e+00> : vector<14x16xf32>
      %78 = tpu.matmul %75, %77, %cst_62 {dimension_numbers = #tpu.dot_dimension_numbers<[1], [0], [0], [1], [0, 0, 1, 1], [], []>} : vector<14x16xbf16>, vector<16x16xbf16>, vector<14x16xf32> -> vector<14x16xf32>
      %79 = arith.addf %74, %78 : vector<14x16xf32>
      %80 = vector.extract_strided_slice %54 {offsets = [2, 0], sizes = [14, 16], strides = [1, 1]} : vector<16x16xbf16> to vector<14x16xbf16>
      %c5 = arith.constant 5 : index
      %c0_63 = arith.constant 0 : index
      %c0_64 = arith.constant 0 : index
      %81 = vector.load %arg3[%c5, %c0_63, %c0_64] : memref<9x16x16xbf16, #tpu.memory_space<vmem>>, vector<1x16x16xbf16>
      %82 = vector.shape_cast %81 : vector<1x16x16xbf16> to vector<16x16xbf16>
      %cst_65 = arith.constant dense<0.000000e+00> : vector<14x16xf32>
      %83 = tpu.matmul %80, %82, %cst_65 {dimension_numbers = #tpu.dot_dimension_numbers<[1], [0], [0], [1], [0, 0, 1, 1], [], []>} : vector<14x16xbf16>, vector<16x16xbf16>, vector<14x16xf32> -> vector<14x16xf32>
      %84 = arith.addf %79, %83 : vector<14x16xf32>
      %85 = vector.extract_strided_slice %59 {offsets = [4, 0], sizes = [14, 16], strides = [1, 1]} : vector<20x16xbf16> to vector<14x16xbf16>
      %c5_66 = arith.constant 5 : index
      %c0_67 = arith.constant 0 : index
      %c0_68 = arith.constant 0 : index
      %86 = vector.load %arg4[%c5_66, %c0_67, %c0_68] : memref<9x16x16xbf16, #tpu.memory_space<vmem>>, vector<1x16x16xbf16>
      %87 = vector.shape_cast %86 : vector<1x16x16xbf16> to vector<16x16xbf16>
      %cst_69 = arith.constant dense<0.000000e+00> : vector<14x16xf32>
      %88 = tpu.matmul %85, %87, %cst_69 {dimension_numbers = #tpu.dot_dimension_numbers<[1], [0], [0], [1], [0, 0, 1, 1], [], []>} : vector<14x16xbf16>, vector<16x16xbf16>, vector<14x16xf32> -> vector<14x16xf32>
      %89 = arith.addf %84, %88 : vector<14x16xf32>
      %c2_i32_70 = arith.constant 2 : i32
      %90 = arith.addi %11, %c2_i32_70 : i32
      %c0_71 = arith.constant 0 : index
      %91 = arith.index_cast %90 : i32 to index
      %c0_72 = arith.constant 0 : index
      %c0_73 = arith.constant 0 : index
      %92 = vector.load %arg1[%c0_71, %91, %c0_72, %c0_73] : memref<1x16x16x16xbf16, #tpu.memory_space<vmem>>, vector<1x1x16x16xbf16>
      %93 = vector.shape_cast %92 : vector<1x1x16x16xbf16> to vector<16x16xbf16>
      %c2_i32_74 = arith.constant 2 : i32
      %94 = arith.addi %11, %c2_i32_74 : i32
      %c2_i32_75 = arith.constant 2 : i32
      %95 = arith.addi %94, %c2_i32_75 : i32
      %c0_76 = arith.constant 0 : index
      %96 = arith.index_cast %95 : i32 to index
      %c0_77 = arith.constant 0 : index
      %c0_78 = arith.constant 0 : index
      %97 = vector.load %arg2[%c0_76, %96, %c0_77, %c0_78] : memref<1x20x20x16xbf16, #tpu.memory_space<vmem>>, vector<1x1x20x16xbf16>
      %98 = vector.shape_cast %97 : vector<1x1x20x16xbf16> to vector<20x16xbf16>
      %99 = vector.extract_strided_slice %93 {offsets = [0, 0], sizes = [14, 16], strides = [1, 1]} : vector<16x16xbf16> to vector<14x16xbf16>
      %c6 = arith.constant 6 : index
      %c0_79 = arith.constant 0 : index
      %c0_80 = arith.constant 0 : index
      %100 = vector.load %arg3[%c6, %c0_79, %c0_80] : memref<9x16x16xbf16, #tpu.memory_space<vmem>>, vector<1x16x16xbf16>
      %101 = vector.shape_cast %100 : vector<1x16x16xbf16> to vector<16x16xbf16>
      %cst_81 = arith.constant dense<0.000000e+00> : vector<14x16xf32>
      %102 = tpu.matmul %99, %101, %cst_81 {dimension_numbers = #tpu.dot_dimension_numbers<[1], [0], [0], [1], [0, 0, 1, 1], [], []>} : vector<14x16xbf16>, vector<16x16xbf16>, vector<14x16xf32> -> vector<14x16xf32>
      %103 = arith.addf %89, %102 : vector<14x16xf32>
      %104 = vector.extract_strided_slice %98 {offsets = [2, 0], sizes = [14, 16], strides = [1, 1]} : vector<20x16xbf16> to vector<14x16xbf16>
      %c6_82 = arith.constant 6 : index
      %c0_83 = arith.constant 0 : index
      %c0_84 = arith.constant 0 : index
      %105 = vector.load %arg4[%c6_82, %c0_83, %c0_84] : memref<9x16x16xbf16, #tpu.memory_space<vmem>>, vector<1x16x16xbf16>
      %106 = vector.shape_cast %105 : vector<1x16x16xbf16> to vector<16x16xbf16>
      %cst_85 = arith.constant dense<0.000000e+00> : vector<14x16xf32>
      %107 = tpu.matmul %104, %106, %cst_85 {dimension_numbers = #tpu.dot_dimension_numbers<[1], [0], [0], [1], [0, 0, 1, 1], [], []>} : vector<14x16xbf16>, vector<16x16xbf16>, vector<14x16xf32> -> vector<14x16xf32>
      %108 = arith.addf %103, %107 : vector<14x16xf32>
      %109 = vector.extract_strided_slice %93 {offsets = [1, 0], sizes = [14, 16], strides = [1, 1]} : vector<16x16xbf16> to vector<14x16xbf16>
      %c7 = arith.constant 7 : index
      %c0_86 = arith.constant 0 : index
      %c0_87 = arith.constant 0 : index
      %110 = vector.load %arg3[%c7, %c0_86, %c0_87] : memref<9x16x16xbf16, #tpu.memory_space<vmem>>, vector<1x16x16xbf16>
      %111 = vector.shape_cast %110 : vector<1x16x16xbf16> to vector<16x16xbf16>
      %cst_88 = arith.constant dense<0.000000e+00> : vector<14x16xf32>
      %112 = tpu.matmul %109, %111, %cst_88 {dimension_numbers = #tpu.dot_dimension_numbers<[1], [0], [0], [1], [0, 0, 1, 1], [], []>} : vector<14x16xbf16>, vector<16x16xbf16>, vector<14x16xf32> -> vector<14x16xf32>
      %113 = arith.addf %108, %112 : vector<14x16xf32>
      %114 = vector.extract_strided_slice %98 {offsets = [3, 0], sizes = [14, 16], strides = [1, 1]} : vector<20x16xbf16> to vector<14x16xbf16>
      %c7_89 = arith.constant 7 : index
      %c0_90 = arith.constant 0 : index
      %c0_91 = arith.constant 0 : index
      %115 = vector.load %arg4[%c7_89, %c0_90, %c0_91] : memref<9x16x16xbf16, #tpu.memory_space<vmem>>, vector<1x16x16xbf16>
      %116 = vector.shape_cast %115 : vector<1x16x16xbf16> to vector<16x16xbf16>
      %cst_92 = arith.constant dense<0.000000e+00> : vector<14x16xf32>
      %117 = tpu.matmul %114, %116, %cst_92 {dimension_numbers = #tpu.dot_dimension_numbers<[1], [0], [0], [1], [0, 0, 1, 1], [], []>} : vector<14x16xbf16>, vector<16x16xbf16>, vector<14x16xf32> -> vector<14x16xf32>
      %118 = arith.addf %113, %117 : vector<14x16xf32>
      %119 = vector.extract_strided_slice %93 {offsets = [2, 0], sizes = [14, 16], strides = [1, 1]} : vector<16x16xbf16> to vector<14x16xbf16>
      %c8 = arith.constant 8 : index
      %c0_93 = arith.constant 0 : index
      %c0_94 = arith.constant 0 : index
      %120 = vector.load %arg3[%c8, %c0_93, %c0_94] : memref<9x16x16xbf16, #tpu.memory_space<vmem>>, vector<1x16x16xbf16>
      %121 = vector.shape_cast %120 : vector<1x16x16xbf16> to vector<16x16xbf16>
      %cst_95 = arith.constant dense<0.000000e+00> : vector<14x16xf32>
      %122 = tpu.matmul %119, %121, %cst_95 {dimension_numbers = #tpu.dot_dimension_numbers<[1], [0], [0], [1], [0, 0, 1, 1], [], []>} : vector<14x16xbf16>, vector<16x16xbf16>, vector<14x16xf32> -> vector<14x16xf32>
      %123 = arith.addf %118, %122 : vector<14x16xf32>
      %124 = vector.extract_strided_slice %98 {offsets = [4, 0], sizes = [14, 16], strides = [1, 1]} : vector<20x16xbf16> to vector<14x16xbf16>
      %c8_96 = arith.constant 8 : index
      %c0_97 = arith.constant 0 : index
      %c0_98 = arith.constant 0 : index
      %125 = vector.load %arg4[%c8_96, %c0_97, %c0_98] : memref<9x16x16xbf16, #tpu.memory_space<vmem>>, vector<1x16x16xbf16>
      %126 = vector.shape_cast %125 : vector<1x16x16xbf16> to vector<16x16xbf16>
      %cst_99 = arith.constant dense<0.000000e+00> : vector<14x16xf32>
      %127 = tpu.matmul %124, %126, %cst_99 {dimension_numbers = #tpu.dot_dimension_numbers<[1], [0], [0], [1], [0, 0, 1, 1], [], []>} : vector<14x16xbf16>, vector<16x16xbf16>, vector<14x16xf32> -> vector<14x16xf32>
      %128 = arith.addf %123, %127 : vector<14x16xf32>
      %cst_100 = arith.constant 0.000000e+00 : f32
      %129 = vector.broadcast %cst_100 : f32 to vector<14x16xf32>
      %130 = arith.maximumf %128, %129 : vector<14x16xf32>
      %131 = arith.truncf %130 : vector<14x16xf32> to vector<14x16xbf16>
      %132 = arith.index_cast %11 : i32 to index
      %c0_101 = arith.constant 0 : index
      %c0_102 = arith.constant 0 : index
      %133 = vector.load %arg9[%132, %c0_101, %c0_102] : memref<14x14x16xbf16, #tpu.memory_space<vmem>>, vector<1x14x16xbf16>
      %134 = vector.shape_cast %133 : vector<1x14x16xbf16> to vector<14x16xbf16>
      %135 = vector.shape_cast %131 : vector<14x16xbf16> to vector<1x14x16xbf16>
      tpu.vector_store %arg9[%132, %c0_101, %c0_102], %135 {strides = array<i32>} : memref<14x14x16xbf16, #tpu.memory_space<vmem>>, vector<1x14x16xbf16>,
    }
    %c14_i32_4 = arith.constant 14 : i32
    %c0_i32_5 = arith.constant 0 : i32
    %c12_i32 = arith.constant 12 : i32
    %9 = arith.addi %c0_i32_5, %c12_i32 : i32
    %c1_i32_6 = arith.constant 1 : i32
    scf.for %arg10 = %c0_i32_5 to %9 step %c1_i32_6  : i32 {
      %c1_i32_8 = arith.constant 1 : i32
      %10 = arith.muli %arg10, %c1_i32_8 : i32
      %c0_i32_9 = arith.constant 0 : i32
      %11 = arith.addi %c0_i32_9, %10 : i32
      %c0_i32_10 = arith.constant 0 : i32
      %12 = arith.addi %11, %c0_i32_10 : i32
      %13 = arith.index_cast %12 : i32 to index
      %c0_11 = arith.constant 0 : index
      %c0_12 = arith.constant 0 : index
      %14 = vector.load %arg9[%13, %c0_11, %c0_12] : memref<14x14x16xbf16, #tpu.memory_space<vmem>>, vector<1x14x16xbf16>
      %15 = vector.shape_cast %14 : vector<1x14x16xbf16> to vector<14x16xbf16>
      %16 = vector.extract_strided_slice %15 {offsets = [0, 0], sizes = [12, 16], strides = [1, 1]} : vector<14x16xbf16> to vector<12x16xbf16>
      %c0_13 = arith.constant 0 : index
      %c0_14 = arith.constant 0 : index
      %c0_15 = arith.constant 0 : index
      %17 = vector.load %arg6[%c0_13, %c0_14, %c0_15] : memref<9x16x16xbf16, #tpu.memory_space<vmem>>, vector<1x16x16xbf16>
      %18 = vector.shape_cast %17 : vector<1x16x16xbf16> to vector<16x16xbf16>
      %cst_16 = arith.constant dense<0.000000e+00> : vector<12x16xf32>
      %19 = tpu.matmul %16, %18, %cst_16 {dimension_numbers = #tpu.dot_dimension_numbers<[1], [0], [0], [1], [0, 0, 1, 1], [], []>} : vector<12x16xbf16>, vector<16x16xbf16>, vector<12x16xf32> -> vector<12x16xf32>
      %20 = arith.addf %7, %19 : vector<12x16xf32>
      %21 = vector.extract_strided_slice %15 {offsets = [1, 0], sizes = [12, 16], strides = [1, 1]} : vector<14x16xbf16> to vector<12x16xbf16>
      %c1 = arith.constant 1 : index
      %c0_17 = arith.constant 0 : index
      %c0_18 = arith.constant 0 : index
      %22 = vector.load %arg6[%c1, %c0_17, %c0_18] : memref<9x16x16xbf16, #tpu.memory_space<vmem>>, vector<1x16x16xbf16>
      %23 = vector.shape_cast %22 : vector<1x16x16xbf16> to vector<16x16xbf16>
      %cst_19 = arith.constant dense<0.000000e+00> : vector<12x16xf32>
      %24 = tpu.matmul %21, %23, %cst_19 {dimension_numbers = #tpu.dot_dimension_numbers<[1], [0], [0], [1], [0, 0, 1, 1], [], []>} : vector<12x16xbf16>, vector<16x16xbf16>, vector<12x16xf32> -> vector<12x16xf32>
      %25 = arith.addf %20, %24 : vector<12x16xf32>
      %26 = vector.extract_strided_slice %15 {offsets = [2, 0], sizes = [12, 16], strides = [1, 1]} : vector<14x16xbf16> to vector<12x16xbf16>
      %c2 = arith.constant 2 : index
      %c0_20 = arith.constant 0 : index
      %c0_21 = arith.constant 0 : index
      %27 = vector.load %arg6[%c2, %c0_20, %c0_21] : memref<9x16x16xbf16, #tpu.memory_space<vmem>>, vector<1x16x16xbf16>
      %28 = vector.shape_cast %27 : vector<1x16x16xbf16> to vector<16x16xbf16>
      %cst_22 = arith.constant dense<0.000000e+00> : vector<12x16xf32>
      %29 = tpu.matmul %26, %28, %cst_22 {dimension_numbers = #tpu.dot_dimension_numbers<[1], [0], [0], [1], [0, 0, 1, 1], [], []>} : vector<12x16xbf16>, vector<16x16xbf16>, vector<12x16xf32> -> vector<12x16xf32>
      %30 = arith.addf %25, %29 : vector<12x16xf32>
      %c1_i32_23 = arith.constant 1 : i32
      %31 = arith.addi %11, %c1_i32_23 : i32
      %32 = arith.index_cast %31 : i32 to index
      %c0_24 = arith.constant 0 : index
      %c0_25 = arith.constant 0 : index
      %33 = vector.load %arg9[%32, %c0_24, %c0_25] : memref<14x14x16xbf16, #tpu.memory_space<vmem>>, vector<1x14x16xbf16>
      %34 = vector.shape_cast %33 : vector<1x14x16xbf16> to vector<14x16xbf16>
      %35 = vector.extract_strided_slice %34 {offsets = [0, 0], sizes = [12, 16], strides = [1, 1]} : vector<14x16xbf16> to vector<12x16xbf16>
      %c3 = arith.constant 3 : index
      %c0_26 = arith.constant 0 : index
      %c0_27 = arith.constant 0 : index
      %36 = vector.load %arg6[%c3, %c0_26, %c0_27] : memref<9x16x16xbf16, #tpu.memory_space<vmem>>, vector<1x16x16xbf16>
      %37 = vector.shape_cast %36 : vector<1x16x16xbf16> to vector<16x16xbf16>
      %cst_28 = arith.constant dense<0.000000e+00> : vector<12x16xf32>
      %38 = tpu.matmul %35, %37, %cst_28 {dimension_numbers = #tpu.dot_dimension_numbers<[1], [0], [0], [1], [0, 0, 1, 1], [], []>} : vector<12x16xbf16>, vector<16x16xbf16>, vector<12x16xf32> -> vector<12x16xf32>
      %39 = arith.addf %30, %38 : vector<12x16xf32>
      %40 = vector.extract_strided_slice %34 {offsets = [1, 0], sizes = [12, 16], strides = [1, 1]} : vector<14x16xbf16> to vector<12x16xbf16>
      %c4 = arith.constant 4 : index
      %c0_29 = arith.constant 0 : index
      %c0_30 = arith.constant 0 : index
      %41 = vector.load %arg6[%c4, %c0_29, %c0_30] : memref<9x16x16xbf16, #tpu.memory_space<vmem>>, vector<1x16x16xbf16>
      %42 = vector.shape_cast %41 : vector<1x16x16xbf16> to vector<16x16xbf16>
      %cst_31 = arith.constant dense<0.000000e+00> : vector<12x16xf32>
      %43 = tpu.matmul %40, %42, %cst_31 {dimension_numbers = #tpu.dot_dimension_numbers<[1], [0], [0], [1], [0, 0, 1, 1], [], []>} : vector<12x16xbf16>, vector<16x16xbf16>, vector<12x16xf32> -> vector<12x16xf32>
      %44 = arith.addf %39, %43 : vector<12x16xf32>
      %45 = vector.extract_strided_slice %34 {offsets = [2, 0], sizes = [12, 16], strides = [1, 1]} : vector<14x16xbf16> to vector<12x16xbf16>
      %c5 = arith.constant 5 : index
      %c0_32 = arith.constant 0 : index
      %c0_33 = arith.constant 0 : index
      %46 = vector.load %arg6[%c5, %c0_32, %c0_33] : memref<9x16x16xbf16, #tpu.memory_space<vmem>>, vector<1x16x16xbf16>
      %47 = vector.shape_cast %46 : vector<1x16x16xbf16> to vector<16x16xbf16>
      %cst_34 = arith.constant dense<0.000000e+00> : vector<12x16xf32>
      %48 = tpu.matmul %45, %47, %cst_34 {dimension_numbers = #tpu.dot_dimension_numbers<[1], [0], [0], [1], [0, 0, 1, 1], [], []>} : vector<12x16xbf16>, vector<16x16xbf16>, vector<12x16xf32> -> vector<12x16xf32>
      %49 = arith.addf %44, %48 : vector<12x16xf32>
      %c2_i32 = arith.constant 2 : i32
      %50 = arith.addi %11, %c2_i32 : i32
      %51 = arith.index_cast %50 : i32 to index
      %c0_35 = arith.constant 0 : index
      %c0_36 = arith.constant 0 : index
      %52 = vector.load %arg9[%51, %c0_35, %c0_36] : memref<14x14x16xbf16, #tpu.memory_space<vmem>>, vector<1x14x16xbf16>
      %53 = vector.shape_cast %52 : vector<1x14x16xbf16> to vector<14x16xbf16>
      %54 = vector.extract_strided_slice %53 {offsets = [0, 0], sizes = [12, 16], strides = [1, 1]} : vector<14x16xbf16> to vector<12x16xbf16>
      %c6 = arith.constant 6 : index
      %c0_37 = arith.constant 0 : index
      %c0_38 = arith.constant 0 : index
      %55 = vector.load %arg6[%c6, %c0_37, %c0_38] : memref<9x16x16xbf16, #tpu.memory_space<vmem>>, vector<1x16x16xbf16>
      %56 = vector.shape_cast %55 : vector<1x16x16xbf16> to vector<16x16xbf16>
      %cst_39 = arith.constant dense<0.000000e+00> : vector<12x16xf32>
      %57 = tpu.matmul %54, %56, %cst_39 {dimension_numbers = #tpu.dot_dimension_numbers<[1], [0], [0], [1], [0, 0, 1, 1], [], []>} : vector<12x16xbf16>, vector<16x16xbf16>, vector<12x16xf32> -> vector<12x16xf32>
      %58 = arith.addf %49, %57 : vector<12x16xf32>
      %59 = vector.extract_strided_slice %53 {offsets = [1, 0], sizes = [12, 16], strides = [1, 1]} : vector<14x16xbf16> to vector<12x16xbf16>
      %c7 = arith.constant 7 : index
      %c0_40 = arith.constant 0 : index
      %c0_41 = arith.constant 0 : index
      %60 = vector.load %arg6[%c7, %c0_40, %c0_41] : memref<9x16x16xbf16, #tpu.memory_space<vmem>>, vector<1x16x16xbf16>
      %61 = vector.shape_cast %60 : vector<1x16x16xbf16> to vector<16x16xbf16>
      %cst_42 = arith.constant dense<0.000000e+00> : vector<12x16xf32>
      %62 = tpu.matmul %59, %61, %cst_42 {dimension_numbers = #tpu.dot_dimension_numbers<[1], [0], [0], [1], [0, 0, 1, 1], [], []>} : vector<12x16xbf16>, vector<16x16xbf16>, vector<12x16xf32> -> vector<12x16xf32>
      %63 = arith.addf %58, %62 : vector<12x16xf32>
      %64 = vector.extract_strided_slice %53 {offsets = [2, 0], sizes = [12, 16], strides = [1, 1]} : vector<14x16xbf16> to vector<12x16xbf16>
      %c8 = arith.constant 8 : index
      %c0_43 = arith.constant 0 : index
      %c0_44 = arith.constant 0 : index
      %65 = vector.load %arg6[%c8, %c0_43, %c0_44] : memref<9x16x16xbf16, #tpu.memory_space<vmem>>, vector<1x16x16xbf16>
      %66 = vector.shape_cast %65 : vector<1x16x16xbf16> to vector<16x16xbf16>
      %cst_45 = arith.constant dense<0.000000e+00> : vector<12x16xf32>
      %67 = tpu.matmul %64, %66, %cst_45 {dimension_numbers = #tpu.dot_dimension_numbers<[1], [0], [0], [1], [0, 0, 1, 1], [], []>} : vector<12x16xbf16>, vector<16x16xbf16>, vector<12x16xf32> -> vector<12x16xf32>
      %68 = arith.addf %63, %67 : vector<12x16xf32>
      %69 = arith.truncf %68 : vector<12x16xf32> to vector<12x16xbf16>
      %c0_46 = arith.constant 0 : index
      %70 = arith.index_cast %11 : i32 to index
      %c0_47 = arith.constant 0 : index
      %c0_48 = arith.constant 0 : index
      %71 = vector.load %arg8[%c0_46, %70, %c0_47, %c0_48] : memref<1x12x12x16xbf16, #tpu.memory_space<vmem>>, vector<1x1x12x16xbf16>
      %72 = vector.shape_cast %71 : vector<1x1x12x16xbf16> to vector<12x16xbf16>
      %73 = vector.shape_cast %69 : vector<12x16xbf16> to vector<1x1x12x16xbf16>
      tpu.vector_store %arg8[%c0_46, %70, %c0_47, %c0_48], %73 {strides = array<i32>} : memref<1x12x12x16xbf16, #tpu.memory_space<vmem>>, vector<1x1x12x16xbf16>,
    }
    %c12_i32_7 = arith.constant 12 : i32
    return
  }
  func.func @transform_0(%arg0: i32) -> (i32, i32, i32, i32) {
    %c0_i32 = arith.constant 0 : i32
    %c0_i32_0 = arith.constant 0 : i32
    %c0_i32_1 = arith.constant 0 : i32
    %c0_i32_2 = arith.constant 0 : i32
    return %arg0, %c0_i32, %c0_i32_0, %c0_i32_1 : i32, i32, i32, i32
  }
  func.func @transform_1(%arg0: i32) -> (i32, i32, i32, i32) {
    %c0_i32 = arith.constant 0 : i32
    %c0_i32_0 = arith.constant 0 : i32
    %c0_i32_1 = arith.constant 0 : i32
    %c0_i32_2 = arith.constant 0 : i32
    return %arg0, %c0_i32, %c0_i32_0, %c0_i32_1 : i32, i32, i32, i32
  }
  func.func @transform_2(%arg0: i32) -> (i32, i32, i32) {
    %c0_i32 = arith.constant 0 : i32
    %c0_i32_0 = arith.constant 0 : i32
    %c0_i32_1 = arith.constant 0 : i32
    %c0_i32_2 = arith.constant 0 : i32
    return %c0_i32, %c0_i32_0, %c0_i32_1 : i32, i32, i32
  }
  func.func @transform_3(%arg0: i32) -> (i32, i32, i32) {
    %c0_i32 = arith.constant 0 : i32
    %c0_i32_0 = arith.constant 0 : i32
    %c0_i32_1 = arith.constant 0 : i32
    %c0_i32_2 = arith.constant 0 : i32
    return %c0_i32, %c0_i32_0, %c0_i32_1 : i32, i32, i32
  }
  func.func @transform_4(%arg0: i32) -> (i32, i32) {
    %c0_i32 = arith.constant 0 : i32
    %c0_i32_0 = arith.constant 0 : i32
    %c0_i32_1 = arith.constant 0 : i32
    return %c0_i32, %c0_i32_0 : i32, i32
  }
  func.func @transform_5(%arg0: i32) -> (i32, i32, i32) {
    %c0_i32 = arith.constant 0 : i32
    %c0_i32_0 = arith.constant 0 : i32
    %c0_i32_1 = arith.constant 0 : i32
    %c0_i32_2 = arith.constant 0 : i32
    return %c0_i32, %c0_i32_0, %c0_i32_1 : i32, i32, i32
  }
  func.func @transform_6(%arg0: i32) -> (i32, i32) {
    %c0_i32 = arith.constant 0 : i32
    %c0_i32_0 = arith.constant 0 : i32
    %c0_i32_1 = arith.constant 0 : i32
    return %c0_i32, %c0_i32_0 : i32, i32
  }
  func.func @transform_7(%arg0: i32) -> (i32, i32, i32, i32) {
    %c0_i32 = arith.constant 0 : i32
    %c0_i32_0 = arith.constant 0 : i32
    %c0_i32_1 = arith.constant 0 : i32
    %c0_i32_2 = arith.constant 0 : i32
    return %arg0, %c0_i32, %c0_i32_0, %c0_i32_1 : i32, i32, i32, i32
  }
}

module attributes {stable_mosaic.version = 11 : i64} {
  func.func @_block_kernel(%arg0: i32, %arg1: memref<1x24x24x8xbf16, #tpu.memory_space<vmem>>, %arg2: memref<1x28x28x8xbf16, #tpu.memory_space<vmem>>, %arg3: memref<9x8x8xbf16, #tpu.memory_space<vmem>>, %arg4: memref<9x8x8xbf16, #tpu.memory_space<vmem>>, %arg5: memref<1x8xf32, #tpu.memory_space<vmem>>, %arg6: memref<9x8x8xbf16, #tpu.memory_space<vmem>>, %arg7: memref<1x8xf32, #tpu.memory_space<vmem>>, %arg8: memref<1x20x20x8xf32, #tpu.memory_space<vmem>>, %arg9: memref<22x22x8xbf16, #tpu.memory_space<vmem>>) attributes {dimension_semantics = [#tpu.dimension_semantics<parallel>], iteration_bounds = array<i64: 2>, scalar_prefetch = 0 : i64, scratch_operands = 1 : i64, tpu.core_type = #tpu.core_type<tc>, window_params = [{transform_indices = @transform_0, window_bounds = array<i64: 1, 24, 24, 8>}, {transform_indices = @transform_1, window_bounds = array<i64: 1, 28, 28, 8>}, {pipeline_mode = #tpu.pipeline_mode<synchronous>, transform_indices = @transform_2, window_bounds = array<i64: 9, 8, 8>}, {pipeline_mode = #tpu.pipeline_mode<synchronous>, transform_indices = @transform_3, window_bounds = array<i64: 9, 8, 8>}, {pipeline_mode = #tpu.pipeline_mode<synchronous>, transform_indices = @transform_4, window_bounds = array<i64: 1, 8>}, {pipeline_mode = #tpu.pipeline_mode<synchronous>, transform_indices = @transform_5, window_bounds = array<i64: 9, 8, 8>}, {pipeline_mode = #tpu.pipeline_mode<synchronous>, transform_indices = @transform_6, window_bounds = array<i64: 1, 8>}, {transform_indices = @transform_7, window_bounds = array<i64: 1, 20, 20, 8>}]} {
    %c0 = arith.constant 0 : index
    %c0_0 = arith.constant 0 : index
    %0 = vector.load %arg5[%c0, %c0_0] : memref<1x8xf32, #tpu.memory_space<vmem>>, vector<1x8xf32>
    %cst = arith.constant 0.000000e+00 : f32
    %1 = vector.broadcast %cst : f32 to vector<22x8xf32>
    %2 = vector.broadcast %0 : vector<1x8xf32> to vector<22x8xf32>
    %3 = arith.addf %2, %1 : vector<22x8xf32>
    %c0_1 = arith.constant 0 : index
    %c0_2 = arith.constant 0 : index
    %4 = vector.load %arg7[%c0_1, %c0_2] : memref<1x8xf32, #tpu.memory_space<vmem>>, vector<1x8xf32>
    %cst_3 = arith.constant 0.000000e+00 : f32
    %5 = vector.broadcast %cst_3 : f32 to vector<20x8xf32>
    %6 = vector.broadcast %4 : vector<1x8xf32> to vector<20x8xf32>
    %7 = arith.addf %6, %5 : vector<20x8xf32>
    %c0_i32 = arith.constant 0 : i32
    %c22_i32 = arith.constant 22 : i32
    %8 = arith.addi %c0_i32, %c22_i32 : i32
    %c1_i32 = arith.constant 1 : i32
    scf.for %arg10 = %c0_i32 to %8 step %c1_i32  : i32 {
      %c1_i32_8 = arith.constant 1 : i32
      %10 = arith.muli %arg10, %c1_i32_8 : i32
      %c0_i32_9 = arith.constant 0 : i32
      %11 = arith.addi %c0_i32_9, %10 : i32
      %c0_i32_10 = arith.constant 0 : i32
      %12 = arith.addi %11, %c0_i32_10 : i32
      %c0_11 = arith.constant 0 : index
      %13 = arith.index_cast %12 : i32 to index
      %c0_12 = arith.constant 0 : index
      %c0_13 = arith.constant 0 : index
      %14 = vector.load %arg1[%c0_11, %13, %c0_12, %c0_13] : memref<1x24x24x8xbf16, #tpu.memory_space<vmem>>, vector<1x1x24x8xbf16>
      %15 = vector.shape_cast %14 : vector<1x1x24x8xbf16> to vector<24x8xbf16>
      %c2_i32 = arith.constant 2 : i32
      %16 = arith.addi %11, %c2_i32 : i32
      %c0_i32_14 = arith.constant 0 : i32
      %17 = arith.addi %16, %c0_i32_14 : i32
      %c0_15 = arith.constant 0 : index
      %18 = arith.index_cast %17 : i32 to index
      %c0_16 = arith.constant 0 : index
      %c0_17 = arith.constant 0 : index
      %19 = vector.load %arg2[%c0_15, %18, %c0_16, %c0_17] : memref<1x28x28x8xbf16, #tpu.memory_space<vmem>>, vector<1x1x28x8xbf16>
      %20 = vector.shape_cast %19 : vector<1x1x28x8xbf16> to vector<28x8xbf16>
      %21 = vector.extract_strided_slice %15 {offsets = [0, 0], sizes = [22, 8], strides = [1, 1]} : vector<24x8xbf16> to vector<22x8xbf16>
      %c0_18 = arith.constant 0 : index
      %c0_19 = arith.constant 0 : index
      %c0_20 = arith.constant 0 : index
      %22 = vector.load %arg3[%c0_18, %c0_19, %c0_20] : memref<9x8x8xbf16, #tpu.memory_space<vmem>>, vector<1x8x8xbf16>
      %23 = vector.shape_cast %22 : vector<1x8x8xbf16> to vector<8x8xbf16>
      %cst_21 = arith.constant dense<0.000000e+00> : vector<22x8xf32>
      %24 = tpu.matmul %21, %23, %cst_21 {dimension_numbers = #tpu.dot_dimension_numbers<[1], [0], [0], [1], [0, 0, 1, 1], [], []>} : vector<22x8xbf16>, vector<8x8xbf16>, vector<22x8xf32> -> vector<22x8xf32>
      %25 = arith.addf %3, %24 : vector<22x8xf32>
      %26 = vector.extract_strided_slice %20 {offsets = [2, 0], sizes = [22, 8], strides = [1, 1]} : vector<28x8xbf16> to vector<22x8xbf16>
      %c0_22 = arith.constant 0 : index
      %c0_23 = arith.constant 0 : index
      %c0_24 = arith.constant 0 : index
      %27 = vector.load %arg4[%c0_22, %c0_23, %c0_24] : memref<9x8x8xbf16, #tpu.memory_space<vmem>>, vector<1x8x8xbf16>
      %28 = vector.shape_cast %27 : vector<1x8x8xbf16> to vector<8x8xbf16>
      %cst_25 = arith.constant dense<0.000000e+00> : vector<22x8xf32>
      %29 = tpu.matmul %26, %28, %cst_25 {dimension_numbers = #tpu.dot_dimension_numbers<[1], [0], [0], [1], [0, 0, 1, 1], [], []>} : vector<22x8xbf16>, vector<8x8xbf16>, vector<22x8xf32> -> vector<22x8xf32>
      %30 = arith.addf %25, %29 : vector<22x8xf32>
      %31 = vector.extract_strided_slice %15 {offsets = [1, 0], sizes = [22, 8], strides = [1, 1]} : vector<24x8xbf16> to vector<22x8xbf16>
      %c1 = arith.constant 1 : index
      %c0_26 = arith.constant 0 : index
      %c0_27 = arith.constant 0 : index
      %32 = vector.load %arg3[%c1, %c0_26, %c0_27] : memref<9x8x8xbf16, #tpu.memory_space<vmem>>, vector<1x8x8xbf16>
      %33 = vector.shape_cast %32 : vector<1x8x8xbf16> to vector<8x8xbf16>
      %cst_28 = arith.constant dense<0.000000e+00> : vector<22x8xf32>
      %34 = tpu.matmul %31, %33, %cst_28 {dimension_numbers = #tpu.dot_dimension_numbers<[1], [0], [0], [1], [0, 0, 1, 1], [], []>} : vector<22x8xbf16>, vector<8x8xbf16>, vector<22x8xf32> -> vector<22x8xf32>
      %35 = arith.addf %30, %34 : vector<22x8xf32>
      %36 = vector.extract_strided_slice %20 {offsets = [3, 0], sizes = [22, 8], strides = [1, 1]} : vector<28x8xbf16> to vector<22x8xbf16>
      %c1_29 = arith.constant 1 : index
      %c0_30 = arith.constant 0 : index
      %c0_31 = arith.constant 0 : index
      %37 = vector.load %arg4[%c1_29, %c0_30, %c0_31] : memref<9x8x8xbf16, #tpu.memory_space<vmem>>, vector<1x8x8xbf16>
      %38 = vector.shape_cast %37 : vector<1x8x8xbf16> to vector<8x8xbf16>
      %cst_32 = arith.constant dense<0.000000e+00> : vector<22x8xf32>
      %39 = tpu.matmul %36, %38, %cst_32 {dimension_numbers = #tpu.dot_dimension_numbers<[1], [0], [0], [1], [0, 0, 1, 1], [], []>} : vector<22x8xbf16>, vector<8x8xbf16>, vector<22x8xf32> -> vector<22x8xf32>
      %40 = arith.addf %35, %39 : vector<22x8xf32>
      %41 = vector.extract_strided_slice %15 {offsets = [2, 0], sizes = [22, 8], strides = [1, 1]} : vector<24x8xbf16> to vector<22x8xbf16>
      %c2 = arith.constant 2 : index
      %c0_33 = arith.constant 0 : index
      %c0_34 = arith.constant 0 : index
      %42 = vector.load %arg3[%c2, %c0_33, %c0_34] : memref<9x8x8xbf16, #tpu.memory_space<vmem>>, vector<1x8x8xbf16>
      %43 = vector.shape_cast %42 : vector<1x8x8xbf16> to vector<8x8xbf16>
      %cst_35 = arith.constant dense<0.000000e+00> : vector<22x8xf32>
      %44 = tpu.matmul %41, %43, %cst_35 {dimension_numbers = #tpu.dot_dimension_numbers<[1], [0], [0], [1], [0, 0, 1, 1], [], []>} : vector<22x8xbf16>, vector<8x8xbf16>, vector<22x8xf32> -> vector<22x8xf32>
      %45 = arith.addf %40, %44 : vector<22x8xf32>
      %46 = vector.extract_strided_slice %20 {offsets = [4, 0], sizes = [22, 8], strides = [1, 1]} : vector<28x8xbf16> to vector<22x8xbf16>
      %c2_36 = arith.constant 2 : index
      %c0_37 = arith.constant 0 : index
      %c0_38 = arith.constant 0 : index
      %47 = vector.load %arg4[%c2_36, %c0_37, %c0_38] : memref<9x8x8xbf16, #tpu.memory_space<vmem>>, vector<1x8x8xbf16>
      %48 = vector.shape_cast %47 : vector<1x8x8xbf16> to vector<8x8xbf16>
      %cst_39 = arith.constant dense<0.000000e+00> : vector<22x8xf32>
      %49 = tpu.matmul %46, %48, %cst_39 {dimension_numbers = #tpu.dot_dimension_numbers<[1], [0], [0], [1], [0, 0, 1, 1], [], []>} : vector<22x8xbf16>, vector<8x8xbf16>, vector<22x8xf32> -> vector<22x8xf32>
      %50 = arith.addf %45, %49 : vector<22x8xf32>
      %c1_i32_40 = arith.constant 1 : i32
      %51 = arith.addi %11, %c1_i32_40 : i32
      %c0_41 = arith.constant 0 : index
      %52 = arith.index_cast %51 : i32 to index
      %c0_42 = arith.constant 0 : index
      %c0_43 = arith.constant 0 : index
      %53 = vector.load %arg1[%c0_41, %52, %c0_42, %c0_43] : memref<1x24x24x8xbf16, #tpu.memory_space<vmem>>, vector<1x1x24x8xbf16>
      %54 = vector.shape_cast %53 : vector<1x1x24x8xbf16> to vector<24x8xbf16>
      %c2_i32_44 = arith.constant 2 : i32
      %55 = arith.addi %11, %c2_i32_44 : i32
      %c1_i32_45 = arith.constant 1 : i32
      %56 = arith.addi %55, %c1_i32_45 : i32
      %c0_46 = arith.constant 0 : index
      %57 = arith.index_cast %56 : i32 to index
      %c0_47 = arith.constant 0 : index
      %c0_48 = arith.constant 0 : index
      %58 = vector.load %arg2[%c0_46, %57, %c0_47, %c0_48] : memref<1x28x28x8xbf16, #tpu.memory_space<vmem>>, vector<1x1x28x8xbf16>
      %59 = vector.shape_cast %58 : vector<1x1x28x8xbf16> to vector<28x8xbf16>
      %60 = vector.extract_strided_slice %54 {offsets = [0, 0], sizes = [22, 8], strides = [1, 1]} : vector<24x8xbf16> to vector<22x8xbf16>
      %c3 = arith.constant 3 : index
      %c0_49 = arith.constant 0 : index
      %c0_50 = arith.constant 0 : index
      %61 = vector.load %arg3[%c3, %c0_49, %c0_50] : memref<9x8x8xbf16, #tpu.memory_space<vmem>>, vector<1x8x8xbf16>
      %62 = vector.shape_cast %61 : vector<1x8x8xbf16> to vector<8x8xbf16>
      %cst_51 = arith.constant dense<0.000000e+00> : vector<22x8xf32>
      %63 = tpu.matmul %60, %62, %cst_51 {dimension_numbers = #tpu.dot_dimension_numbers<[1], [0], [0], [1], [0, 0, 1, 1], [], []>} : vector<22x8xbf16>, vector<8x8xbf16>, vector<22x8xf32> -> vector<22x8xf32>
      %64 = arith.addf %50, %63 : vector<22x8xf32>
      %65 = vector.extract_strided_slice %59 {offsets = [2, 0], sizes = [22, 8], strides = [1, 1]} : vector<28x8xbf16> to vector<22x8xbf16>
      %c3_52 = arith.constant 3 : index
      %c0_53 = arith.constant 0 : index
      %c0_54 = arith.constant 0 : index
      %66 = vector.load %arg4[%c3_52, %c0_53, %c0_54] : memref<9x8x8xbf16, #tpu.memory_space<vmem>>, vector<1x8x8xbf16>
      %67 = vector.shape_cast %66 : vector<1x8x8xbf16> to vector<8x8xbf16>
      %cst_55 = arith.constant dense<0.000000e+00> : vector<22x8xf32>
      %68 = tpu.matmul %65, %67, %cst_55 {dimension_numbers = #tpu.dot_dimension_numbers<[1], [0], [0], [1], [0, 0, 1, 1], [], []>} : vector<22x8xbf16>, vector<8x8xbf16>, vector<22x8xf32> -> vector<22x8xf32>
      %69 = arith.addf %64, %68 : vector<22x8xf32>
      %70 = vector.extract_strided_slice %54 {offsets = [1, 0], sizes = [22, 8], strides = [1, 1]} : vector<24x8xbf16> to vector<22x8xbf16>
      %c4 = arith.constant 4 : index
      %c0_56 = arith.constant 0 : index
      %c0_57 = arith.constant 0 : index
      %71 = vector.load %arg3[%c4, %c0_56, %c0_57] : memref<9x8x8xbf16, #tpu.memory_space<vmem>>, vector<1x8x8xbf16>
      %72 = vector.shape_cast %71 : vector<1x8x8xbf16> to vector<8x8xbf16>
      %cst_58 = arith.constant dense<0.000000e+00> : vector<22x8xf32>
      %73 = tpu.matmul %70, %72, %cst_58 {dimension_numbers = #tpu.dot_dimension_numbers<[1], [0], [0], [1], [0, 0, 1, 1], [], []>} : vector<22x8xbf16>, vector<8x8xbf16>, vector<22x8xf32> -> vector<22x8xf32>
      %74 = arith.addf %69, %73 : vector<22x8xf32>
      %75 = vector.extract_strided_slice %59 {offsets = [3, 0], sizes = [22, 8], strides = [1, 1]} : vector<28x8xbf16> to vector<22x8xbf16>
      %c4_59 = arith.constant 4 : index
      %c0_60 = arith.constant 0 : index
      %c0_61 = arith.constant 0 : index
      %76 = vector.load %arg4[%c4_59, %c0_60, %c0_61] : memref<9x8x8xbf16, #tpu.memory_space<vmem>>, vector<1x8x8xbf16>
      %77 = vector.shape_cast %76 : vector<1x8x8xbf16> to vector<8x8xbf16>
      %cst_62 = arith.constant dense<0.000000e+00> : vector<22x8xf32>
      %78 = tpu.matmul %75, %77, %cst_62 {dimension_numbers = #tpu.dot_dimension_numbers<[1], [0], [0], [1], [0, 0, 1, 1], [], []>} : vector<22x8xbf16>, vector<8x8xbf16>, vector<22x8xf32> -> vector<22x8xf32>
      %79 = arith.addf %74, %78 : vector<22x8xf32>
      %80 = vector.extract_strided_slice %54 {offsets = [2, 0], sizes = [22, 8], strides = [1, 1]} : vector<24x8xbf16> to vector<22x8xbf16>
      %c5 = arith.constant 5 : index
      %c0_63 = arith.constant 0 : index
      %c0_64 = arith.constant 0 : index
      %81 = vector.load %arg3[%c5, %c0_63, %c0_64] : memref<9x8x8xbf16, #tpu.memory_space<vmem>>, vector<1x8x8xbf16>
      %82 = vector.shape_cast %81 : vector<1x8x8xbf16> to vector<8x8xbf16>
      %cst_65 = arith.constant dense<0.000000e+00> : vector<22x8xf32>
      %83 = tpu.matmul %80, %82, %cst_65 {dimension_numbers = #tpu.dot_dimension_numbers<[1], [0], [0], [1], [0, 0, 1, 1], [], []>} : vector<22x8xbf16>, vector<8x8xbf16>, vector<22x8xf32> -> vector<22x8xf32>
      %84 = arith.addf %79, %83 : vector<22x8xf32>
      %85 = vector.extract_strided_slice %59 {offsets = [4, 0], sizes = [22, 8], strides = [1, 1]} : vector<28x8xbf16> to vector<22x8xbf16>
      %c5_66 = arith.constant 5 : index
      %c0_67 = arith.constant 0 : index
      %c0_68 = arith.constant 0 : index
      %86 = vector.load %arg4[%c5_66, %c0_67, %c0_68] : memref<9x8x8xbf16, #tpu.memory_space<vmem>>, vector<1x8x8xbf16>
      %87 = vector.shape_cast %86 : vector<1x8x8xbf16> to vector<8x8xbf16>
      %cst_69 = arith.constant dense<0.000000e+00> : vector<22x8xf32>
      %88 = tpu.matmul %85, %87, %cst_69 {dimension_numbers = #tpu.dot_dimension_numbers<[1], [0], [0], [1], [0, 0, 1, 1], [], []>} : vector<22x8xbf16>, vector<8x8xbf16>, vector<22x8xf32> -> vector<22x8xf32>
      %89 = arith.addf %84, %88 : vector<22x8xf32>
      %c2_i32_70 = arith.constant 2 : i32
      %90 = arith.addi %11, %c2_i32_70 : i32
      %c0_71 = arith.constant 0 : index
      %91 = arith.index_cast %90 : i32 to index
      %c0_72 = arith.constant 0 : index
      %c0_73 = arith.constant 0 : index
      %92 = vector.load %arg1[%c0_71, %91, %c0_72, %c0_73] : memref<1x24x24x8xbf16, #tpu.memory_space<vmem>>, vector<1x1x24x8xbf16>
      %93 = vector.shape_cast %92 : vector<1x1x24x8xbf16> to vector<24x8xbf16>
      %c2_i32_74 = arith.constant 2 : i32
      %94 = arith.addi %11, %c2_i32_74 : i32
      %c2_i32_75 = arith.constant 2 : i32
      %95 = arith.addi %94, %c2_i32_75 : i32
      %c0_76 = arith.constant 0 : index
      %96 = arith.index_cast %95 : i32 to index
      %c0_77 = arith.constant 0 : index
      %c0_78 = arith.constant 0 : index
      %97 = vector.load %arg2[%c0_76, %96, %c0_77, %c0_78] : memref<1x28x28x8xbf16, #tpu.memory_space<vmem>>, vector<1x1x28x8xbf16>
      %98 = vector.shape_cast %97 : vector<1x1x28x8xbf16> to vector<28x8xbf16>
      %99 = vector.extract_strided_slice %93 {offsets = [0, 0], sizes = [22, 8], strides = [1, 1]} : vector<24x8xbf16> to vector<22x8xbf16>
      %c6 = arith.constant 6 : index
      %c0_79 = arith.constant 0 : index
      %c0_80 = arith.constant 0 : index
      %100 = vector.load %arg3[%c6, %c0_79, %c0_80] : memref<9x8x8xbf16, #tpu.memory_space<vmem>>, vector<1x8x8xbf16>
      %101 = vector.shape_cast %100 : vector<1x8x8xbf16> to vector<8x8xbf16>
      %cst_81 = arith.constant dense<0.000000e+00> : vector<22x8xf32>
      %102 = tpu.matmul %99, %101, %cst_81 {dimension_numbers = #tpu.dot_dimension_numbers<[1], [0], [0], [1], [0, 0, 1, 1], [], []>} : vector<22x8xbf16>, vector<8x8xbf16>, vector<22x8xf32> -> vector<22x8xf32>
      %103 = arith.addf %89, %102 : vector<22x8xf32>
      %104 = vector.extract_strided_slice %98 {offsets = [2, 0], sizes = [22, 8], strides = [1, 1]} : vector<28x8xbf16> to vector<22x8xbf16>
      %c6_82 = arith.constant 6 : index
      %c0_83 = arith.constant 0 : index
      %c0_84 = arith.constant 0 : index
      %105 = vector.load %arg4[%c6_82, %c0_83, %c0_84] : memref<9x8x8xbf16, #tpu.memory_space<vmem>>, vector<1x8x8xbf16>
      %106 = vector.shape_cast %105 : vector<1x8x8xbf16> to vector<8x8xbf16>
      %cst_85 = arith.constant dense<0.000000e+00> : vector<22x8xf32>
      %107 = tpu.matmul %104, %106, %cst_85 {dimension_numbers = #tpu.dot_dimension_numbers<[1], [0], [0], [1], [0, 0, 1, 1], [], []>} : vector<22x8xbf16>, vector<8x8xbf16>, vector<22x8xf32> -> vector<22x8xf32>
      %108 = arith.addf %103, %107 : vector<22x8xf32>
      %109 = vector.extract_strided_slice %93 {offsets = [1, 0], sizes = [22, 8], strides = [1, 1]} : vector<24x8xbf16> to vector<22x8xbf16>
      %c7 = arith.constant 7 : index
      %c0_86 = arith.constant 0 : index
      %c0_87 = arith.constant 0 : index
      %110 = vector.load %arg3[%c7, %c0_86, %c0_87] : memref<9x8x8xbf16, #tpu.memory_space<vmem>>, vector<1x8x8xbf16>
      %111 = vector.shape_cast %110 : vector<1x8x8xbf16> to vector<8x8xbf16>
      %cst_88 = arith.constant dense<0.000000e+00> : vector<22x8xf32>
      %112 = tpu.matmul %109, %111, %cst_88 {dimension_numbers = #tpu.dot_dimension_numbers<[1], [0], [0], [1], [0, 0, 1, 1], [], []>} : vector<22x8xbf16>, vector<8x8xbf16>, vector<22x8xf32> -> vector<22x8xf32>
      %113 = arith.addf %108, %112 : vector<22x8xf32>
      %114 = vector.extract_strided_slice %98 {offsets = [3, 0], sizes = [22, 8], strides = [1, 1]} : vector<28x8xbf16> to vector<22x8xbf16>
      %c7_89 = arith.constant 7 : index
      %c0_90 = arith.constant 0 : index
      %c0_91 = arith.constant 0 : index
      %115 = vector.load %arg4[%c7_89, %c0_90, %c0_91] : memref<9x8x8xbf16, #tpu.memory_space<vmem>>, vector<1x8x8xbf16>
      %116 = vector.shape_cast %115 : vector<1x8x8xbf16> to vector<8x8xbf16>
      %cst_92 = arith.constant dense<0.000000e+00> : vector<22x8xf32>
      %117 = tpu.matmul %114, %116, %cst_92 {dimension_numbers = #tpu.dot_dimension_numbers<[1], [0], [0], [1], [0, 0, 1, 1], [], []>} : vector<22x8xbf16>, vector<8x8xbf16>, vector<22x8xf32> -> vector<22x8xf32>
      %118 = arith.addf %113, %117 : vector<22x8xf32>
      %119 = vector.extract_strided_slice %93 {offsets = [2, 0], sizes = [22, 8], strides = [1, 1]} : vector<24x8xbf16> to vector<22x8xbf16>
      %c8 = arith.constant 8 : index
      %c0_93 = arith.constant 0 : index
      %c0_94 = arith.constant 0 : index
      %120 = vector.load %arg3[%c8, %c0_93, %c0_94] : memref<9x8x8xbf16, #tpu.memory_space<vmem>>, vector<1x8x8xbf16>
      %121 = vector.shape_cast %120 : vector<1x8x8xbf16> to vector<8x8xbf16>
      %cst_95 = arith.constant dense<0.000000e+00> : vector<22x8xf32>
      %122 = tpu.matmul %119, %121, %cst_95 {dimension_numbers = #tpu.dot_dimension_numbers<[1], [0], [0], [1], [0, 0, 1, 1], [], []>} : vector<22x8xbf16>, vector<8x8xbf16>, vector<22x8xf32> -> vector<22x8xf32>
      %123 = arith.addf %118, %122 : vector<22x8xf32>
      %124 = vector.extract_strided_slice %98 {offsets = [4, 0], sizes = [22, 8], strides = [1, 1]} : vector<28x8xbf16> to vector<22x8xbf16>
      %c8_96 = arith.constant 8 : index
      %c0_97 = arith.constant 0 : index
      %c0_98 = arith.constant 0 : index
      %125 = vector.load %arg4[%c8_96, %c0_97, %c0_98] : memref<9x8x8xbf16, #tpu.memory_space<vmem>>, vector<1x8x8xbf16>
      %126 = vector.shape_cast %125 : vector<1x8x8xbf16> to vector<8x8xbf16>
      %cst_99 = arith.constant dense<0.000000e+00> : vector<22x8xf32>
      %127 = tpu.matmul %124, %126, %cst_99 {dimension_numbers = #tpu.dot_dimension_numbers<[1], [0], [0], [1], [0, 0, 1, 1], [], []>} : vector<22x8xbf16>, vector<8x8xbf16>, vector<22x8xf32> -> vector<22x8xf32>
      %128 = arith.addf %123, %127 : vector<22x8xf32>
      %cst_100 = arith.constant 0.000000e+00 : f32
      %129 = vector.broadcast %cst_100 : f32 to vector<22x8xf32>
      %130 = arith.maximumf %128, %129 : vector<22x8xf32>
      %131 = arith.truncf %130 : vector<22x8xf32> to vector<22x8xbf16>
      %132 = arith.index_cast %11 : i32 to index
      %c0_101 = arith.constant 0 : index
      %c0_102 = arith.constant 0 : index
      %133 = vector.load %arg9[%132, %c0_101, %c0_102] : memref<22x22x8xbf16, #tpu.memory_space<vmem>>, vector<1x22x8xbf16>
      %134 = vector.shape_cast %133 : vector<1x22x8xbf16> to vector<22x8xbf16>
      %135 = vector.shape_cast %131 : vector<22x8xbf16> to vector<1x22x8xbf16>
      tpu.vector_store %arg9[%132, %c0_101, %c0_102], %135 {strides = array<i32>} : memref<22x22x8xbf16, #tpu.memory_space<vmem>>, vector<1x22x8xbf16>,
    }
    %c22_i32_4 = arith.constant 22 : i32
    %c0_i32_5 = arith.constant 0 : i32
    %c20_i32 = arith.constant 20 : i32
    %9 = arith.addi %c0_i32_5, %c20_i32 : i32
    %c1_i32_6 = arith.constant 1 : i32
    scf.for %arg10 = %c0_i32_5 to %9 step %c1_i32_6  : i32 {
      %c1_i32_8 = arith.constant 1 : i32
      %10 = arith.muli %arg10, %c1_i32_8 : i32
      %c0_i32_9 = arith.constant 0 : i32
      %11 = arith.addi %c0_i32_9, %10 : i32
      %c0_i32_10 = arith.constant 0 : i32
      %12 = arith.addi %11, %c0_i32_10 : i32
      %13 = arith.index_cast %12 : i32 to index
      %c0_11 = arith.constant 0 : index
      %c0_12 = arith.constant 0 : index
      %14 = vector.load %arg9[%13, %c0_11, %c0_12] : memref<22x22x8xbf16, #tpu.memory_space<vmem>>, vector<1x22x8xbf16>
      %15 = vector.shape_cast %14 : vector<1x22x8xbf16> to vector<22x8xbf16>
      %16 = vector.extract_strided_slice %15 {offsets = [0, 0], sizes = [20, 8], strides = [1, 1]} : vector<22x8xbf16> to vector<20x8xbf16>
      %c0_13 = arith.constant 0 : index
      %c0_14 = arith.constant 0 : index
      %c0_15 = arith.constant 0 : index
      %17 = vector.load %arg6[%c0_13, %c0_14, %c0_15] : memref<9x8x8xbf16, #tpu.memory_space<vmem>>, vector<1x8x8xbf16>
      %18 = vector.shape_cast %17 : vector<1x8x8xbf16> to vector<8x8xbf16>
      %cst_16 = arith.constant dense<0.000000e+00> : vector<20x8xf32>
      %19 = tpu.matmul %16, %18, %cst_16 {dimension_numbers = #tpu.dot_dimension_numbers<[1], [0], [0], [1], [0, 0, 1, 1], [], []>} : vector<20x8xbf16>, vector<8x8xbf16>, vector<20x8xf32> -> vector<20x8xf32>
      %20 = arith.addf %7, %19 : vector<20x8xf32>
      %21 = vector.extract_strided_slice %15 {offsets = [1, 0], sizes = [20, 8], strides = [1, 1]} : vector<22x8xbf16> to vector<20x8xbf16>
      %c1 = arith.constant 1 : index
      %c0_17 = arith.constant 0 : index
      %c0_18 = arith.constant 0 : index
      %22 = vector.load %arg6[%c1, %c0_17, %c0_18] : memref<9x8x8xbf16, #tpu.memory_space<vmem>>, vector<1x8x8xbf16>
      %23 = vector.shape_cast %22 : vector<1x8x8xbf16> to vector<8x8xbf16>
      %cst_19 = arith.constant dense<0.000000e+00> : vector<20x8xf32>
      %24 = tpu.matmul %21, %23, %cst_19 {dimension_numbers = #tpu.dot_dimension_numbers<[1], [0], [0], [1], [0, 0, 1, 1], [], []>} : vector<20x8xbf16>, vector<8x8xbf16>, vector<20x8xf32> -> vector<20x8xf32>
      %25 = arith.addf %20, %24 : vector<20x8xf32>
      %26 = vector.extract_strided_slice %15 {offsets = [2, 0], sizes = [20, 8], strides = [1, 1]} : vector<22x8xbf16> to vector<20x8xbf16>
      %c2 = arith.constant 2 : index
      %c0_20 = arith.constant 0 : index
      %c0_21 = arith.constant 0 : index
      %27 = vector.load %arg6[%c2, %c0_20, %c0_21] : memref<9x8x8xbf16, #tpu.memory_space<vmem>>, vector<1x8x8xbf16>
      %28 = vector.shape_cast %27 : vector<1x8x8xbf16> to vector<8x8xbf16>
      %cst_22 = arith.constant dense<0.000000e+00> : vector<20x8xf32>
      %29 = tpu.matmul %26, %28, %cst_22 {dimension_numbers = #tpu.dot_dimension_numbers<[1], [0], [0], [1], [0, 0, 1, 1], [], []>} : vector<20x8xbf16>, vector<8x8xbf16>, vector<20x8xf32> -> vector<20x8xf32>
      %30 = arith.addf %25, %29 : vector<20x8xf32>
      %c1_i32_23 = arith.constant 1 : i32
      %31 = arith.addi %11, %c1_i32_23 : i32
      %32 = arith.index_cast %31 : i32 to index
      %c0_24 = arith.constant 0 : index
      %c0_25 = arith.constant 0 : index
      %33 = vector.load %arg9[%32, %c0_24, %c0_25] : memref<22x22x8xbf16, #tpu.memory_space<vmem>>, vector<1x22x8xbf16>
      %34 = vector.shape_cast %33 : vector<1x22x8xbf16> to vector<22x8xbf16>
      %35 = vector.extract_strided_slice %34 {offsets = [0, 0], sizes = [20, 8], strides = [1, 1]} : vector<22x8xbf16> to vector<20x8xbf16>
      %c3 = arith.constant 3 : index
      %c0_26 = arith.constant 0 : index
      %c0_27 = arith.constant 0 : index
      %36 = vector.load %arg6[%c3, %c0_26, %c0_27] : memref<9x8x8xbf16, #tpu.memory_space<vmem>>, vector<1x8x8xbf16>
      %37 = vector.shape_cast %36 : vector<1x8x8xbf16> to vector<8x8xbf16>
      %cst_28 = arith.constant dense<0.000000e+00> : vector<20x8xf32>
      %38 = tpu.matmul %35, %37, %cst_28 {dimension_numbers = #tpu.dot_dimension_numbers<[1], [0], [0], [1], [0, 0, 1, 1], [], []>} : vector<20x8xbf16>, vector<8x8xbf16>, vector<20x8xf32> -> vector<20x8xf32>
      %39 = arith.addf %30, %38 : vector<20x8xf32>
      %40 = vector.extract_strided_slice %34 {offsets = [1, 0], sizes = [20, 8], strides = [1, 1]} : vector<22x8xbf16> to vector<20x8xbf16>
      %c4 = arith.constant 4 : index
      %c0_29 = arith.constant 0 : index
      %c0_30 = arith.constant 0 : index
      %41 = vector.load %arg6[%c4, %c0_29, %c0_30] : memref<9x8x8xbf16, #tpu.memory_space<vmem>>, vector<1x8x8xbf16>
      %42 = vector.shape_cast %41 : vector<1x8x8xbf16> to vector<8x8xbf16>
      %cst_31 = arith.constant dense<0.000000e+00> : vector<20x8xf32>
      %43 = tpu.matmul %40, %42, %cst_31 {dimension_numbers = #tpu.dot_dimension_numbers<[1], [0], [0], [1], [0, 0, 1, 1], [], []>} : vector<20x8xbf16>, vector<8x8xbf16>, vector<20x8xf32> -> vector<20x8xf32>
      %44 = arith.addf %39, %43 : vector<20x8xf32>
      %45 = vector.extract_strided_slice %34 {offsets = [2, 0], sizes = [20, 8], strides = [1, 1]} : vector<22x8xbf16> to vector<20x8xbf16>
      %c5 = arith.constant 5 : index
      %c0_32 = arith.constant 0 : index
      %c0_33 = arith.constant 0 : index
      %46 = vector.load %arg6[%c5, %c0_32, %c0_33] : memref<9x8x8xbf16, #tpu.memory_space<vmem>>, vector<1x8x8xbf16>
      %47 = vector.shape_cast %46 : vector<1x8x8xbf16> to vector<8x8xbf16>
      %cst_34 = arith.constant dense<0.000000e+00> : vector<20x8xf32>
      %48 = tpu.matmul %45, %47, %cst_34 {dimension_numbers = #tpu.dot_dimension_numbers<[1], [0], [0], [1], [0, 0, 1, 1], [], []>} : vector<20x8xbf16>, vector<8x8xbf16>, vector<20x8xf32> -> vector<20x8xf32>
      %49 = arith.addf %44, %48 : vector<20x8xf32>
      %c2_i32 = arith.constant 2 : i32
      %50 = arith.addi %11, %c2_i32 : i32
      %51 = arith.index_cast %50 : i32 to index
      %c0_35 = arith.constant 0 : index
      %c0_36 = arith.constant 0 : index
      %52 = vector.load %arg9[%51, %c0_35, %c0_36] : memref<22x22x8xbf16, #tpu.memory_space<vmem>>, vector<1x22x8xbf16>
      %53 = vector.shape_cast %52 : vector<1x22x8xbf16> to vector<22x8xbf16>
      %54 = vector.extract_strided_slice %53 {offsets = [0, 0], sizes = [20, 8], strides = [1, 1]} : vector<22x8xbf16> to vector<20x8xbf16>
      %c6 = arith.constant 6 : index
      %c0_37 = arith.constant 0 : index
      %c0_38 = arith.constant 0 : index
      %55 = vector.load %arg6[%c6, %c0_37, %c0_38] : memref<9x8x8xbf16, #tpu.memory_space<vmem>>, vector<1x8x8xbf16>
      %56 = vector.shape_cast %55 : vector<1x8x8xbf16> to vector<8x8xbf16>
      %cst_39 = arith.constant dense<0.000000e+00> : vector<20x8xf32>
      %57 = tpu.matmul %54, %56, %cst_39 {dimension_numbers = #tpu.dot_dimension_numbers<[1], [0], [0], [1], [0, 0, 1, 1], [], []>} : vector<20x8xbf16>, vector<8x8xbf16>, vector<20x8xf32> -> vector<20x8xf32>
      %58 = arith.addf %49, %57 : vector<20x8xf32>
      %59 = vector.extract_strided_slice %53 {offsets = [1, 0], sizes = [20, 8], strides = [1, 1]} : vector<22x8xbf16> to vector<20x8xbf16>
      %c7 = arith.constant 7 : index
      %c0_40 = arith.constant 0 : index
      %c0_41 = arith.constant 0 : index
      %60 = vector.load %arg6[%c7, %c0_40, %c0_41] : memref<9x8x8xbf16, #tpu.memory_space<vmem>>, vector<1x8x8xbf16>
      %61 = vector.shape_cast %60 : vector<1x8x8xbf16> to vector<8x8xbf16>
      %cst_42 = arith.constant dense<0.000000e+00> : vector<20x8xf32>
      %62 = tpu.matmul %59, %61, %cst_42 {dimension_numbers = #tpu.dot_dimension_numbers<[1], [0], [0], [1], [0, 0, 1, 1], [], []>} : vector<20x8xbf16>, vector<8x8xbf16>, vector<20x8xf32> -> vector<20x8xf32>
      %63 = arith.addf %58, %62 : vector<20x8xf32>
      %64 = vector.extract_strided_slice %53 {offsets = [2, 0], sizes = [20, 8], strides = [1, 1]} : vector<22x8xbf16> to vector<20x8xbf16>
      %c8 = arith.constant 8 : index
      %c0_43 = arith.constant 0 : index
      %c0_44 = arith.constant 0 : index
      %65 = vector.load %arg6[%c8, %c0_43, %c0_44] : memref<9x8x8xbf16, #tpu.memory_space<vmem>>, vector<1x8x8xbf16>
      %66 = vector.shape_cast %65 : vector<1x8x8xbf16> to vector<8x8xbf16>
      %cst_45 = arith.constant dense<0.000000e+00> : vector<20x8xf32>
      %67 = tpu.matmul %64, %66, %cst_45 {dimension_numbers = #tpu.dot_dimension_numbers<[1], [0], [0], [1], [0, 0, 1, 1], [], []>} : vector<20x8xbf16>, vector<8x8xbf16>, vector<20x8xf32> -> vector<20x8xf32>
      %68 = arith.addf %63, %67 : vector<20x8xf32>
      %c0_46 = arith.constant 0 : index
      %69 = arith.index_cast %11 : i32 to index
      %c0_47 = arith.constant 0 : index
      %c0_48 = arith.constant 0 : index
      %70 = vector.load %arg8[%c0_46, %69, %c0_47, %c0_48] : memref<1x20x20x8xf32, #tpu.memory_space<vmem>>, vector<1x1x20x8xf32>
      %71 = vector.shape_cast %70 : vector<1x1x20x8xf32> to vector<20x8xf32>
      %72 = vector.shape_cast %68 : vector<20x8xf32> to vector<1x1x20x8xf32>
      tpu.vector_store %arg8[%c0_46, %69, %c0_47, %c0_48], %72 {strides = array<i32>} : memref<1x20x20x8xf32, #tpu.memory_space<vmem>>, vector<1x1x20x8xf32>,
    }
    %c20_i32_7 = arith.constant 20 : i32
    return
  }
  func.func @transform_0(%arg0: i32) -> (i32, i32, i32, i32) {
    %c0_i32 = arith.constant 0 : i32
    %c0_i32_0 = arith.constant 0 : i32
    %c0_i32_1 = arith.constant 0 : i32
    %c0_i32_2 = arith.constant 0 : i32
    return %arg0, %c0_i32, %c0_i32_0, %c0_i32_1 : i32, i32, i32, i32
  }
  func.func @transform_1(%arg0: i32) -> (i32, i32, i32, i32) {
    %c0_i32 = arith.constant 0 : i32
    %c0_i32_0 = arith.constant 0 : i32
    %c0_i32_1 = arith.constant 0 : i32
    %c0_i32_2 = arith.constant 0 : i32
    return %arg0, %c0_i32, %c0_i32_0, %c0_i32_1 : i32, i32, i32, i32
  }
  func.func @transform_2(%arg0: i32) -> (i32, i32, i32) {
    %c0_i32 = arith.constant 0 : i32
    %c0_i32_0 = arith.constant 0 : i32
    %c0_i32_1 = arith.constant 0 : i32
    %c0_i32_2 = arith.constant 0 : i32
    return %c0_i32, %c0_i32_0, %c0_i32_1 : i32, i32, i32
  }
  func.func @transform_3(%arg0: i32) -> (i32, i32, i32) {
    %c0_i32 = arith.constant 0 : i32
    %c0_i32_0 = arith.constant 0 : i32
    %c0_i32_1 = arith.constant 0 : i32
    %c0_i32_2 = arith.constant 0 : i32
    return %c0_i32, %c0_i32_0, %c0_i32_1 : i32, i32, i32
  }
  func.func @transform_4(%arg0: i32) -> (i32, i32) {
    %c0_i32 = arith.constant 0 : i32
    %c0_i32_0 = arith.constant 0 : i32
    %c0_i32_1 = arith.constant 0 : i32
    return %c0_i32, %c0_i32_0 : i32, i32
  }
  func.func @transform_5(%arg0: i32) -> (i32, i32, i32) {
    %c0_i32 = arith.constant 0 : i32
    %c0_i32_0 = arith.constant 0 : i32
    %c0_i32_1 = arith.constant 0 : i32
    %c0_i32_2 = arith.constant 0 : i32
    return %c0_i32, %c0_i32_0, %c0_i32_1 : i32, i32, i32
  }
  func.func @transform_6(%arg0: i32) -> (i32, i32) {
    %c0_i32 = arith.constant 0 : i32
    %c0_i32_0 = arith.constant 0 : i32
    %c0_i32_1 = arith.constant 0 : i32
    return %c0_i32, %c0_i32_0 : i32, i32
  }
  func.func @transform_7(%arg0: i32) -> (i32, i32, i32, i32) {
    %c0_i32 = arith.constant 0 : i32
    %c0_i32_0 = arith.constant 0 : i32
    %c0_i32_1 = arith.constant 0 : i32
    %c0_i32_2 = arith.constant 0 : i32
    return %arg0, %c0_i32, %c0_i32_0, %c0_i32_1 : i32, i32, i32, i32
  }
}

</mosaic_0001>

<bundles_post_ra>
// kernel: tile.18
= control target key start
LH: loop header
LB: loop body
LE: loop exit
PB: predicated region body
PF: predicated region fallthrough
CT: control target
= control target key end

     0   :  { %s22_s0 = inlined_call_operand.vmem [shape: f32[8], index: 0, kind: input, shape index: {}]   ;;  %s23_s1 = inlined_call_operand.vmem [shape: f32[2,8], index: 1, kind: output, shape index: {}]  }
   0x1   :  { %v4_v0 = vld [vmem:[%s22_s0] ss:$0 sm:$0xff] }
   0x2   :  { %5 = vst [vmem:[%s23_s1] sm:$0x3] %v4_v0 }

// kernel: tile.19
= control target key start
LH: loop header
LB: loop body
LE: loop exit
PB: predicated region body
PF: predicated region fallthrough
CT: control target
= control target key end

     0   :  { %vm7_vm0 = vcmask 64512   ;;  %vm13_vm1 = vcmask 130112   ;;  %s39_s0 = inlined_call_operand.vmem [shape: f32[2,8], index: 0, kind: input, shape index: {}]   ;;  %s40_s1 = inlined_call_operand.vmem [shape: f32[1,16], index: 1, kind: output, shape index: {}]  }
   0x1   :  { %v4_v0 = vld [vmem:[%s39_s0] sm:$0x3]  ;;  %s22_s0 = smov 8  }
   0x2   :  { %5 = vst [vmem:[#allocation1] sm:$0x3] %v4_v0 }
   0x9   :  { %v10_v1 = vld [vmem:[#allocation1 + $0x1] sm:$0x1]   ;;  %v6_v2 = vld [vmem:[#allocation1] sm:$0x1]  }
   0xa   :  { %11 = vrot.lane.b32.xlu0 %v10_v1, %s22_s0  ;;  %8 = vst.msk [vmem:[#allocation0] sm:$0x1] %vm7_vm0, %v6_v2  }
  0x7c   :  { %v12_v3 = vpop.permute.xlu0 %11  }
  0x7d   :  { %14 = vst.msk [vmem:[#allocation0] sm:$0x1] %vm13_vm1, %v12_v3  }
  0x84   :  { %v18_v4 = vld [vmem:[#allocation0] sm:$0x1] }
  0x85   :  { %20 = vst [vmem:[%s40_s1] sm:$0x1] %v18_v4 }

// kernel: tile.14
= control target key start
LH: loop header
LB: loop body
LE: loop exit
PB: predicated region body
PF: predicated region fallthrough
CT: control target
= control target key end

     0   :  { %vm7_vm0 = vcmask 130048   ;;  %vm13_vm1 = vcmask 261248   ;;  %s39_s0 = inlined_call_operand.vmem [shape: f32[2,16], index: 0, kind: input, shape index: {}]   ;;  %s40_s1 = inlined_call_operand.vmem [shape: f32[1,32], index: 1, kind: output, shape index: {}]  }
   0x1   :  { %v4_v0 = vld [vmem:[%s39_s0] sm:$0x3]  ;;  %s22_s0 = smov 16  }
   0x2   :  { %5 = vst [vmem:[#allocation1] sm:$0x3] %v4_v0 }
   0x9   :  { %v10_v1 = vld [vmem:[#allocation1 + $0x1] sm:$0x1]   ;;  %v6_v2 = vld [vmem:[#allocation1] sm:$0x1]  }
   0xa   :  { %11 = vrot.lane.b32.xlu0 %v10_v1, %s22_s0  ;;  %8 = vst.msk [vmem:[#allocation0] sm:$0x1] %vm7_vm0, %v6_v2  }
  0x7c   :  { %v12_v3 = vpop.permute.xlu0 %11  }
  0x7d   :  { %14 = vst.msk [vmem:[#allocation0] sm:$0x1] %vm13_vm1, %v12_v3  }
  0x84   :  { %v18_v4 = vld [vmem:[#allocation0] sm:$0x1] }
  0x85   :  { %20 = vst [vmem:[%s40_s1] sm:$0x1] %v18_v4 }

// kernel: tile.13
= control target key start
LH: loop header
LB: loop body
LE: loop exit
PB: predicated region body
PF: predicated region fallthrough
CT: control target
= control target key end

     0   :  { %s22_s0 = inlined_call_operand.vmem [shape: f32[16], index: 0, kind: input, shape index: {}]   ;;  %s23_s1 = inlined_call_operand.vmem [shape: f32[2,16], index: 1, kind: output, shape index: {}]  }
   0x1   :  { %v4_v0 = vld [vmem:[%s22_s0] ss:$0 sm:$0xff] }
   0x2   :  { %5 = vst [vmem:[%s23_s1] sm:$0x3] %v4_v0 }

// kernel: decoder_forward.4
= control target key start
LH: loop header
LB: loop body
LE: loop exit
PB: predicated region body
PF: predicated region fallthrough
CT: control target
= control target key end

     0   :  { %s499_s12 = smov 0   ;;  %s547_s0 = inlined_call_operand.vmem [shape: bf16[2,8,8,32], index: 0, kind: input, shape index: {}]   ;;  %s548_s1 = inlined_call_operand.vmem [shape: bf16[2,32,32], index: 1, kind: input, shape index: {}]   ;;  %s549_s2 = inlined_call_operand.vmem [shape: f32[1,32], index: 2, kind: input, shape index: {}]   ;;  %s550_s3 = inlined_call_operand.vmem [shape: bf16[2,16,8,32], index: 3, kind: output, shape index: {}]  }
   0x1 LB: > { %s385_s13 = sadd.s32 4294967295, %s471_s12   ;;  %p389_p0 = scmp.ge.s32.totalorder %s471_s12, 1  ;;  %s471_s12 = sphi %s499_s12, %s13_s12  }
   0x2   : > { %p137_p1 = scmp.lt.s32.totalorder %s471_s12, 3 }
   0x4   : > { %p138_p2 = pnand %p389_p0, %p137_p1 }
   0x5   : > { %p161_p3 = scmp.lt.s32.totalorder (!%p138_p2), %s385_s13, 1  ;;  %v394_v0 = vld [vmem:[%s549_s2] ss:$0 sm:$0xff] (!%p138_p2)  ;;  %s520_s24 = smov (!%p138_p2), 0  }
   0x6   : > { %141 = sbr.rel (%p138_p2) target bundleno = 243 (0xf3), region = 32 }
   0xd   : > { %s552_s13 = smov (!%p161_p3, %s385_s13), 1 }
   0xe   : > { %s413_s16 = sshll.u32 %s552_s13, 5  ;;  %s414_s17 = sshll.u32 %s552_s13, 6 }
   0xf   : > { %s513_s20 = scalar_lea.vmem %s547_s0, %s413_s16  ;;  %s518_s23 = scalar_lea.vmem %s550_s3, %s414_s17 }
  0x10 LB: >> { %v457_v1 = vld [vmem:[%s548_s1] sm:$0xff]   ;;  %v477_v2 = vmov 0.0   ;;  %v458_v3 = vld [vmem:[%s548_s1 + $0x10] sm:$0xff]   ;;  %v459_v4 = vld [vmem:[%s548_s1 + $0x8] sm:$0xff]   ;;  %vm478_vm0 = vmmov 0   ;;  %s395_s4 = sshll.u32 %s475_s24, 2  ;;  %s475_s24 = sphi %s520_s24, %s185_s24  }
  0x11   : >> { %423 = vmatprep.subr.bf16.mxu0 %v477_v2  ;;  %431 = vmatprep.subr.bf16.mxu1 %v477_v2  ;;  %v460_v5 = vld [vmem:[%s548_s1 + $0x18] sm:$0xff]   ;;  %s187_s7 = scalar_lea.vmem %s513_s20, %s395_s4  ;;  %vm205_vm1 = vcmask 261120   ;;  %s415_s8 = sshll.u32 %s475_s24, 3  ;;  %vm253_vm2 = vcmask 257024  }
  0x12   : >> { %424 = vmatpush3.bf16.msra.mxu0 %v457_v1  ;;  %427 = vmatprep.mubr.msk.bf16.mxu0 %vm478_vm0, %v477_v2  ;;  %v188_v6 = vld [vmem:[%s187_s7] sm:$0xf]  ;;  %s252_s9 = scalar_lea.vmem %s518_s23, %s415_s8  ;;  %s185_s24 = sadd.s32 1, %s475_s24  }
  0x13   : >> { %432 = vmatpush3.bf16.msra.mxu1 %v458_v3  ;;  %425 = vmatprep.subr.bf16.mxu0 %v477_v2  ;;  %p182_p4 = scmp.ge.s32.totalorder %s185_s24, 8  }
  0x14   : >> { %433 = vmatprep.subr.bf16.mxu1 %v477_v2  ;;  %435 = vmatprep.mubr.msk.bf16.mxu1 %vm478_vm0, %v477_v2 }
  0x16   : >> { %426 = vmatpush3.bf16.msra.mxu0 %v459_v4 }
  0x17   : >> { %434 = vmatpush3.bf16.msra.mxu1 %v460_v5 }
  0x19   : >> { %428 = vmatmul.mubr.msk.bf16.vlgmr.msra.gmra.mrb[0].mxu0 %vm205_vm1, %v188_v6 }
  0x1a   : >> { %436 = vmatmul.mubr.msk.bf16.vlgmr.msra.gmra.mrb[0].mxu1 %vm205_vm1, %v188_v6 }
  0xec   : >> { %v243_v7 = vpop.f32.mrb[0].mxu0  ;;  %184 = sbr.rel (!%p182_p4) target bundleno = 16 (0x10), region = 73 }
  0xed   : >> { %v244_v8 = vadd.f32 %v394_v0, %v243_v7  ;;  %v306_v9 = vpop.f32.mrb[0].mxu1  ;;  %v429_v10 = vpop.f32.mrb[1].mxu0 }
  0xee   : >> { %v307_v11 = vadd.f32 %v394_v0, %v306_v9  ;;  %v437_v12 = vpop.f32.mrb[1].mxu1  ;;  %v246_v13 = vpop.f32.mrb[2].mxu0 }
  0xef   : >> { %v249_v14 = vpack.c.bf16 %v244_v8, %v244_v8  ;;  %v309_v15 = vpop.f32.mrb[2].mxu1  ;;  %v430_v16 = vpop.f32.mrb[3].mxu0 }
  0xf0   : >> { %v312_v17 = vpack.c.bf16 %v307_v11, %v307_v11  ;;  %v438_v18 = vpop.f32.mrb[3].mxu1 }
  0xf1   : >> { %254 = vst.msk [vmem:[%s252_s9] sm:$0xf] %vm253_vm2, %v249_v14 }
  0xf2   : >> { %410 = vst.msk [vmem:[%s252_s9 + $0x4] sm:$0xf] %vm253_vm2, %v312_v17 }
  0xf3 PF: > { %s13_s12 = sadd.s32 1, %s471_s12  }
  0xf4   : > { %p10_p5 = scmp.ge.s32.totalorder %s13_s12, 4  }
  0xf6   :  { %12 = sbr.rel (!%p10_p5) target bundleno = 1 (0x1), region = 84 }

// kernel: decoder_forward.6
= control target key start
LH: loop header
LB: loop body
LE: loop exit
PB: predicated region body
PF: predicated region fallthrough
CT: control target
= control target key end

     0   :  { %s510_s12 = smov 0   ;;  %s552_s0 = inlined_call_operand.vmem [shape: bf16[2,12,12,16], index: 0, kind: input, shape index: {}]   ;;  %s553_s1 = inlined_call_operand.vmem [shape: bf16[2,16,16], index: 1, kind: input, shape index: {}]   ;;  %s554_s2 = inlined_call_operand.vmem [shape: f32[1,16], index: 2, kind: input, shape index: {}]   ;;  %s555_s3 = inlined_call_operand.vmem [shape: bf16[2,24,12,16], index: 3, kind: output, shape index: {}]  }
   0x1 LB: > { %s396_s13 = sadd.s32 4294967295, %s482_s12   ;;  %p400_p0 = scmp.ge.s32.totalorder %s482_s12, 1  ;;  %s482_s12 = sphi %s510_s12, %s13_s12  }
   0x2   : > { %p137_p1 = scmp.lt.s32.totalorder %s482_s12, 3 }
   0x4   : > { %p138_p2 = pnand %p400_p0, %p137_p1 }
   0x5   : > { %p161_p3 = scmp.lt.s32.totalorder (!%p138_p2), %s396_s13, 1  ;;  %v403_v0 = vld [vmem:[%s554_s2] ss:$0 sm:$0xff] (!%p138_p2)  ;;  %s531_s24 = smov (!%p138_p2), 0  }
   0x6   : > { %141 = sbr.rel (%p138_p2) target bundleno = 243 (0xf3), region = 32 }
   0xd   : > { %s557_s13 = smov (!%p161_p3, %s396_s13), 1 }
   0xe   : > { %s449_s16 = smul.u32 96, %s557_s13 }
   0xf   : > { %s450_s17 = smul.u32 192, %s557_s13 }
  0x10   : > { %s524_s20 = scalar_lea.vmem %s552_s0, %s449_s16 }
  0x11   : > { %s529_s23 = scalar_lea.vmem %s555_s3, %s450_s17 }
  0x12 LB: >> { %v469_v1 = vld [vmem:[%s553_s1] sm:$0xff]   ;;  %v488_v2 = vmov 0.0   ;;  %v470_v3 = vld [vmem:[%s553_s1 + $0x8] sm:$0xff]   ;;  %vm489_vm0 = vmmov 0   ;;  %s425_s29 = sshll.u32 %s486_s24, 3  ;;  %vm204_vm1 = vcmask 130048   ;;  %s486_s24 = sphi %s531_s24, %s185_s24  }
  0x13   : >> { %437 = vmatprep.subr.bf16.mxu0 %v488_v2  ;;  %443 = vmatprep.subr.bf16.mxu1 %v488_v2  ;;  %s188_s30 = scalar_lea.vmem %s524_s20, %s425_s29  ;;  %s429_s4 = sshll.u32 %s486_s24, 4  ;;  %vm260_vm2 = vcmask 125952   ;;  %vm262_vm3 = vcmask 123904  }
  0x14   : >> { %438 = vmatpush3.bf16.msra.mxu0 %v469_v1  ;;  %439 = vmatprep.mubr.msk.bf16.mxu0 %vm489_vm0, %v488_v2  ;;  %v471_v4 = vld [vmem:[%s188_s30] sm:$0x3f]   ;;  %s259_s5 = scalar_lea.vmem %s529_s23, %s429_s4  ;;  %s185_s24 = sadd.s32 1, %s486_s24  }
  0x15   : >> { %444 = vmatpush3.bf16.msra.mxu1 %v470_v3  ;;  %445 = vmatprep.mubr.msk.bf16.mxu1 %vm489_vm0, %v488_v2  ;;  %p182_p4 = scmp.ge.s32.totalorder %s185_s24, 12  }
  0x17   : >> { %440 = vmatmul.mubr.msk.bf16.vlgmr.msra.gmra.mrb[0].mxu0 %vm204_vm1, %v471_v4 }
  0x18   : >> { %446 = vmatmul.mubr.msk.bf16.vlgmr.msra.gmra.mrb[0].mxu1 %vm204_vm1, %v471_v4 }
  0xea   : >> { %v242_v5 = vpop.f32.mrb[0].mxu0 }
  0xeb   : >> { %v307_v6 = vpop.f32.mrb[0].mxu1  ;;  %v243_v7 = vadd.f32 %v403_v0, %v242_v5  ;;  %v441_v9 = vpop.f32.mrb[1].mxu0 }
  0xec   : >> { %v308_v8 = vadd.f32 %v403_v0, %v307_v6  ;;  %v447_v10 = vpop.f32.mrb[1].mxu1  ;;  %v245_v11 = vpop.f32.mrb[2].mxu0  ;;  %184 = sbr.rel (!%p182_p4) target bundleno = 18 (0x12), region = 73 }
  0xed   : >> { %v310_v12 = vpop.f32.mrb[2].mxu1  ;;  %v426_v13 = vpack.c.bf16 %v243_v7, %v243_v7  ;;  %v246_v15 = vadd.f32 %v403_v0, %v245_v11  ;;  %v442_v17 = vpop.f32.mrb[3].mxu0 }
  0xee   : >> { %v430_v14 = vpack.c.bf16 %v308_v8, %v308_v8  ;;  %v311_v16 = vadd.f32 %v403_v0, %v310_v12  ;;  %v448_v18 = vpop.f32.mrb[3].mxu1 }
  0xef   : >> { %261 = vst.msk [vmem:[%s259_s5] sm:$0xf] %vm260_vm2, %v426_v13  ;;  %v427_v19 = vpack.c.bf16 %v246_v15, %v246_v15 }
  0xf0   : >> { %421 = vst.msk [vmem:[%s259_s5 + $0x8] sm:$0xf] %vm260_vm2, %v430_v14  ;;  %v431_v20 = vpack.c.bf16 %v311_v16, %v311_v16 }
  0xf1   : >> { %263 = vst.msk [vmem:[%s259_s5 + $0x4] sm:$0x3] %vm262_vm3, %v427_v19 }
  0xf2   : >> { %422 = vst.msk [vmem:[%s259_s5 + $0xc] sm:$0x3] %vm262_vm3, %v431_v20 }
  0xf3 PF: > { %s13_s12 = sadd.s32 1, %s482_s12  }
  0xf4   : > { %p10_p5 = scmp.ge.s32.totalorder %s13_s12, 4  }
  0xf6   :  { %12 = sbr.rel (!%p10_p5) target bundleno = 1 (0x1), region = 84 }

// kernel: decoder_forward.5
= control target key start
LH: loop header
LB: loop body
LE: loop exit
PB: predicated region body
PF: predicated region fallthrough
CT: control target
= control target key end

     0   :  { %s2771_s24 = smov 0   ;;  %s3093_s0 = inlined_call_operand.vmem [shape: bf16[2,16,16,16], index: 0, kind: input, shape index: {}]   ;;  %s3094_s1 = inlined_call_operand.vmem [shape: bf16[2,20,20,16], index: 1, kind: input, shape index: {}]   ;;  %s3095_s2 = inlined_call_operand.vmem [shape: bf16[9,16,16], index: 2, kind: input, shape index: {}]   ;;  %s3096_s3 = inlined_call_operand.vmem [shape: bf16[9,16,16], index: 3, kind: input, shape index: {}]   ;;  %s3097_s4 = inlined_call_operand.vmem [shape: f32[1,16], index: 4, kind: input, shape index: {}]   ;;  %s3098_s5 = inlined_call_operand.vmem [shape: bf16[9,16,16], index: 5, kind: input, shape index: {}]   ;;  %s3099_s6 = inlined_call_operand.vmem [shape: f32[1,16], index: 6, kind: input, shape index: {}]   ;;  %s3100_s7 = inlined_call_operand.vmem [shape: bf16[2,12,12,16], index: 7, kind: output, shape index: {}]  }
   0x1 LB: > { %s2151_s25 = sadd.s32 4294967295, %s2717_s24   ;;  %p2155_p0 = scmp.ge.s32.totalorder %s2717_s24, 1  ;;  %s2717_s24 = sphi %s2771_s24, %s17_s24  }
   0x2   : > { %p247_p1 = scmp.lt.s32.totalorder %s2717_s24, 3 }
   0x4   : > { %p248_p2 = pnand %p2155_p0, %p247_p1 }
   0x5   : > { %p284_p3 = scmp.lt.s32.totalorder (!%p248_p2), %s2151_s25, 1  ;;  %v2782_v0 = vld [vmem:[%s3097_s4] ss:$0 sm:$0xff] (!%p248_p2)  ;;  %s2804_s19 = smov (!%p248_p2), 0  }
   0x6   : > { %251 = sbr.rel (%p248_p2) target bundleno = 627 (0x273), region = 48  ;;  %v2787_v1 = vld [vmem:[%s3099_s6] ss:$0 sm:$0xff] (!%p248_p2) }
   0xd   : > { %s3102_s25 = smov (!%p284_p3, %s2151_s25), 1 }
   0xe   : > { %s2309_s30 = sshll.u32 %s3102_s25, 7  ;;  %s2634_s8 = smul.u32 240, %s3102_s25 }
   0xf   : > { %s2792_s11 = scalar_lea.vmem %s3093_s0, %s2309_s30  ;;  %s2635_s12 = smul.u32 96, %s3102_s25 }
  0x10   : > { %s2797_s15 = scalar_lea.vmem %s3094_s1, %s2634_s8 }
  0x11   : > { %s2802_s18 = scalar_lea.vmem %s3100_s7, %s2635_s12 }
  0x12 LB: >> { %v2664_v2 = vld [vmem:[%s3095_s2] sm:$0xff]   ;;  %v2727_v3 = vmov 0.0   ;;  %vm2728_vm0 = vmmov 0   ;;  %s2310_s22 = sshll.u32 %s2721_s19, 3  ;;  %s2084_s23 = smul.u32 12, %s2721_s19  ;;  %vm347_vm1 = vcmask 130048   ;;  %s2721_s19 = sphi %s2804_s19, %s321_s19  }
  0x13   : >> { %2372 = vmatprep.subr.bf16.mxu1 %v2727_v3  ;;  %2426 = vmatprep.subr.bf16.mxu0 %v2727_v3  ;;  %v2666_v4 = vld [vmem:[%s3096_s3 + $0x20] sm:$0xff]   ;;  %s2824_s27 = scalar_lea.vmem %s2792_s11, %s2310_s22  ;;  %vm521_vm2 = vsmask.f32 6400  ;;  %v2670_v17 = vld [vmem:[%s3095_s2 + $0x28] sm:$0xff]   ;;  %vm646_vm3 = vcmask 1045504   ;;  %v2676_v53 = vld [vmem:[%s3095_s2 + $0x30] sm:$0xff]  }
  0x14   : >> { %2373 = vmatpush3.bf16.msra.mxu1 %v2664_v2  ;;  %2374 = vmatprep.mubr.msk.bf16.mxu1 %vm2728_vm0, %v2727_v3  ;;  %v2667_v5 = vld [vmem:[%s3096_s3] sm:$0xff]   ;;  %s2833_s30 = scalar_lea.vmem %s2797_s15, %s2084_s23  ;;  %v2672_v20 = vld [vmem:[%s3095_s2 + $0x8] sm:$0xff]   ;;  %v2678_v55 = vld [vmem:[%s3095_s2 + $0x10] sm:$0xff]   ;;  %vm1473_vm4 = vcmask 125952   ;;  %vm1475_vm5 = vcmask 124928   ;;  %s1472_s28 = scalar_lea.vmem [#allocation2], %s2310_s22 }
  0x15   : >> { %2378 = vmatprep.subr.bf16.mxu1 %v2727_v3  ;;  %2428 = vmatprep.mubr.msk.bf16.mxu0 %vm2728_vm0, %v2727_v3  ;;  %v2836_v6 = vld [vmem:[%s2824_s27] sm:$0xff]   ;;  %v2845_v8 = vld [vmem:[%s2833_s30 + $0x2c] ss:$0 sps:$4 sm:$0x33]   ;;  %v2854_v15 = vld [vmem:[%s2833_s30 + $0x18] sm:$0xff]   ;;  %s321_s19 = sadd.s32 1, %s2721_s19  }
  0x16   : >> { %2427 = vmatpush3.bf16.msra.mxu0 %v2666_v4  ;;  %v2842_v7 = vld [vmem:[%s2833_s30 + $0x24] sm:$0xff]   ;;  %v912_v11 = vshll.u32 %v2845_v8, 16  ;;  %v401_v19 = vrot.slane %v2854_v15, 1  ;;  %v459_v21 = vshll.u32 %v2836_v6, 16  ;;  %v2877_v23 = vld [vmem:[%s2833_s30 + $0x30] sm:$0xff]   ;;  %v457_v24 = vshrl.u32 %v2836_v6, 16 }
  0x17   : >> { %2432 = vmatprep.subr.bf16.mxu0 %v2727_v3  ;;  %2375 = vmatmul.mubr.msk.bf16.vlgmr.msra.gmra.mrb[0].mxu1 %vm347_vm1, %v2836_v6  ;;  %v904_v9 = vshrl.u32 %v2842_v7, 16  ;;  %v907_v10 = vshll.u32 %v2842_v7, 16  ;;  %v2871_v22 = vld [vmem:[%s2824_s27 + $0x8] sm:$0xff]   ;;  %v1283_v27 = vshrl.u32 %v2877_v23, 16  ;;  %v523_v31 = vshrl.u32 %v2854_v15, 16  ;;  %v2679_v56 = vld [vmem:[%s2824_s27 + $0x10] sm:$0xff]  }
  0x18   : >> { %2379 = vmatpush3.bf16.msra.mxu1 %v2667_v5  ;;  %2380 = vmatprep.mubr.msk.bf16.mxu1 %vm2728_vm0, %v2727_v3  ;;  %v914_v14 = vrot.slane %v912_v11, 2  ;;  %v461_v25 = vrot.slane %v459_v21, 1  ;;  %v971_v26 = vrot.slane %v2871_v22, 1  ;;  %v2674_v28 = vld [vmem:[%s3096_s3 + $0x28] sm:$0xff]   ;;  %v1286_v35 = vshll.u32 %v2877_v23, 16  ;;  %v2680_v57 = vld [vmem:[%s3096_s3 + $0x30] sm:$0xff]  }
  0x19   : >> { %2384 = vmatprep.subr.bf16.mxu1 %v2727_v3  ;;  %v906_v12 = vrot.slane %v904_v9, 1  ;;  %v909_v13 = vrot.slane %v907_v10, 2  ;;  %v2675_v29 = vld [vmem:[%s3096_s3 + $0x8] sm:$0xff]   ;;  %v2677_v30 = vld [vmem:[%s2833_s30 + $0x20] ss:$0 sps:$4 sm:$0x33]  }
  0x1a   : >> { %v2687_v32 = vld [vmem:[%s2833_s30 + $0x38] ss:$0 sps:$4 sm:$0x33]   ;;  %v462_v33 = vor.u32 %v461_v25, %v457_v24  ;;  %v1285_v34 = vrot.slane %v1283_v27, 1  ;;  %v526_v36 = vshll.u32 %v2854_v15, 16  ;;  %v1288_v38 = vrot.slane %v1286_v35, 2 }
  0x1b   : >> { %v910_v16 = vor.u32 %v909_v13, %v906_v12  ;;  %v1291_v37 = vshll.u32 %v2687_v32, 16  ;;  %v1406_v40 = vrot.slane %v2877_v23, 2  ;;  %v1407_v42 = vrot.slane %v2687_v32, 2  ;;  %v2681_v59 = vld [vmem:[%s3096_s3 + $0x10] sm:$0xff]   ;;  %v2683_v63 = vld [vmem:[%s3095_s2 + $0x38] sm:$0xff]   ;;  %v2688_v12 = vld [vmem:[%s3095_s2 + $0x40] sm:$0xff]  }
  0x1c   : >> { %v1289_v41 = vor.u32 %v1288_v38, %v1285_v34  ;;  %v525_v43 = vrot.slane %v523_v31, 1  ;;  %v528_v44 = vrot.slane %v526_v36, 2  ;;  %v531_v45 = vshll.u32 %v2677_v30, 16  ;;  %v2684_v4 = vld [vmem:[%s3095_s2 + $0x18] sm:$0xff]   ;;  %p318_p4 = scmp.ge.s32.totalorder %s321_s19, 14  }
  0x1d   : >> { %v915_v18 = vsel %vm521_vm2, %v910_v16, %v914_v14  ;;  %v1293_v39 = vrot.slane %v1291_v37, 2  ;;  %v1027_v46 = vrot.slane %v2842_v7, 2  ;;  %v1028_v47 = vrot.slane %v2845_v8, 2  ;;  %v2685_v10 = vld [vmem:[%s3096_s3 + $0x38] sm:$0xff]   ;;  %v2689_v14 = vld [vmem:[%s3095_s2 + $0x20] sm:$0xff]   ;;  %s3005_s29 = smov (%p318_p4), 0  }
  0x1e   : >> { %2429 = vmatmul.mubr.msk.bf16.vlgmr.msra.gmra.mrb[0].mxu0 %vm347_vm1, %v915_v18  ;;  %v2906_v49 = vsel %vm646_vm3, %v1406_v40, %v1407_v42  ;;  %v529_v50 = vor.u32 %v528_v44, %v525_v43  ;;  %v533_v51 = vrot.slane %v531_v45, 2  ;;  %v590_v58 = vrot.slane %v2836_v6, 1  ;;  %v2686_v11 = vld [vmem:[%s3096_s3 + $0x18] sm:$0xff]   ;;  %v2690_v18 = vld [vmem:[%s3096_s3 + $0x40] sm:$0xff]  }
  0x1f   : >> { %2433 = vmatpush3.bf16.msra.mxu0 %v2670_v17  ;;  %2434 = vmatprep.mubr.msk.bf16.mxu0 %vm2728_vm0, %v2727_v3  ;;  %v1294_v48 = vsel %vm521_vm2, %v1289_v41, %v1293_v39  ;;  %v1029_v52 = vsel %vm646_vm3, %v1027_v46, %v1028_v47  ;;  %v1162_v60 = vrot.slane %v2877_v23, 1  ;;  %v647_v61 = vrot.slane %v2854_v15, 2 }
  0x20   : >> { %2438 = vmatprep.subr.bf16.mxu0 %v2727_v3  ;;  %v534_v54 = vsel %vm521_vm2, %v529_v50, %v533_v51  ;;  %v648_v62 = vrot.slane %v2677_v30, 2  ;;  %v1220_v5 = vshll.u32 %v2679_v56, 16  ;;  %v1218_v6 = vshrl.u32 %v2679_v56, 16 }
  0x21   : >> { %v783_v13 = vrot.slane %v2842_v7, 1  ;;  %v841_v15 = vshll.u32 %v2871_v22, 16  ;;  %v839_v7 = vshrl.u32 %v2871_v22, 16  ;;  %v1350_v17 = vrot.slane %v2679_v56, 1 }
  0x22   : >> { %v649_v2 = vsel %vm646_vm3, %v647_v61, %v648_v62  ;;  %v1222_v8 = vrot.slane %v1220_v5, 1 }
  0x23   : >> { %2381 = vmatmul.mubr.msk.bf16.vlgmr.msra.gmra.mrb[0].mxu1 %vm347_vm1, %v401_v19  ;;  %v843_v16 = vrot.slane %v841_v15, 1 }
  0x24   : >> { %2385 = vmatpush3.bf16.msra.mxu1 %v2672_v20  ;;  %2386 = vmatprep.mubr.msk.bf16.mxu1 %vm2728_vm0, %v2727_v3  ;;  %v1223_v9 = vor.u32 %v1222_v8, %v1218_v6 }
  0x25   : >> { %2390 = vmatprep.subr.bf16.mxu1 %v2727_v3  ;;  %v844_v19 = vor.u32 %v843_v16, %v839_v7 }
  0x2a   : >> { %2435 = vmatmul.mubr.msk.bf16.vlgmr.msra.gmra.mrb[0].mxu0 %vm347_vm1, %v971_v26 }
  0x2b   : >> { %2439 = vmatpush3.bf16.msra.mxu0 %v2674_v28  ;;  %2440 = vmatprep.mubr.msk.bf16.mxu0 %vm2728_vm0, %v2727_v3 }
  0x2c   : >> { %2444 = vmatprep.subr.bf16.mxu0 %v2727_v3 }
  0x2f   : >> { %2387 = vmatmul.mubr.msk.bf16.vlgmr.msra.gmra.mrb[0].mxu1 %vm347_vm1, %v462_v33 }
  0x30   : >> { %2391 = vmatpush3.bf16.msra.mxu1 %v2675_v29  ;;  %2392 = vmatprep.mubr.msk.bf16.mxu1 %vm2728_vm0, %v2727_v3 }
  0x31   : >> { %2396 = vmatprep.subr.bf16.mxu1 %v2727_v3 }
  0x36   : >> { %2441 = vmatmul.mubr.msk.bf16.vlgmr.msra.gmra.mrb[0].mxu0 %vm347_vm1, %v1029_v52 }
  0x37   : >> { %2445 = vmatpush3.bf16.msra.mxu0 %v2676_v53  ;;  %2446 = vmatprep.mubr.msk.bf16.mxu0 %vm2728_vm0, %v2727_v3 }
  0x38   : >> { %2450 = vmatprep.subr.bf16.mxu0 %v2727_v3 }
  0x3b   : >> { %2393 = vmatmul.mubr.msk.bf16.vlgmr.msra.gmra.mrb[0].mxu1 %vm347_vm1, %v534_v54 }
  0x3c   : >> { %2397 = vmatpush3.bf16.msra.mxu1 %v2678_v55  ;;  %2398 = vmatprep.mubr.msk.bf16.mxu1 %vm2728_vm0, %v2727_v3 }
  0x3d   : >> { %2402 = vmatprep.subr.bf16.mxu1 %v2727_v3 }
  0x42   : >> { %2447 = vmatmul.mubr.msk.bf16.vlgmr.msra.gmra.mrb[0].mxu0 %vm347_vm1, %v2679_v56 }
  0x43   : >> { %2451 = vmatpush3.bf16.msra.mxu0 %v2680_v57  ;;  %2452 = vmatprep.mubr.msk.bf16.mxu0 %vm2728_vm0, %v2727_v3 }
  0x44   : >> { %2456 = vmatprep.subr.bf16.mxu0 %v2727_v3 }
  0x47   : >> { %2399 = vmatmul.mubr.msk.bf16.vlgmr.msra.gmra.mrb[0].mxu1 %vm347_vm1, %v590_v58 }
  0x48   : >> { %2403 = vmatpush3.bf16.msra.mxu1 %v2681_v59  ;;  %2404 = vmatprep.mubr.msk.bf16.mxu1 %vm2728_vm0, %v2727_v3 }
  0x49   : >> { %2408 = vmatprep.subr.bf16.mxu1 %v2727_v3 }
  0x4e   : >> { %2453 = vmatmul.mubr.msk.bf16.vlgmr.msra.gmra.mrb[0].mxu0 %vm347_vm1, %v1162_v60 }
  0x4f   : >> { %2457 = vmatpush3.bf16.msra.mxu0 %v2683_v63  ;;  %2458 = vmatprep.mubr.msk.bf16.mxu0 %vm2728_vm0, %v2727_v3 }
  0x50   : >> { %2462 = vmatprep.subr.bf16.mxu0 %v2727_v3 }
  0x53   : >> { %2405 = vmatmul.mubr.msk.bf16.vlgmr.msra.gmra.mrb[0].mxu1 %vm347_vm1, %v649_v2 }
  0x54   : >> { %2409 = vmatpush3.bf16.msra.mxu1 %v2684_v4  ;;  %2410 = vmatprep.mubr.msk.bf16.mxu1 %vm2728_vm0, %v2727_v3 }
  0x55   : >> { %2414 = vmatprep.subr.bf16.mxu1 %v2727_v3 }
  0x5a   : >> { %2459 = vmatmul.mubr.msk.bf16.vlgmr.msra.gmra.mrb[0].mxu0 %vm347_vm1, %v1223_v9 }
  0x5b   : >> { %2463 = vmatpush3.bf16.msra.mxu0 %v2685_v10  ;;  %2464 = vmatprep.mubr.msk.bf16.mxu0 %vm2728_vm0, %v2727_v3 }
  0x5c   : >> { %2468 = vmatprep.subr.bf16.mxu0 %v2727_v3 }
  0x5f   : >> { %2411 = vmatmul.mubr.msk.bf16.vlgmr.msra.gmra.mrb[0].mxu1 %vm347_vm1, %v2871_v22 }
  0x60   : >> { %2415 = vmatpush3.bf16.msra.mxu1 %v2686_v11  ;;  %2416 = vmatprep.mubr.msk.bf16.mxu1 %vm2728_vm0, %v2727_v3 }
  0x61   : >> { %2420 = vmatprep.subr.bf16.mxu1 %v2727_v3 }
  0x66   : >> { %2465 = vmatmul.mubr.msk.bf16.vlgmr.msra.gmra.mrb[0].mxu0 %vm347_vm1, %v1294_v48 }
  0x67   : >> { %2469 = vmatpush3.bf16.msra.mxu0 %v2688_v12  ;;  %2470 = vmatprep.mubr.msk.bf16.mxu0 %vm2728_vm0, %v2727_v3 }
  0x68   : >> { %2474 = vmatprep.subr.bf16.mxu0 %v2727_v3 }
  0x6b   : >> { %2417 = vmatmul.mubr.msk.bf16.vlgmr.msra.gmra.mrb[0].mxu1 %vm347_vm1, %v783_v13 }
  0x6c   : >> { %2421 = vmatpush3.bf16.msra.mxu1 %v2689_v14  ;;  %2422 = vmatprep.mubr.msk.bf16.mxu1 %vm2728_vm0, %v2727_v3 }
  0x72   : >> { %2471 = vmatmul.mubr.msk.bf16.vlgmr.msra.gmra.mrb[0].mxu0 %vm347_vm1, %v1350_v17 }
  0x73   : >> { %2475 = vmatpush3.bf16.msra.mxu0 %v2690_v18  ;;  %2476 = vmatprep.mubr.msk.bf16.mxu0 %vm2728_vm0, %v2727_v3 }
  0x77   : >> { %2423 = vmatmul.mubr.msk.bf16.vlgmr.msra.gmra.mrb[0].mxu1 %vm347_vm1, %v844_v19 }
  0x7e   : >> { %2477 = vmatmul.mubr.msk.bf16.vlgmr.msra.gmra.mrb[0].mxu0 %vm347_vm1, %v2906_v49 }
 0x14a   : >> { %v888_v20 = vpop.f32.mrb[0].mxu1 }
 0x14b   : >> { %v2424_v21 = vpop.f32.mrb[1].mxu1  ;;  %v2534_v24 = vadd.f32 %v2782_v0, %v888_v20 }
 0x14c   : >> { %v891_v22 = vpop.f32.mrb[2].mxu1 }
 0x14d   : >> { %v2425_v23 = vpop.f32.mrb[3].mxu1  ;;  %v2536_v26 = vadd.f32 %v2782_v0, %v891_v22 }
 0x151   : >> { %v1452_v25 = vpop.f32.mrb[0].mxu0 }
 0x152   : >> { %v2535_v27 = vadd.f32 %v2534_v24, %v1452_v25  ;;  %v2478_v28 = vpop.f32.mrb[1].mxu0 }
 0x153   : >> { %v1455_v29 = vpop.f32.mrb[2].mxu0 }
 0x154   : >> { %v1461_v30 = vmax.f32 %v2535_v27, 0.0  ;;  %v2537_v3 = vadd.f32 %v2536_v26, %v1455_v29  ;;  %v2479_v31 = vpop.f32.mrb[3].mxu0  ;;  %320 = sbr.rel (!%p318_p4) target bundleno = 18 (0x12), region = 130 }
 0x156   : >> { %v2311_v32 = vpack.c.bf16 %v1461_v30, %v1461_v30  ;;  %v1462_v33 = vmax.f32 %v2537_v3, 0.0 }
 0x158   : >> { %1474 = vst.msk [vmem:[%s1472_s28] sm:$0xf] %vm1473_vm4, %v2311_v32  ;;  %v2312_v34 = vpack.c.bf16 %v1462_v33, %v1462_v33 }
 0x15a   : >> { %1476 = vst.msk [vmem:[%s1472_s28 + $0x4] sm:$0x7] %vm1475_vm5, %v2312_v34 }
 0x15b LB: >> { %v2691_v35 = vld [vmem:[%s3098_s5] sm:$0xff]   ;;  %v2729_v36 = vmov 0.0   ;;  %vm2730_vm6 = vmmov 0   ;;  %s2314_s11 = sshll.u32 %s2725_s29, 3  ;;  %v2696_v37 = vld [vmem:[%s3098_s5 + $0x8] sm:$0xff]   ;;  %v2698_v49 = vld [vmem:[%s3098_s5 + $0x10] sm:$0xff]   ;;  %s2725_s29 = sphi %s3005_s29, %s1482_s29  }
 0x15c   : >> { %2480 = vmatprep.subr.bf16.mxu1 %v2729_v36  ;;  %2504 = vmatprep.subr.bf16.mxu0 %v2729_v36  ;;  %v2693_v0 = vld [vmem:[%s3098_s5 + $0x20] sm:$0xff]   ;;  %s3028_s9 = scalar_lea.vmem [#allocation2], %s2314_s11  ;;  %v2695_v44 = vld [vmem:[%s3098_s5 + $0x28] sm:$0xff]   ;;  %v2697_v51 = vld [vmem:[%s3098_s5 + $0x30] sm:$0xff]   ;;  %s2040_s30 = scalar_lea.vmem %s2802_s18, %s2314_s11  ;;  %vm2043_vm7 = vcmask 123904  }
 0x15d   : >> { %2481 = vmatpush3.bf16.msra.mxu1 %v2691_v35  ;;  %2482 = vmatprep.mubr.msk.bf16.mxu1 %vm2730_vm6, %v2729_v36  ;;  %v2701_v53 = vld [vmem:[%s3098_s5 + $0x18] sm:$0xff]   ;;  %v2702_v60 = vld [vmem:[%s3098_s5 + $0x40] sm:$0xff]   ;;  %s1482_s29 = sadd.s32 1, %s2725_s29  }
 0x15e   : >> { %2505 = vmatpush3.bf16.msra.mxu0 %v2693_v0  ;;  %2506 = vmatprep.mubr.msk.bf16.mxu0 %vm2730_vm6, %v2729_v36  ;;  %v2700_v55 = vld [vmem:[%s3098_s5 + $0x38] sm:$0xff]   ;;  %p1479_p5 = scmp.ge.s32.totalorder %s1482_s29, 12  }
 0x15f   : >> { %2510 = vmatprep.subr.bf16.mxu0 %v2729_v36  ;;  %2486 = vmatprep.subr.bf16.mxu1 %v2729_v36 }
 0x161   : >> { %v2692_v38 = vld [vmem:[%s3028_s9] sm:$0x7f]   ;;  %v2694_v39 = vld [vmem:[%s3028_s9 + $0x8] sm:$0x7f]   ;;  %v2699_v54 = vld [vmem:[%s3028_s9 + $0x10] sm:$0x7f]  }
 0x162   : >> { %2483 = vmatmul.mubr.msk.bf16.vlgmr.msra.gmra.mrb[0].mxu1 %vm347_vm1, %v2692_v38  ;;  %v1553_v40 = vshll.u32 %v2692_v38, 16  ;;  %v1734_v41 = vshrl.u32 %v2694_v39, 16  ;;  %v1736_v42 = vshll.u32 %v2694_v39, 16  ;;  %v1551_v45 = vshrl.u32 %v2692_v38, 16 }
 0x163   : >> { %2487 = vmatpush3.bf16.msra.mxu1 %v2696_v37  ;;  %2488 = vmatprep.mubr.msk.bf16.mxu1 %vm2730_vm6, %v2729_v36  ;;  %v1795_v50 = vrot.slane %v2694_v39, 1  ;;  %v1612_v52 = vrot.slane %v2692_v38, 1  ;;  %v1919_v56 = vshll.u32 %v2699_v54, 16  ;;  %v1917_v57 = vshrl.u32 %v2699_v54, 16 }
 0x164   : >> { %2492 = vmatprep.subr.bf16.mxu1 %v2729_v36  ;;  %v1738_v43 = vrot.slane %v1736_v42, 1  ;;  %v1555_v46 = vrot.slane %v1553_v40, 1  ;;  %v1978_v61 = vrot.slane %v2699_v54, 1 }
 0x165   : >> { %v1921_v58 = vrot.slane %v1919_v56, 1 }
 0x166   : >> { %v1739_v47 = vor.u32 %v1738_v43, %v1734_v41  ;;  %v1556_v48 = vor.u32 %v1555_v46, %v1551_v45 }
 0x167   : >> { %v1922_v59 = vor.u32 %v1921_v58, %v1917_v57 }
 0x168   : >> { %2507 = vmatmul.mubr.msk.bf16.vlgmr.msra.gmra.mrb[0].mxu0 %vm347_vm1, %v1739_v47 }
 0x169   : >> { %2511 = vmatpush3.bf16.msra.mxu0 %v2695_v44  ;;  %2512 = vmatprep.mubr.msk.bf16.mxu0 %vm2730_vm6, %v2729_v36 }
 0x16a   : >> { %2516 = vmatprep.subr.bf16.mxu0 %v2729_v36 }
 0x16e   : >> { %2489 = vmatmul.mubr.msk.bf16.vlgmr.msra.gmra.mrb[0].mxu1 %vm347_vm1, %v1556_v48 }
 0x16f   : >> { %2493 = vmatpush3.bf16.msra.mxu1 %v2698_v49  ;;  %2494 = vmatprep.mubr.msk.bf16.mxu1 %vm2730_vm6, %v2729_v36 }
 0x170   : >> { %2498 = vmatprep.subr.bf16.mxu1 %v2729_v36 }
 0x174   : >> { %2513 = vmatmul.mubr.msk.bf16.vlgmr.msra.gmra.mrb[0].mxu0 %vm347_vm1, %v1795_v50 }
 0x175   : >> { %2517 = vmatpush3.bf16.msra.mxu0 %v2697_v51  ;;  %2518 = vmatprep.mubr.msk.bf16.mxu0 %vm2730_vm6, %v2729_v36 }
 0x176   : >> { %2522 = vmatprep.subr.bf16.mxu0 %v2729_v36 }
 0x17a   : >> { %2495 = vmatmul.mubr.msk.bf16.vlgmr.msra.gmra.mrb[0].mxu1 %vm347_vm1, %v1612_v52 }
 0x17b   : >> { %2499 = vmatpush3.bf16.msra.mxu1 %v2701_v53  ;;  %2500 = vmatprep.mubr.msk.bf16.mxu1 %vm2730_vm6, %v2729_v36 }
 0x180   : >> { %2519 = vmatmul.mubr.msk.bf16.vlgmr.msra.gmra.mrb[0].mxu0 %vm347_vm1, %v2699_v54 }
 0x181   : >> { %2523 = vmatpush3.bf16.msra.mxu0 %v2700_v55  ;;  %2524 = vmatprep.mubr.msk.bf16.mxu0 %vm2730_vm6, %v2729_v36 }
 0x182   : >> { %2528 = vmatprep.subr.bf16.mxu0 %v2729_v36 }
 0x186   : >> { %2501 = vmatmul.mubr.msk.bf16.vlgmr.msra.gmra.mrb[0].mxu1 %vm347_vm1, %v2694_v39 }
 0x18c   : >> { %2525 = vmatmul.mubr.msk.bf16.vlgmr.msra.gmra.mrb[0].mxu0 %vm347_vm1, %v1922_v59 }
 0x18d   : >> { %2529 = vmatpush3.bf16.msra.mxu0 %v2702_v60  ;;  %2530 = vmatprep.mubr.msk.bf16.mxu0 %vm2730_vm6, %v2729_v36 }
 0x198   : >> { %2531 = vmatmul.mubr.msk.bf16.vlgmr.msra.gmra.mrb[0].mxu0 %vm347_vm1, %v1978_v61 }
 0x259   : >> { %v1722_v62 = vpop.f32.mrb[0].mxu1 }
 0x25a   : >> { %v2502_v63 = vpop.f32.mrb[1].mxu1  ;;  %v2602_v5 = vadd.f32 %v2787_v1, %v1722_v62 }
 0x25b   : >> { %v1725_v2 = vpop.f32.mrb[2].mxu1 }
 0x25c   : >> { %v2503_v4 = vpop.f32.mrb[3].mxu1  ;;  %v2604_v8 = vadd.f32 %v2787_v1, %v1725_v2 }
 0x26b   : >> { %v2022_v6 = vpop.f32.mrb[0].mxu0 }
 0x26c   : >> { %v2603_v9 = vadd.f32 %v2602_v5, %v2022_v6  ;;  %v2532_v10 = vpop.f32.mrb[1].mxu0  ;;  %1481 = sbr.rel (!%p1479_p5) target bundleno = 347 (0x15b), region = 141 }
 0x26d   : >> { %v2025_v11 = vpop.f32.mrb[2].mxu0 }
 0x26e   : >> { %v2315_v12 = vpack.c.bf16 %v2603_v9, %v2603_v9  ;;  %v2605_v13 = vadd.f32 %v2604_v8, %v2025_v11  ;;  %v2533_v14 = vpop.f32.mrb[3].mxu0 }
 0x270   : >> { %2042 = vst.msk [vmem:[%s2040_s30] sm:$0xf] %vm1473_vm4, %v2315_v12  ;;  %v2316_v15 = vpack.c.bf16 %v2605_v13, %v2605_v13 }
 0x272   : >> { %2044 = vst.msk [vmem:[%s2040_s30 + $0x4] sm:$0x3] %vm2043_vm7, %v2316_v15 }
 0x273 PF: > { %s17_s24 = sadd.s32 1, %s2717_s24  }
 0x274   : > { %p14_p6 = scmp.ge.s32.totalorder %s17_s24, 4  }
 0x276   :  { %16 = sbr.rel (!%p14_p6) target bundleno = 1 (0x1), region = 152 }

// kernel: decoder_forward.7
= control target key start
LH: loop header
LB: loop body
LE: loop exit
PB: predicated region body
PF: predicated region fallthrough
CT: control target
= control target key end

     0   :  { %s3089_s24 = smov 0   ;;  %s3501_s0 = inlined_call_operand.vmem [shape: bf16[2,24,24,8], index: 0, kind: input, shape index: {}]   ;;  %s3502_s1 = inlined_call_operand.vmem [shape: bf16[2,28,28,8], index: 1, kind: input, shape index: {}]   ;;  %s3503_s2 = inlined_call_operand.vmem [shape: bf16[9,8,8], index: 2, kind: input, shape index: {}]   ;;  %s3504_s3 = inlined_call_operand.vmem [shape: bf16[9,8,8], index: 3, kind: input, shape index: {}]   ;;  %s3505_s4 = inlined_call_operand.vmem [shape: f32[1,8], index: 4, kind: input, shape index: {}]   ;;  %s3506_s5 = inlined_call_operand.vmem [shape: bf16[9,8,8], index: 5, kind: input, shape index: {}]   ;;  %s3507_s6 = inlined_call_operand.vmem [shape: f32[1,8], index: 6, kind: input, shape index: {}]   ;;  %s3508_s7 = inlined_call_operand.vmem [shape: f32[2,20,20,8], index: 7, kind: output, shape index: {}]  }
   0x1 LB: > { %s2453_s25 = sadd.s32 4294967295, %s3039_s24   ;;  %p2457_p0 = scmp.ge.s32.totalorder %s3039_s24, 1  ;;  %s3039_s24 = sphi %s3089_s24, %s17_s24  }
   0x2   : > { %p247_p1 = scmp.lt.s32.totalorder %s3039_s24, 3 }
   0x4   : > { %p248_p2 = pnand %p2457_p0, %p247_p1 }
   0x5   : > { %p284_p3 = scmp.lt.s32.totalorder (!%p248_p2), %s2453_s25, 1  ;;  %v3100_v0 = vld [vmem:[%s3505_s4] ss:$0 sm:$0xff] (!%p248_p2)  ;;  %s3122_s19 = smov (!%p248_p2), 0  }
   0x6   : > { %251 = sbr.rel (%p248_p2) target bundleno = 633 (0x279), region = 48  ;;  %v3105_v1 = vld [vmem:[%s3507_s6] ss:$0 sm:$0xff] (!%p248_p2) }
   0xd   : > { %s3510_s25 = smov (!%p284_p3, %s2453_s25), 1 }
   0xe   : > { %s2977_s30 = smul.u32 288, %s3510_s25 }
   0xf   : > { %s2978_s8 = smul.u32 448, %s3510_s25 }
  0x10   : > { %s3110_s11 = scalar_lea.vmem %s3501_s0, %s2977_s30  ;;  %s2979_s12 = smul.u32 480, %s3510_s25 }
  0x11   : > { %s3115_s15 = scalar_lea.vmem %s3502_s1, %s2978_s8 }
  0x12   : > { %s3120_s18 = scalar_lea.vmem %s3508_s7, %s2979_s12 }
  0x13 LB: >> { %v336_v2 = vld [vmem:[%s3503_s2] sm:$0xf]  ;;  %vm352_vm0 = vcmask 1043456   ;;  %v2511_v3 = vld [vmem:[%s3504_s3 + $0x10] sm:$0xf]  ;;  %s2597_s27 = smul.u32 12, %s3043_s19  ;;  %s3043_s19 = sphi %s3122_s19, %s321_s19  }
  0x14   : >> { %2950 = vmatprep.subr.msk.bf16.mxu1 %vm352_vm0, %v336_v2  ;;  %v354_v4 = vsel %vm352_vm0, %v336_v2, 0  ;;  %2959 = vmatprep.subr.msk.bf16.mxu0 %vm352_vm0, %v2511_v3  ;;  %v1032_v5 = vsel %vm352_vm0, %v2511_v3, 0  ;;  %v407_v6 = vld [vmem:[%s3504_s3] sm:$0xf]  ;;  %s2464_s28 = sshll.u32 %s3043_s19, 4  ;;  %vm345_vm1 = vcmask 64512  }
  0x15   : >> { %2685 = vmatpush3.bf16.msra.mxu1 %v354_v4  ;;  %2739 = vmatpush3.bf16.msra.mxu0 %v1032_v5  ;;  %v2515_v7 = vld [vmem:[%s3503_s2 + $0x14] sm:$0xf]  ;;  %s3146_s8 = scalar_lea.vmem %s3115_s15, %s2464_s28  ;;  %s3153_s9 = scalar_lea.vmem %s3110_s11, %s2597_s27  ;;  %v427_v10 = vsel %vm352_vm0, %v407_v6, 0  ;;  %v2477_v11 = vld [vmem:[%s3503_s2 + $0x4] sm:$0xf]  ;;  %vm416_vm3 = vcmask 1046528  }
  0x16   : >> { %2951 = vmatprep.subr.msk.bf16.mxu1 %vm352_vm0, %v407_v6  ;;  %2960 = vmatprep.subr.msk.bf16.mxu0 %vm352_vm0, %v2515_v7  ;;  %v3156_v8 = vld [vmem:[%s3146_s8 + $0x38] sm:$0xf]  ;;  %v3159_v9 = vld [vmem:[%s3153_s9] sm:$0xff]   ;;  %v3166_v12 = vld [vmem:[%s3153_s9 + $0x8] ss:$0 sps:$4 sm:$0xff]   ;;  %v1097_v43 = vsel %vm352_vm0, %v2515_v7, 0 }
  0x17   : >> { %v2497_v13 = vld [vmem:[%s3146_s8 + $0x3c] sm:$0x3]  ;;  %2686 = vmatprep.mubr.msk.bf16.mxu1 %vm345_vm1, %v3159_v9  ;;  %v3172_v14 = vld [vmem:[%s3146_s8 + $0x30] sm:$0xff]   ;;  %vm561_vm2 = vsmask.f32 6400  ;;  %v3181_v17 = vld [vmem:[%s3146_s8 + $0x20] sm:$0xff]   ;;  %v2505_v62 = vcombine.low %v3156_v8, %v3156_v8 }
  0x18   : >> { %v3175_v15 = vcombine.low %v3156_v8, %v2497_v13  ;;  %2687 = vmatmul.mubr.msk.bf16.vlgmr.msra.gmra.mrb[0].mxu1 %vm345_vm1, %v3166_v12  ;;  %v2467_v16 = vld [vmem:[%s3146_s8 + $0x28] sm:$0xf]  ;;  %v1009_v18 = vshrl.u32 %v3172_v14, 16  ;;  %v1012_v19 = vshll.u32 %v3172_v14, 16  ;;  %v2468_v22 = vld [vmem:[%s3146_s8 + $0x2c] sm:$0x3] }
  0x19   : >> { %2691 = vmatpush3.bf16.msra.mxu1 %v427_v10  ;;  %v2474_v23 = vcombine.low %v2467_v16, %v2467_v16  ;;  %v417_v24 = vrot.slane %v3181_v17, 1  ;;  %v3191_v25 = vld [vmem:[%s3153_s9 + $0xc] sm:$0xff]   ;;  %v3194_v30 = vld [vmem:[%s3153_s9 + $0x14] ss:$0 sps:$4 sm:$0xff]   ;;  %v483_v33 = vshrl.u32 %v3159_v9, 16  ;;  %v485_v34 = vshll.u32 %v3159_v9, 16 }
  0x1a   : >> { %v1017_v20 = vshrl.u32 %v3175_v15, 16  ;;  %v1020_v21 = vshll.u32 %v3175_v15, 16  ;;  %2952 = vmatprep.subr.msk.bf16.mxu1 %vm352_vm0, %v2477_v11  ;;  %v1011_v26 = vrot.slane %v1009_v18, 1  ;;  %v1014_v27 = vrot.slane %v1012_v19, 2  ;;  %v2518_v46 = vld [vmem:[%s3504_s3 + $0x14] sm:$0xf] }
  0x1b   : >> { %v418_v31 = vrot.slane %v2474_v23, 1  ;;  %v1087_v32 = vrot.slane %v3191_v25, 1  ;;  %v1088_v37 = vrot.slane %v3194_v30, 1  ;;  %v489_v38 = vshll.u32 %v3166_v12, 16  ;;  %v2480_v54 = vld [vmem:[%s3504_s3 + $0x4] sm:$0xf] }
  0x1c   : >> { %v1019_v28 = vrot.slane %v1017_v20, 1  ;;  %v1022_v29 = vrot.slane %v1020_v21, 2  ;;  %v1015_v35 = vor.u32 %v1014_v27, %v1011_v26  ;;  %v3202_v40 = vcombine.low %v2467_v16, %v2468_v22  ;;  %v2529_v6 = vld [vmem:[%s3503_s2 + $0x18] sm:$0xf]  ;;  %v2528_v7 = vld [vmem:[%s3146_s8 + $0x4c] sm:$0x3] }
  0x1d   : >> { %v419_v39 = vsel %vm416_vm3, %v417_v24, %v418_v31  ;;  %vm482_vm4 = vsmask.f32 7424  ;;  %v487_v41 = vrot.slane %v485_v34, 1  ;;  %v1089_v44 = vsel %vm416_vm3, %v1087_v32, %v1088_v37  ;;  %v2484_v16 = vld [vmem:[%s3503_s2 + $0x8] sm:$0xf]  ;;  %v3251_v18 = vld [vmem:[%s3146_s8 + $0x40] sm:$0xff]  }
  0x1e   : >> { %v1023_v36 = vor.u32 %v1022_v29, %v1019_v28  ;;  %2692 = vmatprep.mubr.msk.bf16.mxu1 %vm345_vm1, %v419_v39  ;;  %v491_v45 = vrot.slane %v489_v38, 1  ;;  %v503_v48 = vsel %vm352_vm0, %v2477_v11, 0  ;;  %v563_v49 = vshrl.u32 %v3181_v17, 16  ;;  %s1676_s26 = scalar_lea.vmem [#allocation2], %s2597_s27  ;;  %s321_s19 = sadd.s32 1, %s3043_s19  }
  0x1f   : >> { %v488_v47 = vor.u32 %v487_v41, %v483_v33  ;;  %v566_v51 = vshll.u32 %v3181_v17, 16  ;;  %v571_v52 = vshrl.u32 %v3202_v40, 16  ;;  %v574_v53 = vshll.u32 %v3202_v40, 16  ;;  %p318_p4 = scmp.ge.s32.totalorder %s321_s19, 22  }
  0x20   : >> { %v1024_v42 = vsel %vm561_vm2, %v1015_v35, %v1023_v36  ;;  %v565_v55 = vrot.slane %v563_v49, 1  ;;  %v1152_v59 = vrot.slane %v3172_v14, 2  ;;  %v1153_v60 = vrot.slane %v3175_v15, 2  ;;  %v2527_v15 = vld [vmem:[%s3146_s8 + $0x48] sm:$0xf]  ;;  %s3398_s28 = smov (%p318_p4), 0  }
  0x21   : >> { %2740 = vmatprep.mubr.msk.bf16.mxu0 %vm345_vm1, %v1024_v42  ;;  %v492_v50 = vsel %vm482_vm4, %v488_v47, %v491_v45  ;;  %v568_v56 = vrot.slane %v566_v51, 2  ;;  %v573_v57 = vrot.slane %v571_v52, 1  ;;  %v576_v58 = vrot.slane %v574_v53, 2  ;;  %v3301_v42 = vld [vmem:[%s3153_s9 + $0x20] ss:$0 sps:$4 sm:$0xff]  }
  0x22   : >> { %2741 = vmatmul.mubr.msk.bf16.vlgmr.msra.gmra.mrb[0].mxu0 %vm345_vm1, %v1023_v36  ;;  %v493_v61 = vshrl.u32 %v3166_v12, 16  ;;  %vm706_vm5 = vcmask 1045504   ;;  %v1162_v3 = vsel %vm352_vm0, %v2518_v46, 0  ;;  %v865_v10 = vrot.slane %v3172_v14, 1  ;;  %v2534_v36 = vld [vmem:[%s3504_s3 + $0x18] sm:$0xf] }
  0x23   : >> { %2745 = vmatpush3.bf16.msra.mxu0 %v1097_v43  ;;  %2746 = vmatprep.mubr.msk.bf16.mxu0 %vm345_vm1, %v1089_v44  ;;  %v569_v63 = vor.u32 %v568_v56, %v565_v55  ;;  %v577_v2 = vor.u32 %v576_v58, %v573_v57  ;;  %v1154_v4 = vsel %vm706_vm5, %v1152_v59, %v1153_v60  ;;  %v3240_v11 = vrot.slane %v2505_v62, 1 }
  0x24   : >> { %2961 = vmatprep.subr.msk.bf16.mxu0 %vm352_vm0, %v2518_v46  ;;  %2693 = vmatmul.mubr.msk.bf16.vlgmr.msra.gmra.mrb[0].mxu1 %vm345_vm1, %v418_v31  ;;  %v495_v5 = vor.u32 %v493_v61, %v491_v45  ;;  %v586_v8 = vsel %vm352_vm0, %v2480_v54, 0  ;;  %v3253_v14 = vcombine.low %v2527_v15, %v2528_v7  ;;  %v930_v20 = vshrl.u32 %v3191_v25, 16  ;;  %v3275_v31 = vld [vmem:[%s3153_s9 + $0x18] sm:$0xff]  }
  0x25   : >> { %2697 = vmatpush3.bf16.msra.mxu1 %v503_v48  ;;  %2698 = vmatprep.mubr.msk.bf16.mxu1 %vm345_vm1, %v492_v50  ;;  %v578_v13 = vsel %vm561_vm2, %v569_v63, %v577_v2  ;;  %v3257_v19 = vsel %vm416_vm3, %v865_v10, %v3240_v11  ;;  %v932_v21 = vshll.u32 %v3191_v25, 16  ;;  %v936_v22 = vshll.u32 %v3194_v30, 16  ;;  %v2539_v48 = vld [vmem:[%s3503_s2 + $0x1c] sm:$0xf]  ;;  %v2503_v63 = vld [vmem:[%s3504_s3 + $0xc] sm:$0xf] }
  0x26   : >> { %2953 = vmatprep.subr.msk.bf16.mxu1 %vm352_vm0, %v2480_v54  ;;  %v1596_v23 = vrot.slane %v3251_v18, 2  ;;  %v1597_v24 = vrot.slane %v3253_v14, 2  ;;  %v641_v32 = vrot.slane %v3159_v9, 1  ;;  %v642_v33 = vrot.slane %v3166_v12, 1  ;;  %v2487_v12 = vld [vmem:[%s3504_s3 + $0x8] sm:$0xf] }
  0x27   : >> { %v934_v26 = vrot.slane %v932_v21, 1  ;;  %v3267_v27 = vrot.slane %v936_v22, 1  ;;  %v1246_v35 = vsel %vm352_vm0, %v2529_v6, 0  ;;  %v2536_v38 = vcombine.low %v2527_v15, %v2527_v15  ;;  %v2542_v61 = vld [vmem:[%s3504_s3 + $0x1c] sm:$0xf] }
  0x28   : >> { %v3272_v28 = vsel %vm706_vm5, %v1596_v23, %v1597_v24  ;;  %v643_v9 = vsel %vm416_vm3, %v641_v32, %v642_v33  ;;  %v1309_v39 = vrot.slane %v3251_v18, 1  ;;  %v707_v43 = vrot.slane %v3181_v17, 2 }
  0x29   : >> { %v935_v29 = vor.u32 %v934_v26, %v930_v20  ;;  %v1310_v41 = vrot.slane %v2536_v38, 1  ;;  %v708_v44 = vrot.slane %v3202_v40, 2  ;;  %v1319_v45 = vsel %vm352_vm0, %v2534_v36, 0  ;;  %v2498_v40 = vld [vmem:[%s3503_s2 + $0xc] sm:$0xf] }
  0x2a   : >> { %v1376_v47 = vshll.u32 %v3275_v31, 16  ;;  %v717_v49 = vsel %vm352_vm0, %v2487_v12, 0  ;;  %v1374_v50 = vshrl.u32 %v3275_v31, 16  ;;  %v1380_v52 = vshll.u32 %v3301_v42, 16  ;;  %v2549_v26 = vld [vmem:[%s3504_s3 + $0x20] sm:$0xf] }
  0x2b   : >> { %v3281_v34 = vsel %vm482_vm4, %v935_v29, %v3267_v27  ;;  %v1311_v46 = vsel %vm416_vm3, %v1309_v39, %v1310_v41  ;;  %v709_v17 = vsel %vm706_vm5, %v707_v43, %v708_v44  ;;  %v1394_v55 = vsel %vm352_vm0, %v2539_v48, 0 }
  0x2c   : >> { %v1378_v51 = vrot.slane %v1376_v47, 1  ;;  %v1382_v54 = vrot.slane %v1380_v52, 1  ;;  %v1453_v56 = vshrl.u32 %v3251_v18, 16  ;;  %v1456_v58 = vshll.u32 %v3251_v18, 16 }
  0x2d   : >> { %v1461_v59 = vshrl.u32 %v3253_v14, 16  ;;  %v802_v62 = vsel %vm352_vm0, %v2498_v40, 0  ;;  %v875_v18 = vsel %vm352_vm0, %v2503_v63, 0  ;;  %v1531_v20 = vrot.slane %v3275_v31, 1 }
  0x2e   : >> { %2747 = vmatmul.mubr.msk.bf16.vlgmr.msra.gmra.mrb[0].mxu0 %vm345_vm1, %v1088_v37  ;;  %v651_v37 = vsel %vm352_vm0, %v2484_v16, 0  ;;  %v1379_v53 = vor.u32 %v1378_v51, %v1374_v50  ;;  %v1532_v21 = vrot.slane %v3301_v42, 1  ;;  %vm1680_vm6 = vcmask 59392  }
  0x2f   : >> { %2751 = vmatpush3.bf16.msra.mxu0 %v1162_v3  ;;  %2752 = vmatprep.mubr.msk.bf16.mxu0 %vm345_vm1, %v1154_v4  ;;  %v1458_v3 = vrot.slane %v1456_v58, 2  ;;  %v1463_v4 = vrot.slane %v1461_v59, 1  ;;  %vm1677_vm7 = vcmask 60416  }
  0x30   : >> { %2962 = vmatprep.subr.msk.bf16.mxu0 %vm352_vm0, %v2529_v6  ;;  %2699 = vmatmul.mubr.msk.bf16.vlgmr.msra.gmra.mrb[0].mxu1 %vm345_vm1, %v495_v5  ;;  %v1383_v57 = vsel %vm482_vm4, %v1379_v53, %v1382_v54  ;;  %v1384_v6 = vshrl.u32 %v3301_v42, 16  ;;  %v1533_v23 = vsel %vm416_vm3, %v1531_v20, %v1532_v21 }
  0x31   : >> { %2703 = vmatpush3.bf16.msra.mxu1 %v586_v8  ;;  %2704 = vmatprep.mubr.msk.bf16.mxu1 %vm345_vm1, %v578_v13  ;;  %v1476_v13 = vsel %vm352_vm0, %v2542_v61, 0 }
  0x32   : >> { %2954 = vmatprep.subr.msk.bf16.mxu1 %vm352_vm0, %v2484_v16  ;;  %v1386_v8 = vor.u32 %v1384_v6, %v1382_v54  ;;  %v2546_v16 = vld [vmem:[%s3503_s2 + $0x20] sm:$0xf] }
  0x33   : >> { %v1541_v22 = vsel %vm352_vm0, %v2546_v16, 0 }
  0x3a   : >> { %2753 = vmatmul.mubr.msk.bf16.vlgmr.msra.gmra.mrb[0].mxu0 %vm345_vm1, %v1153_v60  ;;  %v1464_v60 = vshll.u32 %v3253_v14, 16 }
  0x3b   : >> { %2757 = vmatpush3.bf16.msra.mxu0 %v1246_v35  ;;  %2758 = vmatprep.mubr.msk.bf16.mxu0 %vm345_vm1, %v3275_v31  ;;  %v1606_v31 = vsel %vm352_vm0, %v2549_v26, 0 }
  0x3c   : >> { %2963 = vmatprep.subr.msk.bf16.mxu0 %vm352_vm0, %v2534_v36  ;;  %2705 = vmatmul.mubr.msk.bf16.vlgmr.msra.gmra.mrb[0].mxu1 %vm345_vm1, %v577_v2  ;;  %v1455_v2 = vrot.slane %v1453_v56, 1  ;;  %v1466_v5 = vrot.slane %v1464_v60, 2 }
  0x3d   : >> { %2709 = vmatpush3.bf16.msra.mxu1 %v651_v37  ;;  %2710 = vmatprep.mubr.msk.bf16.mxu1 %vm345_vm1, %v643_v9 }
  0x3e   : >> { %2955 = vmatprep.subr.msk.bf16.mxu1 %vm352_vm0, %v2487_v12  ;;  %v1459_v7 = vor.u32 %v1458_v3, %v1455_v2  ;;  %v1467_v10 = vor.u32 %v1466_v5, %v1463_v4 }
  0x40   : >> { %v1468_v15 = vsel %vm561_vm2, %v1459_v7, %v1467_v10 }
  0x46   : >> { %2759 = vmatmul.mubr.msk.bf16.vlgmr.msra.gmra.mrb[0].mxu0 %vm345_vm1, %v3301_v42 }
  0x47   : >> { %2763 = vmatpush3.bf16.msra.mxu0 %v1319_v45  ;;  %2764 = vmatprep.mubr.msk.bf16.mxu0 %vm345_vm1, %v1311_v46 }
  0x48   : >> { %2964 = vmatprep.subr.msk.bf16.mxu0 %vm352_vm0, %v2539_v48  ;;  %2711 = vmatmul.mubr.msk.bf16.vlgmr.msra.gmra.mrb[0].mxu1 %vm345_vm1, %v642_v33 }
  0x49   : >> { %2715 = vmatpush3.bf16.msra.mxu1 %v717_v49  ;;  %2716 = vmatprep.mubr.msk.bf16.mxu1 %vm345_vm1, %v709_v17 }
  0x4a   : >> { %2956 = vmatprep.subr.msk.bf16.mxu1 %vm352_vm0, %v2498_v40 }
  0x52   : >> { %2765 = vmatmul.mubr.msk.bf16.vlgmr.msra.gmra.mrb[0].mxu0 %vm345_vm1, %v1310_v41 }
  0x53   : >> { %2769 = vmatpush3.bf16.msra.mxu0 %v1394_v55  ;;  %2770 = vmatprep.mubr.msk.bf16.mxu0 %vm345_vm1, %v1383_v57 }
  0x54   : >> { %2965 = vmatprep.subr.msk.bf16.mxu0 %vm352_vm0, %v2542_v61  ;;  %2717 = vmatmul.mubr.msk.bf16.vlgmr.msra.gmra.mrb[0].mxu1 %vm345_vm1, %v708_v44 }
  0x55   : >> { %2721 = vmatpush3.bf16.msra.mxu1 %v802_v62  ;;  %2722 = vmatprep.mubr.msk.bf16.mxu1 %vm345_vm1, %v3191_v25  ;;  %v2508_v25 = vld [vmem:[%s3503_s2 + $0x10] sm:$0xf] }
  0x56   : >> { %2957 = vmatprep.subr.msk.bf16.mxu1 %vm352_vm0, %v2503_v63  ;;  %v950_v29 = vsel %vm352_vm0, %v2508_v25, 0 }
  0x5e   : >> { %2771 = vmatmul.mubr.msk.bf16.vlgmr.msra.gmra.mrb[0].mxu0 %vm345_vm1, %v1386_v8 }
  0x5f   : >> { %2775 = vmatpush3.bf16.msra.mxu0 %v1476_v13  ;;  %2776 = vmatprep.mubr.msk.bf16.mxu0 %vm345_vm1, %v1468_v15 }
  0x60   : >> { %2966 = vmatprep.subr.msk.bf16.mxu0 %vm352_vm0, %v2546_v16  ;;  %2723 = vmatmul.mubr.msk.bf16.vlgmr.msra.gmra.mrb[0].mxu1 %vm345_vm1, %v3194_v30 }
  0x61   : >> { %2727 = vmatpush3.bf16.msra.mxu1 %v875_v18  ;;  %2728 = vmatprep.mubr.msk.bf16.mxu1 %vm345_vm1, %v3257_v19  ;;  %v940_v19 = vshrl.u32 %v3194_v30, 16 }
  0x62   : >> { %2958 = vmatprep.subr.msk.bf16.mxu1 %vm352_vm0, %v2508_v25 }
  0x63   : >> { %v942_v32 = vor.u32 %v940_v19, %v3267_v27 }
  0x6a   : >> { %2777 = vmatmul.mubr.msk.bf16.vlgmr.msra.gmra.mrb[0].mxu0 %vm345_vm1, %v1467_v10 }
  0x6b   : >> { %2781 = vmatpush3.bf16.msra.mxu0 %v1541_v22  ;;  %2782 = vmatprep.mubr.msk.bf16.mxu0 %vm345_vm1, %v1533_v23 }
  0x6c   : >> { %2967 = vmatprep.subr.msk.bf16.mxu0 %vm352_vm0, %v2549_v26  ;;  %2729 = vmatmul.mubr.msk.bf16.vlgmr.msra.gmra.mrb[0].mxu1 %vm345_vm1, %v3240_v11 }
  0x6d   : >> { %2733 = vmatpush3.bf16.msra.mxu1 %v950_v29  ;;  %2734 = vmatprep.mubr.msk.bf16.mxu1 %vm345_vm1, %v3281_v34 }
  0x76   : >> { %2783 = vmatmul.mubr.msk.bf16.vlgmr.msra.gmra.mrb[0].mxu0 %vm345_vm1, %v1532_v21 }
  0x77   : >> { %2787 = vmatpush3.bf16.msra.mxu0 %v1606_v31  ;;  %2788 = vmatprep.mubr.msk.bf16.mxu0 %vm345_vm1, %v3272_v28 }
  0x78   : >> { %2735 = vmatmul.mubr.msk.bf16.vlgmr.msra.gmra.mrb[0].mxu1 %vm345_vm1, %v942_v32 }
  0x82   : >> { %2789 = vmatmul.mubr.msk.bf16.vlgmr.msra.gmra.mrb[0].mxu0 %vm345_vm1, %v1597_v24 }
 0x14b   : >> { %v2736_v11 = vpop.f32.mrb[0].mxu1 }
 0x14c   : >> { %v986_v33 = vpop.f32.mrb[1].mxu1  ;;  %v2846_v35 = vadd.f32 %v2736_v11, %v3100_v0 }
 0x14d   : >> { %v2737_v34 = vpop.f32.mrb[2].mxu1  ;;  %v2848_v27 = vadd.f32 %v3100_v0, %v986_v33 }
 0x14e   : >> { %v989_v30 = vpop.f32.mrb[3].mxu1 }
 0x14f   : >> { %v2850_v28 = vadd.f32 %v3100_v0, %v989_v30 }
 0x155   : >> { %v2790_v36 = vpop.f32.mrb[0].mxu0 }
 0x156   : >> { %v2847_v37 = vadd.f32 %v2846_v35, %v2790_v36  ;;  %v1642_v9 = vpop.f32.mrb[1].mxu0 }
 0x157   : >> { %v2849_v12 = vadd.f32 %v2848_v27, %v1642_v9  ;;  %v2791_v38 = vpop.f32.mrb[2].mxu0 }
 0x158   : >> { %v1661_v39 = vmax.f32 %v2847_v37, 0.0  ;;  %v1645_v14 = vpop.f32.mrb[3].mxu0 }
 0x159   : >> { %v1659_v24 = vmax.f32 %v2849_v12, 0.0  ;;  %v2851_v41 = vadd.f32 %v2850_v28, %v1645_v14  ;;  %320 = sbr.rel (!%p318_p4) target bundleno = 19 (0x13), region = 130 }
 0x15a   : >> { %v2600_v42 = vpack.c.bf16 %v1661_v39, %v1661_v39 }
 0x15b   : >> { %v2598_v43 = vpack.c.bf16 %v1659_v24, %v1659_v24  ;;  %v1660_v44 = vmax.f32 %v2851_v41, 0.0 }
 0x15c   : >> { %1681 = vst.msk [vmem:[%s1676_s26 + $0x8] sm:$0x7] %vm1680_vm6, %v2600_v42 }
 0x15d   : >> { %1678 = vst.msk [vmem:[%s1676_s26] sm:$0xf] %vm1677_vm7, %v2598_v43  ;;  %v2599_v45 = vpack.c.bf16 %v1660_v44, %v1660_v44 }
 0x15f   : >> { %1679 = vst.msk [vmem:[%s1676_s26 + $0x4] sm:$0xf] %vm1677_vm7, %v2599_v45 }
 0x160 LB: >> { %v1694_v46 = vld [vmem:[%s3506_s5] sm:$0xf]  ;;  %v2575_v47 = vld [vmem:[%s3506_s5 + $0x10] sm:$0xf]  ;;  %v2578_v48 = vld [vmem:[%s3506_s5 + $0x14] sm:$0xf]  ;;  %s3047_s28 = sphi %s3398_s28, %s1687_s28  }
 0x161   : >> { %2968 = vmatprep.subr.msk.bf16.mxu1 %vm352_vm0, %v1694_v46  ;;  %v1712_v0 = vsel %vm352_vm0, %v1694_v46, 0  ;;  %2972 = vmatprep.subr.msk.bf16.mxu0 %vm352_vm0, %v2575_v47  ;;  %v2006_v49 = vsel %vm352_vm0, %v2575_v47, 0  ;;  %v2561_v17 = vld [vmem:[%s3506_s5 + $0x4] sm:$0xf]  ;;  %s2602_s19 = smul.u32 12, %s3047_s28  ;;  %v2071_v10 = vsel %vm352_vm0, %v2578_v48, 0 }
 0x162   : >> { %2793 = vmatpush3.bf16.msra.mxu1 %v1712_v0  ;;  %2817 = vmatpush3.bf16.msra.mxu0 %v2006_v49  ;;  %v1788_v50 = vsel %vm352_vm0, %v2561_v17, 0  ;;  %v2564_v51 = vld [vmem:[%s3506_s5 + $0x8] sm:$0xf]  ;;  %v2584_v21 = vld [vmem:[%s3506_s5 + $0x18] sm:$0xf]  ;;  %s2341_s27 = smul.u32 24, %s3047_s28 }
 0x163   : >> { %2973 = vmatprep.subr.msk.bf16.mxu0 %vm352_vm0, %v2578_v48  ;;  %2969 = vmatprep.subr.msk.bf16.mxu1 %vm352_vm0, %v2561_v17  ;;  %s3422_s12 = scalar_lea.vmem [#allocation2], %s2602_s19  ;;  %v1854_v23 = vsel %vm352_vm0, %v2564_v51, 0  ;;  %v2570_v29 = vld [vmem:[%s3506_s5 + $0xc] sm:$0xf]  ;;  %v2148_v31 = vsel %vm352_vm0, %v2584_v21, 0  ;;  %s1687_s28 = sadd.s32 1, %s3047_s28  }
 0x164   : >> { %v2589_v11 = vld [vmem:[%s3506_s5 + $0x1c] sm:$0xf]  ;;  %v1931_v34 = vsel %vm352_vm0, %v2570_v29, 0  ;;  %v2592_v12 = vld [vmem:[%s3506_s5 + $0x20] sm:$0xf]  ;;  %s2342_s29 = scalar_lea.vmem %s3120_s18, %s2341_s27  ;;  %p1684_p5 = scmp.ge.s32.totalorder %s1687_s28, 20  }
 0x165   : >> { %v2223_v9 = vsel %vm352_vm0, %v2589_v11, 0  ;;  %v2288_v41 = vsel %vm352_vm0, %v2592_v12, 0 }
 0x166   : >> { %v3019_v40 = vld [vmem:[%s3422_s12] sm:$0xff]   ;;  %v3020_v52 = vld [vmem:[%s3422_s12 + $0x8] ss:$0 sps:$4 sm:$0x77]   ;;  %v3021_v53 = vld [vmem:[%s3422_s12 + $0xc] sm:$0xff]  }
 0x167   : >> { %2794 = vmatprep.mubr.msk.bf16.mxu1 %vm345_vm1, %v3019_v40  ;;  %v3434_v54 = vld [vmem:[%s3422_s12 + $0x14] ss:$0 sps:$4 sm:$0x77]   ;;  %v1986_v55 = vshrl.u32 %v3021_v53, 16  ;;  %v1988_v56 = vshll.u32 %v3021_v53, 16  ;;  %v1768_v57 = vshrl.u32 %v3019_v40, 16 }
 0x168   : >> { %2795 = vmatmul.mubr.msk.bf16.vlgmr.msra.gmra.mrb[0].mxu1 %vm345_vm1, %v3020_v52  ;;  %v1770_v58 = vshll.u32 %v3019_v40, 16  ;;  %v1774_v59 = vshll.u32 %v3020_v52, 16  ;;  %v2061_v60 = vrot.slane %v3021_v53, 1  ;;  %v1992_v62 = vshll.u32 %v3434_v54, 16  ;;  %v3023_v19 = vld [vmem:[%s3422_s12 + $0x18] sm:$0xff]  }
 0x169   : >> { %2799 = vmatpush3.bf16.msra.mxu1 %v1788_v50  ;;  %v1990_v61 = vrot.slane %v1988_v56, 1  ;;  %v1996_v63 = vshrl.u32 %v3434_v54, 16  ;;  %v2062_v2 = vrot.slane %v3434_v54, 1  ;;  %v1778_v7 = vshrl.u32 %v3020_v52, 16 }
 0x16a   : >> { %2970 = vmatprep.subr.msk.bf16.mxu1 %vm352_vm0, %v2564_v51  ;;  %v1772_v3 = vrot.slane %v1770_v58, 1  ;;  %v1776_v4 = vrot.slane %v1774_v59, 1  ;;  %v1994_v6 = vrot.slane %v1992_v62, 1  ;;  %v1844_v13 = vrot.slane %v3019_v40, 1 }
 0x16b   : >> { %v1991_v5 = vor.u32 %v1990_v61, %v1986_v55  ;;  %v2063_v18 = vsel %vm416_vm3, %v2061_v60, %v2062_v2  ;;  %v1845_v25 = vrot.slane %v3020_v52, 1  ;;  %v2205_v32 = vshll.u32 %v3023_v19, 16  ;;  %v3024_v33 = vld [vmem:[%s3422_s12 + $0x20] ss:$0 sps:$4 sm:$0x77]  }
 0x16c   : >> { %v1773_v8 = vor.u32 %v1772_v3, %v1768_v57  ;;  %v1998_v16 = vor.u32 %v1996_v63, %v1994_v6  ;;  %v1780_v22 = vor.u32 %v1778_v7, %v1776_v4  ;;  %v2203_v30 = vshrl.u32 %v3023_v19, 16 }
 0x16d   : >> { %v1995_v15 = vsel %vm482_vm4, %v1991_v5, %v1994_v6  ;;  %v1846_v26 = vsel %vm416_vm3, %v1844_v13, %v1845_v25  ;;  %v2207_v35 = vrot.slane %v2205_v32, 1  ;;  %v2209_v27 = vshll.u32 %v3024_v33, 16 }
 0x16e   : >> { %2818 = vmatprep.mubr.msk.bf16.mxu0 %vm345_vm1, %v1995_v15  ;;  %v1777_v20 = vsel %vm482_vm4, %v1773_v8, %v1776_v4  ;;  %v2213_v38 = vshrl.u32 %v3024_v33, 16  ;;  %v2278_v39 = vrot.slane %v3023_v19, 1  ;;  %v2279_v14 = vrot.slane %v3024_v33, 1 }
 0x16f   : >> { %2819 = vmatmul.mubr.msk.bf16.vlgmr.msra.gmra.mrb[0].mxu0 %vm345_vm1, %v1998_v16  ;;  %2800 = vmatprep.mubr.msk.bf16.mxu1 %vm345_vm1, %v1777_v20  ;;  %v2208_v36 = vor.u32 %v2207_v35, %v2203_v30  ;;  %v2211_v37 = vrot.slane %v2209_v27, 1 }
 0x170   : >> { %2823 = vmatpush3.bf16.msra.mxu0 %v2071_v10  ;;  %2824 = vmatprep.mubr.msk.bf16.mxu0 %vm345_vm1, %v2063_v18  ;;  %v2280_v42 = vsel %vm416_vm3, %v2278_v39, %v2279_v14 }
 0x171   : >> { %2974 = vmatprep.subr.msk.bf16.mxu0 %vm352_vm0, %v2584_v21  ;;  %v2212_v28 = vsel %vm482_vm4, %v2208_v36, %v2211_v37  ;;  %v2215_v24 = vor.u32 %v2213_v38, %v2211_v37 }
 0x174   : >> { %2801 = vmatmul.mubr.msk.bf16.vlgmr.msra.gmra.mrb[0].mxu1 %vm345_vm1, %v1780_v22 }
 0x175   : >> { %2805 = vmatpush3.bf16.msra.mxu1 %v1854_v23  ;;  %2806 = vmatprep.mubr.msk.bf16.mxu1 %vm345_vm1, %v1846_v26 }
 0x176   : >> { %2971 = vmatprep.subr.msk.bf16.mxu1 %vm352_vm0, %v2570_v29 }
 0x17b   : >> { %2825 = vmatmul.mubr.msk.bf16.vlgmr.msra.gmra.mrb[0].mxu0 %vm345_vm1, %v2062_v2 }
 0x17c   : >> { %2829 = vmatpush3.bf16.msra.mxu0 %v2148_v31  ;;  %2830 = vmatprep.mubr.msk.bf16.mxu0 %vm345_vm1, %v3023_v19 }
 0x17d   : >> { %2975 = vmatprep.subr.msk.bf16.mxu0 %vm352_vm0, %v2589_v11 }
 0x180   : >> { %2807 = vmatmul.mubr.msk.bf16.vlgmr.msra.gmra.mrb[0].mxu1 %vm345_vm1, %v1845_v25 }
 0x181   : >> { %2811 = vmatpush3.bf16.msra.mxu1 %v1931_v34  ;;  %2812 = vmatprep.mubr.msk.bf16.mxu1 %vm345_vm1, %v3021_v53 }
 0x187   : >> { %2831 = vmatmul.mubr.msk.bf16.vlgmr.msra.gmra.mrb[0].mxu0 %vm345_vm1, %v3024_v33 }
 0x188   : >> { %2835 = vmatpush3.bf16.msra.mxu0 %v2223_v9  ;;  %2836 = vmatprep.mubr.msk.bf16.mxu0 %vm345_vm1, %v2212_v28 }
 0x189   : >> { %2976 = vmatprep.subr.msk.bf16.mxu0 %vm352_vm0, %v2592_v12 }
 0x18c   : >> { %2813 = vmatmul.mubr.msk.bf16.vlgmr.msra.gmra.mrb[0].mxu1 %vm345_vm1, %v3434_v54 }
 0x193   : >> { %2837 = vmatmul.mubr.msk.bf16.vlgmr.msra.gmra.mrb[0].mxu0 %vm345_vm1, %v2215_v24 }
 0x194   : >> { %2841 = vmatpush3.bf16.msra.mxu0 %v2288_v41  ;;  %2842 = vmatprep.mubr.msk.bf16.mxu0 %vm345_vm1, %v2280_v42 }
 0x19f   : >> { %2843 = vmatmul.mubr.msk.bf16.vlgmr.msra.gmra.mrb[0].mxu0 %vm345_vm1, %v2279_v14 }
 0x25f   : >> { %v2814_v43 = vpop.f32.mrb[0].mxu1 }
 0x260   : >> { %v1967_v44 = vpop.f32.mrb[1].mxu1  ;;  %v2916_v47 = vadd.f32 %v2814_v43, %v3105_v1 }
 0x261   : >> { %v2815_v45 = vpop.f32.mrb[2].mxu1  ;;  %v2918_v48 = vadd.f32 %v3105_v1, %v1967_v44 }
 0x262   : >> { %v1970_v46 = vpop.f32.mrb[3].mxu1 }
 0x263   : >> { %v2920_v40 = vadd.f32 %v3105_v1, %v1970_v46 }
 0x272   : >> { %v2844_v0 = vpop.f32.mrb[0].mxu0  ;;  %1686 = sbr.rel (!%p1684_p5) target bundleno = 352 (0x160), region = 141 }
 0x273   : >> { %v2917_v49 = vadd.f32 %v2916_v47, %v2844_v0  ;;  %v2324_v17 = vpop.f32.mrb[1].mxu0 }
 0x274   : >> { %v2919_v50 = vadd.f32 %v2918_v48, %v2324_v17  ;;  %v2845_v51 = vpop.f32.mrb[2].mxu0 }
 0x275   : >> { %2346 = vst.msk [vmem:[%s2342_s29 + $0x10] sm:$0xf] %vm1677_vm7, %v2917_v49  ;;  %v2327_v52 = vpop.f32.mrb[3].mxu0 }
 0x276   : >> { %2343 = vst.msk [vmem:[%s2342_s29] sm:$0xff] %vm345_vm1, %v2919_v50  ;;  %v2921_v53 = vadd.f32 %v2920_v40, %v2327_v52 }
 0x278   : >> { %2344 = vst.msk [vmem:[%s2342_s29 + $0x8] sm:$0xff] %vm345_vm1, %v2921_v53 }
 0x279 PF: > { %s17_s24 = sadd.s32 1, %s3039_s24  }
 0x27a   : > { %p14_p6 = scmp.ge.s32.totalorder %s17_s24, 4  }
 0x27c   :  { %16 = sbr.rel (!%p14_p6) target bundleno = 1 (0x1), region = 152 }

</bundles_post_ra>
